<compile_context>
chip_gen: v7x
topology: tpu7x:2x2x1
jax: 0.10.0
libtpu: 0.0.40
codegen_flags: <defaults>
</compile_context>

<pallas_src>
import functools

import numpy as np
import jax
import jax.numpy as jnp
from jax.experimental import pallas as pl
from jax.experimental.pallas import tpu as pltpu


_VMEM_LIMIT = 32 * 1024 * 1024   # fits v5e/v6e (128 MiB phys) and v7x (64 MiB phys)
_TILE_M = 1024                   # row tile: a few MiB/buffer at these K/N (v7x-safe)


def _compiler_params():
    return pltpu.CompilerParams(
        dimension_semantics=("parallel",),   # shard row tiles across TCs on v7x
        vmem_limit_bytes=_VMEM_LIMIT,
    )


# ----------------------------------------------------------------------------
# Pallas kernel 1: Y = act(X @ W + b), M-tiled, bf16 MXU operands, f32 epilogue
# ----------------------------------------------------------------------------
def _mm_bias_relu_kernel(x_ref, w_ref, b_ref, o_ref, *, relu):
    y = jnp.dot(x_ref[...], w_ref[...], preferred_element_type=jnp.float32)
    y = y + b_ref[...].astype(jnp.float32)
    if relu:
        y = jnp.maximum(y, 0.0)
    o_ref[...] = y.astype(o_ref.dtype)


def matmul_bias_act(x, w, b, *, relu, out_dtype, tile_m=_TILE_M):
    """y = act(x @ w + b).  x:(M,K) bf16, w:(K,N) bf16, b:(N,) f32 -> (M,N)."""
    M, K = x.shape
    K2, N = w.shape
    assert K == K2, (K, K2)
    # Single full block when it fits, otherwise an (8,128)-aligned row tile;
    # the last (possibly partial) tile is masked on store, and each output row
    # only depends on its own input row, so padding rows are harmless.
    tm = M if M <= tile_m else tile_m
    grid = (pl.cdiv(M, tm),)
    cost = pl.CostEstimate(
        flops=2 * M * K * N,
        transcendentals=0,
        bytes_accessed=(x.size * x.dtype.itemsize
                        + w.size * w.dtype.itemsize
                        + N * 4
                        + M * N * jnp.dtype(out_dtype).itemsize))
    return pl.pallas_call(
        functools.partial(_mm_bias_relu_kernel, relu=relu),
        out_shape=jax.ShapeDtypeStruct((M, N), out_dtype),
        grid=grid,
        in_specs=[
            pl.BlockSpec((tm, K), lambda i: (i, 0)),   # streamed, double-buffered
            pl.BlockSpec((K, N), lambda i: (0, 0)),    # VMEM-resident weight
            pl.BlockSpec((1, N), lambda i: (0, 0)),    # VMEM-resident bias
        ],
        out_specs=pl.BlockSpec((tm, N), lambda i: (i, 0)),
        compiler_params=_compiler_params(),
        cost_estimate=cost,
    )(x, w, b.reshape(1, N))


# ----------------------------------------------------------------------------
# Pallas kernel 2: fused fc + critic head.
#   hidden = ReLU(x @ w_fc + b_fc);  value = hidden @ w_cr + b_cr
# ----------------------------------------------------------------------------
def _fc_critic_kernel(x_ref, wf_ref, bf_ref, wc_ref, bc_ref, h_ref, v_ref):
    h = jnp.dot(x_ref[...], wf_ref[...], preferred_element_type=jnp.float32)
    h = jnp.maximum(h + bf_ref[...].astype(jnp.float32), 0.0)
    h_ref[...] = h.astype(h_ref.dtype)
    v = jnp.dot(h, wc_ref[...], preferred_element_type=jnp.float32)
    v_ref[...] = (v + bc_ref[...].astype(jnp.float32)).astype(v_ref.dtype)


def fc_critic(x, w_fc, b_fc, w_cr, b_cr, *, tile_m=_TILE_M):
    M, K = x.shape
    _, H = w_fc.shape
    tm = M if M <= tile_m else tile_m
    grid = (pl.cdiv(M, tm),)
    cost = pl.CostEstimate(
        flops=2 * M * K * H + 2 * M * H,
        transcendentals=0,
        bytes_accessed=(x.size * x.dtype.itemsize
                        + w_fc.size * w_fc.dtype.itemsize
                        + (H + H + 1 + 1) * 4
                        + M * H * 4 + M * 4))
    return pl.pallas_call(
        _fc_critic_kernel,
        out_shape=(jax.ShapeDtypeStruct((M, H), jnp.float32),
                   jax.ShapeDtypeStruct((M, 1), jnp.float32)),
        grid=grid,
        in_specs=[
            pl.BlockSpec((tm, K), lambda i: (i, 0)),
            pl.BlockSpec((K, H), lambda i: (0, 0)),
            pl.BlockSpec((1, H), lambda i: (0, 0)),
            pl.BlockSpec((H, 1), lambda i: (0, 0)),
            pl.BlockSpec((1, 1), lambda i: (0, 0)),
        ],
        out_specs=(pl.BlockSpec((tm, H), lambda i: (i, 0)),
                   pl.BlockSpec((tm, 1), lambda i: (i, 0))),
        compiler_params=_compiler_params(),
        cost_estimate=cost,
    )(x, w_fc, b_fc.reshape(1, H), w_cr, b_cr.reshape(1, 1))


# ----------------------------------------------------------------------------
# im2col glue (pure index rearrangement in XLA; compute stays in the kernels).
# Feature order of the produced rows is (kh, kw, C).
# ----------------------------------------------------------------------------
def im2col(x_nhwc, kh, kw, stride):
    n, h, w, c = x_nhwc.shape
    oh = (h - kh) // stride + 1
    ow = (w - kw) // stride + 1
    cols = []
    for i in range(kh):
        for j in range(kw):
            cols.append(
                x_nhwc[:, i:i + stride * oh:stride, j:j + stride * ow:stride, :])
    p = jnp.stack(cols, axis=3)                       # (N, OH, OW, kh*kw, C)
    return p.reshape(n * oh * ow, kh * kw * c), oh, ow


# ----------------------------------------------------------------------------
# Parameters.
#   Reference layout (f32):
#     conv weight (kh*kw*Cin, Cout) with rows in (kh, kw, Cin) order
#       == torch_weight.permute(2, 3, 1, 0).reshape(-1, Cout)
#     linear weight (in, out) == torch_weight.T
#   prepare_params() then produces the kernel-ready params (folds /255 into w1,
#   folds PyTorch's (C,H,W) Flatten order into w_fc's rows, casts to bf16).
# ----------------------------------------------------------------------------
def init_reference_params(num_inputs, hidden_size, key):
    ks = jax.random.split(key, 5)
    ortho_relu = jax.nn.initializers.orthogonal(scale=float(np.sqrt(2.0)))
    ortho_one = jax.nn.initializers.orthogonal(scale=1.0)
    return {
        "w1": ortho_relu(ks[0], (8 * 8 * num_inputs, 32), jnp.float32),
        "b1": jnp.zeros((32,), jnp.float32),
        "w2": ortho_relu(ks[1], (4 * 4 * 32, 64), jnp.float32),
        "b2": jnp.zeros((64,), jnp.float32),
        "w3": ortho_relu(ks[2], (3 * 3 * 64, 32), jnp.float32),
        "b3": jnp.zeros((32,), jnp.float32),
        "w_fc": ortho_relu(ks[3], (32 * 7 * 7, hidden_size), jnp.float32),
        "b_fc": jnp.zeros((hidden_size,), jnp.float32),
        "w_cr": ortho_one(ks[4], (hidden_size, 1), jnp.float32),
        "b_cr": jnp.zeros((1,), jnp.float32),
    }


def prepare_params(ref):
    # fc row permutation: PyTorch flatten order is (c, h, w); our NHWC flatten
    # is (h, w, c).  Permuting w_fc's rows once at init removes the per-forward
    # transpose of the conv3 activation.
    perm = np.arange(32 * 7 * 7).reshape(32, 7, 7).transpose(1, 2, 0).reshape(-1)
    return {
        # fold the /255 input scaling into conv1's weight (x@(s*W) == (s*x)@W)
        "w1": (ref["w1"] * (1.0 / 255.0)).astype(jnp.bfloat16),
        "b1": ref["b1"],
        "w2": ref["w2"].astype(jnp.bfloat16),
        "b2": ref["b2"],
        "w3": ref["w3"].astype(jnp.bfloat16),
        "b3": ref["b3"],
        "w_fc": ref["w_fc"][perm].astype(jnp.bfloat16),
        "b_fc": ref["b_fc"],
        "w_cr": ref["w_cr"],          # N=1 head: keep f32, negligible cost
        "b_cr": ref["b_cr"],
    }


# ----------------------------------------------------------------------------
# Forward pass: returns (critic_value, hidden_features), like CNNBase.forward.
# ----------------------------------------------------------------------------
def cnn_base_forward(params, inputs_nchw):
    n = inputs_nchw.shape[0]
    # Raw 0..255 pixel values are exactly representable in bf16; the /255 scale
    # lives in w1, so cast first (halves the relayout bytes), then NCHW->NHWC.
    x = jnp.transpose(inputs_nchw.astype(jnp.bfloat16), (0, 2, 3, 1))

    # conv1 (8x8 / 4) + ReLU   (input scaling fused into w1)
    p, oh, ow = im2col(x, 8, 8, 4)
    x = matmul_bias_act(p, params["w1"], params["b1"], relu=True,
                        out_dtype=jnp.bfloat16).reshape(n, oh, ow, 32)

    # conv2 (4x4 / 2) + ReLU
    p, oh, ow = im2col(x, 4, 4, 2)
    x = matmul_bias_act(p, params["w2"], params["b2"], relu=True,
                        out_dtype=jnp.bfloat16).reshape(n, oh, ow, 64)

    # conv3 (3x3 / 1) + ReLU
    p, oh, ow = im2col(x, 3, 3, 1)
    x = matmul_bias_act(p, params["w3"], params["b3"], relu=True,
                        out_dtype=jnp.bfloat16).reshape(n, oh, ow, 32)

    # NHWC flatten; PyTorch's (C,H,W) order is already folded into w_fc's rows,
    # so no activation transpose.  fc(+ReLU) and the critic head run fused.
    x = x.reshape(n, oh * ow * 32)
    hidden, value = fc_critic(x, params["w_fc"], params["b_fc"],
                              params["w_cr"], params["b_cr"])
    return value, hidden


if __name__ == "__main__":
    # Small but architecture-consistent shapes: the conv stack requires 84x84
    # spatial input so that Flatten feeds Linear(32*7*7, hidden).
    batch, num_inputs, hidden_size = 2, 4, 32
    key = jax.random.PRNGKey(0)
    k_in, k_par = jax.random.split(key)

    inputs = jax.random.uniform(
        k_in, (batch, num_inputs, 84, 84), jnp.float32, 0.0, 255.0)
    params = prepare_params(init_reference_params(num_inputs, hidden_size, k_par))

    value, hidden = jax.jit(cnn_base_forward)(params, inputs)
    jax.block_until_ready((value, hidden))

    assert value.shape == (batch, 1), value.shape
    assert hidden.shape == (batch, hidden_size), hidden.shape
    assert bool(jnp.all(hidden >= 0.0))          # post-ReLU features
    assert bool(jnp.all(jnp.isfinite(value)))
    print("KERNEL_OK")
</pallas_src>

<mosaic_0001>
module attributes {stable_mosaic.version = 11 : i64} {
  func.func @_mm_bias_relu_kernel(%arg0: i32, %arg1: memref<800x256xbf16, #tpu.memory_space<vmem>>, %arg2: memref<256x32xbf16, #tpu.memory_space<vmem>>, %arg3: memref<1x32xf32, #tpu.memory_space<vmem>>, %arg4: memref<800x32xbf16, #tpu.memory_space<vmem>>) attributes {dimension_semantics = [#tpu.dimension_semantics<parallel>], iteration_bounds = array<i64: 1>, scalar_prefetch = 0 : i64, scratch_operands = 0 : i64, tpu.core_type = #tpu.core_type<tc>, window_params = [{transform_indices = @transform_0, window_bounds = array<i64: 800, 256>}, {pipeline_mode = #tpu.pipeline_mode<synchronous>, transform_indices = @transform_1, window_bounds = array<i64: 256, 32>}, {pipeline_mode = #tpu.pipeline_mode<synchronous>, transform_indices = @transform_2, window_bounds = array<i64: 1, 32>}, {transform_indices = @transform_3, window_bounds = array<i64: 800, 32>}]} {
    %c0 = arith.constant 0 : index
    %c0_0 = arith.constant 0 : index
    %0 = vector.load %arg1[%c0, %c0_0] : memref<800x256xbf16, #tpu.memory_space<vmem>>, vector<800x256xbf16>
    %c0_1 = arith.constant 0 : index
    %c0_2 = arith.constant 0 : index
    %1 = vector.load %arg2[%c0_1, %c0_2] : memref<256x32xbf16, #tpu.memory_space<vmem>>, vector<256x32xbf16>
    %cst = arith.constant dense<0.000000e+00> : vector<800x32xf32>
    %2 = tpu.matmul %0, %1, %cst {dimension_numbers = #tpu.dot_dimension_numbers<[1], [0], [0], [1], [0, 0, 1, 1], [], []>} : vector<800x256xbf16>, vector<256x32xbf16>, vector<800x32xf32> -> vector<800x32xf32>
    %c0_3 = arith.constant 0 : index
    %c0_4 = arith.constant 0 : index
    %3 = vector.load %arg3[%c0_3, %c0_4] : memref<1x32xf32, #tpu.memory_space<vmem>>, vector<1x32xf32>
    %4 = vector.broadcast %3 : vector<1x32xf32> to vector<800x32xf32>
    %5 = arith.addf %2, %4 : vector<800x32xf32>
    %cst_5 = arith.constant 0.000000e+00 : f32
    %6 = vector.broadcast %cst_5 : f32 to vector<800x32xf32>
    %7 = arith.maximumf %5, %6 : vector<800x32xf32>
    %8 = arith.truncf %7 : vector<800x32xf32> to vector<800x32xbf16>
    %c0_6 = arith.constant 0 : index
    %c0_7 = arith.constant 0 : index
    %9 = vector.load %arg4[%c0_6, %c0_7] : memref<800x32xbf16, #tpu.memory_space<vmem>>, vector<800x32xbf16>
    tpu.vector_store %arg4[%c0_6, %c0_7], %8 {strides = array<i32>} : memref<800x32xbf16, #tpu.memory_space<vmem>>, vector<800x32xbf16>,
    return
  }
  func.func @transform_0(%arg0: i32) -> (i32, i32) {
    %c0_i32 = arith.constant 0 : i32
    %c0_i32_0 = arith.constant 0 : i32
    return %arg0, %c0_i32 : i32, i32
  }
  func.func @transform_1(%arg0: i32) -> (i32, i32) {
    %c0_i32 = arith.constant 0 : i32
    %c0_i32_0 = arith.constant 0 : i32
    %c0_i32_1 = arith.constant 0 : i32
    return %c0_i32, %c0_i32_0 : i32, i32
  }
  func.func @transform_2(%arg0: i32) -> (i32, i32) {
    %c0_i32 = arith.constant 0 : i32
    %c0_i32_0 = arith.constant 0 : i32
    %c0_i32_1 = arith.constant 0 : i32
    return %c0_i32, %c0_i32_0 : i32, i32
  }
  func.func @transform_3(%arg0: i32) -> (i32, i32) {
    %c0_i32 = arith.constant 0 : i32
    %c0_i32_0 = arith.constant 0 : i32
    return %arg0, %c0_i32 : i32, i32
  }
}

module attributes {stable_mosaic.version = 11 : i64} {
  func.func @_mm_bias_relu_kernel(%arg0: i32, %arg1: memref<162x512xbf16, #tpu.memory_space<vmem>>, %arg2: memref<512x64xbf16, #tpu.memory_space<vmem>>, %arg3: memref<1x64xf32, #tpu.memory_space<vmem>>, %arg4: memref<162x64xbf16, #tpu.memory_space<vmem>>) attributes {dimension_semantics = [#tpu.dimension_semantics<parallel>], iteration_bounds = array<i64: 1>, scalar_prefetch = 0 : i64, scratch_operands = 0 : i64, tpu.core_type = #tpu.core_type<tc>, window_params = [{transform_indices = @transform_0, window_bounds = array<i64: 162, 512>}, {pipeline_mode = #tpu.pipeline_mode<synchronous>, transform_indices = @transform_1, window_bounds = array<i64: 512, 64>}, {pipeline_mode = #tpu.pipeline_mode<synchronous>, transform_indices = @transform_2, window_bounds = array<i64: 1, 64>}, {transform_indices = @transform_3, window_bounds = array<i64: 162, 64>}]} {
    %c0 = arith.constant 0 : index
    %c0_0 = arith.constant 0 : index
    %0 = vector.load %arg1[%c0, %c0_0] : memref<162x512xbf16, #tpu.memory_space<vmem>>, vector<162x512xbf16>
    %c0_1 = arith.constant 0 : index
    %c0_2 = arith.constant 0 : index
    %1 = vector.load %arg2[%c0_1, %c0_2] : memref<512x64xbf16, #tpu.memory_space<vmem>>, vector<512x64xbf16>
    %cst = arith.constant dense<0.000000e+00> : vector<162x64xf32>
    %2 = tpu.matmul %0, %1, %cst {dimension_numbers = #tpu.dot_dimension_numbers<[1], [0], [0], [1], [0, 0, 1, 1], [], []>} : vector<162x512xbf16>, vector<512x64xbf16>, vector<162x64xf32> -> vector<162x64xf32>
    %c0_3 = arith.constant 0 : index
    %c0_4 = arith.constant 0 : index
    %3 = vector.load %arg3[%c0_3, %c0_4] : memref<1x64xf32, #tpu.memory_space<vmem>>, vector<1x64xf32>
    %4 = vector.broadcast %3 : vector<1x64xf32> to vector<162x64xf32>
    %5 = arith.addf %2, %4 : vector<162x64xf32>
    %cst_5 = arith.constant 0.000000e+00 : f32
    %6 = vector.broadcast %cst_5 : f32 to vector<162x64xf32>
    %7 = arith.maximumf %5, %6 : vector<162x64xf32>
    %8 = arith.truncf %7 : vector<162x64xf32> to vector<162x64xbf16>
    %c0_6 = arith.constant 0 : index
    %c0_7 = arith.constant 0 : index
    %9 = vector.load %arg4[%c0_6, %c0_7] : memref<162x64xbf16, #tpu.memory_space<vmem>>, vector<162x64xbf16>
    tpu.vector_store %arg4[%c0_6, %c0_7], %8 {strides = array<i32>} : memref<162x64xbf16, #tpu.memory_space<vmem>>, vector<162x64xbf16>,
    return
  }
  func.func @transform_0(%arg0: i32) -> (i32, i32) {
    %c0_i32 = arith.constant 0 : i32
    %c0_i32_0 = arith.constant 0 : i32
    return %arg0, %c0_i32 : i32, i32
  }
  func.func @transform_1(%arg0: i32) -> (i32, i32) {
    %c0_i32 = arith.constant 0 : i32
    %c0_i32_0 = arith.constant 0 : i32
    %c0_i32_1 = arith.constant 0 : i32
    return %c0_i32, %c0_i32_0 : i32, i32
  }
  func.func @transform_2(%arg0: i32) -> (i32, i32) {
    %c0_i32 = arith.constant 0 : i32
    %c0_i32_0 = arith.constant 0 : i32
    %c0_i32_1 = arith.constant 0 : i32
    return %c0_i32, %c0_i32_0 : i32, i32
  }
  func.func @transform_3(%arg0: i32) -> (i32, i32) {
    %c0_i32 = arith.constant 0 : i32
    %c0_i32_0 = arith.constant 0 : i32
    return %arg0, %c0_i32 : i32, i32
  }
}

module attributes {stable_mosaic.version = 11 : i64} {
  func.func @_mm_bias_relu_kernel(%arg0: i32, %arg1: memref<98x576xbf16, #tpu.memory_space<vmem>>, %arg2: memref<576x32xbf16, #tpu.memory_space<vmem>>, %arg3: memref<1x32xf32, #tpu.memory_space<vmem>>, %arg4: memref<98x32xbf16, #tpu.memory_space<vmem>>) attributes {dimension_semantics = [#tpu.dimension_semantics<parallel>], iteration_bounds = array<i64: 1>, scalar_prefetch = 0 : i64, scratch_operands = 0 : i64, tpu.core_type = #tpu.core_type<tc>, window_params = [{transform_indices = @transform_0, window_bounds = array<i64: 98, 576>}, {pipeline_mode = #tpu.pipeline_mode<synchronous>, transform_indices = @transform_1, window_bounds = array<i64: 576, 32>}, {pipeline_mode = #tpu.pipeline_mode<synchronous>, transform_indices = @transform_2, window_bounds = array<i64: 1, 32>}, {transform_indices = @transform_3, window_bounds = array<i64: 98, 32>}]} {
    %c0 = arith.constant 0 : index
    %c0_0 = arith.constant 0 : index
    %0 = vector.load %arg1[%c0, %c0_0] : memref<98x576xbf16, #tpu.memory_space<vmem>>, vector<98x576xbf16>
    %c0_1 = arith.constant 0 : index
    %c0_2 = arith.constant 0 : index
    %1 = vector.load %arg2[%c0_1, %c0_2] : memref<576x32xbf16, #tpu.memory_space<vmem>>, vector<576x32xbf16>
    %cst = arith.constant dense<0.000000e+00> : vector<98x32xf32>
    %2 = tpu.matmul %0, %1, %cst {dimension_numbers = #tpu.dot_dimension_numbers<[1], [0], [0], [1], [0, 0, 1, 1], [], []>} : vector<98x576xbf16>, vector<576x32xbf16>, vector<98x32xf32> -> vector<98x32xf32>
    %c0_3 = arith.constant 0 : index
    %c0_4 = arith.constant 0 : index
    %3 = vector.load %arg3[%c0_3, %c0_4] : memref<1x32xf32, #tpu.memory_space<vmem>>, vector<1x32xf32>
    %4 = vector.broadcast %3 : vector<1x32xf32> to vector<98x32xf32>
    %5 = arith.addf %2, %4 : vector<98x32xf32>
    %cst_5 = arith.constant 0.000000e+00 : f32
    %6 = vector.broadcast %cst_5 : f32 to vector<98x32xf32>
    %7 = arith.maximumf %5, %6 : vector<98x32xf32>
    %8 = arith.truncf %7 : vector<98x32xf32> to vector<98x32xbf16>
    %c0_6 = arith.constant 0 : index
    %c0_7 = arith.constant 0 : index
    %9 = vector.load %arg4[%c0_6, %c0_7] : memref<98x32xbf16, #tpu.memory_space<vmem>>, vector<98x32xbf16>
    tpu.vector_store %arg4[%c0_6, %c0_7], %8 {strides = array<i32>} : memref<98x32xbf16, #tpu.memory_space<vmem>>, vector<98x32xbf16>,
    return
  }
  func.func @transform_0(%arg0: i32) -> (i32, i32) {
    %c0_i32 = arith.constant 0 : i32
    %c0_i32_0 = arith.constant 0 : i32
    return %arg0, %c0_i32 : i32, i32
  }
  func.func @transform_1(%arg0: i32) -> (i32, i32) {
    %c0_i32 = arith.constant 0 : i32
    %c0_i32_0 = arith.constant 0 : i32
    %c0_i32_1 = arith.constant 0 : i32
    return %c0_i32, %c0_i32_0 : i32, i32
  }
  func.func @transform_2(%arg0: i32) -> (i32, i32) {
    %c0_i32 = arith.constant 0 : i32
    %c0_i32_0 = arith.constant 0 : i32
    %c0_i32_1 = arith.constant 0 : i32
    return %c0_i32, %c0_i32_0 : i32, i32
  }
  func.func @transform_3(%arg0: i32) -> (i32, i32) {
    %c0_i32 = arith.constant 0 : i32
    %c0_i32_0 = arith.constant 0 : i32
    return %arg0, %c0_i32 : i32, i32
  }
}

module attributes {stable_mosaic.version = 11 : i64} {
  func.func @_fc_critic_kernel(%arg0: i32, %arg1: memref<2x1568xbf16, #tpu.memory_space<vmem>>, %arg2: memref<1568x32xbf16, #tpu.memory_space<vmem>>, %arg3: memref<1x32xf32, #tpu.memory_space<vmem>>, %arg4: memref<32x1xf32, #tpu.memory_space<vmem>>, %arg5: memref<1x1xf32, #tpu.memory_space<vmem>>, %arg6: memref<2x32xf32, #tpu.memory_space<vmem>>, %arg7: memref<2x1xf32, #tpu.memory_space<vmem>>) attributes {dimension_semantics = [#tpu.dimension_semantics<parallel>], iteration_bounds = array<i64: 1>, scalar_prefetch = 0 : i64, scratch_operands = 0 : i64, tpu.core_type = #tpu.core_type<tc>, window_params = [{transform_indices = @transform_0, window_bounds = array<i64: 2, 1568>}, {pipeline_mode = #tpu.pipeline_mode<synchronous>, transform_indices = @transform_1, window_bounds = array<i64: 1568, 32>}, {pipeline_mode = #tpu.pipeline_mode<synchronous>, transform_indices = @transform_2, window_bounds = array<i64: 1, 32>}, {pipeline_mode = #tpu.pipeline_mode<synchronous>, transform_indices = @transform_3, window_bounds = array<i64: 32, 1>}, {pipeline_mode = #tpu.pipeline_mode<synchronous>, transform_indices = @transform_4, window_bounds = array<i64: 1, 1>}, {transform_indices = @transform_5, window_bounds = array<i64: 2, 32>}, {transform_indices = @transform_6, window_bounds = array<i64: 2, 1>}]} {
    %c0 = arith.constant 0 : index
    %c0_0 = arith.constant 0 : index
    %0 = vector.load %arg1[%c0, %c0_0] : memref<2x1568xbf16, #tpu.memory_space<vmem>>, vector<2x1568xbf16>
    %c0_1 = arith.constant 0 : index
    %c0_2 = arith.constant 0 : index
    %1 = vector.load %arg2[%c0_1, %c0_2] : memref<1568x32xbf16, #tpu.memory_space<vmem>>, vector<1568x32xbf16>
    %cst = arith.constant dense<0.000000e+00> : vector<2x32xf32>
    %2 = tpu.matmul %0, %1, %cst {dimension_numbers = #tpu.dot_dimension_numbers<[1], [0], [0], [1], [0, 0, 1, 1], [], []>} : vector<2x1568xbf16>, vector<1568x32xbf16>, vector<2x32xf32> -> vector<2x32xf32>
    %c0_3 = arith.constant 0 : index
    %c0_4 = arith.constant 0 : index
    %3 = vector.load %arg3[%c0_3, %c0_4] : memref<1x32xf32, #tpu.memory_space<vmem>>, vector<1x32xf32>
    %4 = vector.broadcast %3 : vector<1x32xf32> to vector<2x32xf32>
    %5 = arith.addf %2, %4 : vector<2x32xf32>
    %cst_5 = arith.constant 0.000000e+00 : f32
    %6 = vector.broadcast %cst_5 : f32 to vector<2x32xf32>
    %7 = arith.maximumf %5, %6 : vector<2x32xf32>
    %c0_6 = arith.constant 0 : index
    %c0_7 = arith.constant 0 : index
    %8 = vector.load %arg6[%c0_6, %c0_7] : memref<2x32xf32, #tpu.memory_space<vmem>>, vector<2x32xf32>
    tpu.vector_store %arg6[%c0_6, %c0_7], %7 {strides = array<i32>} : memref<2x32xf32, #tpu.memory_space<vmem>>, vector<2x32xf32>,
    %c0_8 = arith.constant 0 : index
    %c0_9 = arith.constant 0 : index
    %9 = vector.load %arg4[%c0_8, %c0_9] : memref<32x1xf32, #tpu.memory_space<vmem>>, vector<32x1xf32>
    %cst_10 = arith.constant dense<0.000000e+00> : vector<2x1xf32>
    %10 = tpu.matmul %7, %9, %cst_10 {dimension_numbers = #tpu.dot_dimension_numbers<[1], [0], [0], [1], [0, 0, 1, 1], [], []>} : vector<2x32xf32>, vector<32x1xf32>, vector<2x1xf32> -> vector<2x1xf32>
    %c0_11 = arith.constant 0 : index
    %c0_12 = arith.constant 0 : index
    %11 = vector.load %arg5[%c0_11, %c0_12] : memref<1x1xf32, #tpu.memory_space<vmem>>, vector<1x1xf32>
    %12 = vector.broadcast %11 : vector<1x1xf32> to vector<2x1xf32>
    %13 = arith.addf %10, %12 : vector<2x1xf32>
    %c0_13 = arith.constant 0 : index
    %c0_14 = arith.constant 0 : index
    %14 = vector.load %arg7[%c0_13, %c0_14] : memref<2x1xf32, #tpu.memory_space<vmem>>, vector<2x1xf32>
    tpu.vector_store %arg7[%c0_13, %c0_14], %13 {strides = array<i32>} : memref<2x1xf32, #tpu.memory_space<vmem>>, vector<2x1xf32>,
    return
  }
  func.func @transform_0(%arg0: i32) -> (i32, i32) {
    %c0_i32 = arith.constant 0 : i32
    %c0_i32_0 = arith.constant 0 : i32
    return %arg0, %c0_i32 : i32, i32
  }
  func.func @transform_1(%arg0: i32) -> (i32, i32) {
    %c0_i32 = arith.constant 0 : i32
    %c0_i32_0 = arith.constant 0 : i32
    %c0_i32_1 = arith.constant 0 : i32
    return %c0_i32, %c0_i32_0 : i32, i32
  }
  func.func @transform_2(%arg0: i32) -> (i32, i32) {
    %c0_i32 = arith.constant 0 : i32
    %c0_i32_0 = arith.constant 0 : i32
    %c0_i32_1 = arith.constant 0 : i32
    return %c0_i32, %c0_i32_0 : i32, i32
  }
  func.func @transform_3(%arg0: i32) -> (i32, i32) {
    %c0_i32 = arith.constant 0 : i32
    %c0_i32_0 = arith.constant 0 : i32
    %c0_i32_1 = arith.constant 0 : i32
    return %c0_i32, %c0_i32_0 : i32, i32
  }
  func.func @transform_4(%arg0: i32) -> (i32, i32) {
    %c0_i32 = arith.constant 0 : i32
    %c0_i32_0 = arith.constant 0 : i32
    %c0_i32_1 = arith.constant 0 : i32
    return %c0_i32, %c0_i32_0 : i32, i32
  }
  func.func @transform_5(%arg0: i32) -> (i32, i32) {
    %c0_i32 = arith.constant 0 : i32
    %c0_i32_0 = arith.constant 0 : i32
    return %arg0, %c0_i32 : i32, i32
  }
  func.func @transform_6(%arg0: i32) -> (i32, i32) {
    %c0_i32 = arith.constant 0 : i32
    %c0_i32_0 = arith.constant 0 : i32
    return %arg0, %c0_i32 : i32, i32
  }
}

</mosaic_0001>

<bundles_post_ra>
// kernel: cnn_base_forward.4
= control target key start
LH: loop header
LB: loop body
LE: loop exit
PB: predicated region body
PF: predicated region fallthrough
CT: control target
= control target key end

     0   :  { %v2305_v0 = vmov 0   ;;  %vm1683_vm0 = vcmask 257024   ;;  %s3216_s1 = inlined_call_operand.vmem [shape: bf16[256,32], index: 1, kind: input, shape index: {}]   ;;  %s3217_s0 = inlined_call_operand.vmem [shape: bf16[800,256], index: 0, kind: input, shape index: {}]   ;;  %s3218_s2 = inlined_call_operand.vmem [shape: f32[1,32], index: 2, kind: input, shape index: {}]   ;;  %s3219_s3 = inlined_call_operand.vmem [shape: bf16[800,32], index: 3, kind: output, shape index: {}]  }
   0x1   :  { %750 = vmatprep.subr.bf16.mxu0 %v2305_v0  ;;  %2105 = vmatprep.subr.bf16.mxu1 %v2305_v0  ;;  %v2138_v1 = vld [vmem:[%s3216_s1] sm:$0xff]   ;;  %v2139_v2 = vld [vmem:[%s3216_s1 + $0x8] sm:$0xff]   ;;  %v2140_v3 = vld [vmem:[%s3216_s1 + $0x10] sm:$0xff]  }
   0x2   :  { %751 = vmatpush1.bf16.msra.mxu0 %v2138_v1  ;;  %2121 = vmatpush1.bf16.msra.mxu1 %v2138_v1  ;;  %v2141_v4 = vld [vmem:[%s3216_s1 + $0x18] sm:$0xff]   ;;  %v2142_v5 = vld [vmem:[%s3216_s1 + $0x20] sm:$0xff]   ;;  %v2143_v7 = vld [vmem:[%s3216_s1 + $0x28] sm:$0xff]  }
   0x3   :  { %752 = vmatprep.subr.bf16.mxu0 %v2305_v0  ;;  %2106 = vmatprep.subr.bf16.mxu1 %v2305_v0  ;;  %v2156_v6 = vld [vmem:[%s3217_s0 + $0x4] ss:$8 sps:$4 sm:$0xff]   ;;  %v2159_v8 = vld [vmem:[%s3217_s0 + $0x194] ss:$8 sps:$4 sm:$0xff]   ;;  %v2154_v19 = vld [vmem:[%s3217_s0] ss:$8 sps:$4 sm:$0xff]  }
   0x4   :  { %782 = vmatprep.mubr.bf16.mxu0 %v2156_v6  ;;  %982 = vmatprep.mubr.bf16.mxu1 %v2159_v8  ;;  %v2144_v9 = vld [vmem:[%s3216_s1 + $0x30] sm:$0xff]   ;;  %v2145_v10 = vld [vmem:[%s3216_s1 + $0x38] sm:$0xff]   ;;  %v2146_v11 = vld [vmem:[%s3216_s1 + $0x40] sm:$0xff]  }
   0x5   :  { %v2147_v12 = vld [vmem:[%s3216_s1 + $0x48] sm:$0xff]   ;;  %v2148_v13 = vld [vmem:[%s3216_s1 + $0x50] sm:$0xff]   ;;  %v2149_v14 = vld [vmem:[%s3216_s1 + $0x58] sm:$0xff]  }
   0x6   :  { %753 = vmatpush1.bf16.msra.mxu0 %v2139_v2  ;;  %2122 = vmatpush1.bf16.msra.mxu1 %v2139_v2  ;;  %v2150_v15 = vld [vmem:[%s3216_s1 + $0x60] sm:$0xff]   ;;  %v2151_v16 = vld [vmem:[%s3216_s1 + $0x68] sm:$0xff]   ;;  %v2152_v17 = vld [vmem:[%s3216_s1 + $0x70] sm:$0xff]  }
   0x7   :  { %754 = vmatprep.subr.bf16.mxu0 %v2305_v0  ;;  %2107 = vmatprep.subr.bf16.mxu1 %v2305_v0  ;;  %v2153_v18 = vld [vmem:[%s3216_s1 + $0x78] sm:$0xff]   ;;  %v2162_v22 = vld [vmem:[%s3217_s0 + $0x1a4] ss:$8 sps:$4 sm:$0xff]   ;;  %v2165_v24 = vld [vmem:[%s3217_s0 + $0x1a0] ss:$8 sps:$4 sm:$0xff]  }
   0x8   :  { %v2157_v20 = vld [vmem:[%s3217_s0 + $0x190] ss:$8 sps:$4 sm:$0xff]   ;;  %v2160_v21 = vld [vmem:[%s3217_s0 + $0x14] ss:$8 sps:$4 sm:$0xff]   ;;  %v2166_v25 = vld [vmem:[%s3217_s0 + $0x24] ss:$8 sps:$4 sm:$0xff]  }
   0x9   :  { %v2164_v23 = vld [vmem:[%s3217_s0 + $0x10] ss:$8 sps:$4 sm:$0xff]   ;;  %v2168_v26 = vld [vmem:[%s3217_s0 + $0x1b4] ss:$8 sps:$4 sm:$0xff]   ;;  %v2170_v27 = vld [vmem:[%s3217_s0 + $0x20] ss:$8 sps:$4 sm:$0xff]  }
   0xa   :  { %755 = vmatpush1.bf16.msra.mxu0 %v2140_v3  ;;  %2123 = vmatpush1.bf16.msra.mxu1 %v2140_v3  ;;  %v2171_v28 = vld [vmem:[%s3217_s0 + $0x1b0] ss:$8 sps:$4 sm:$0xff]   ;;  %v2172_v29 = vld [vmem:[%s3217_s0 + $0x34] ss:$8 sps:$4 sm:$0xff]   ;;  %v2174_v30 = vld [vmem:[%s3217_s0 + $0x1c4] ss:$8 sps:$4 sm:$0xff]  }
   0xb   :  { %756 = vmatprep.subr.bf16.mxu0 %v2305_v0  ;;  %2108 = vmatprep.subr.bf16.mxu1 %v2305_v0  ;;  %v2176_v31 = vld [vmem:[%s3217_s0 + $0x30] ss:$8 sps:$4 sm:$0xff]   ;;  %v2177_v32 = vld [vmem:[%s3217_s0 + $0x1c0] ss:$8 sps:$4 sm:$0xff]   ;;  %v2178_v33 = vld [vmem:[%s3217_s0 + $0x44] ss:$8 sps:$4 sm:$0xff]  }
   0xc   :  { %v2180_v34 = vld [vmem:[%s3217_s0 + $0x1d4] ss:$8 sps:$4 sm:$0xff]   ;;  %v2182_v35 = vld [vmem:[%s3217_s0 + $0x40] ss:$8 sps:$4 sm:$0xff]   ;;  %v2183_v36 = vld [vmem:[%s3217_s0 + $0x1d0] ss:$8 sps:$4 sm:$0xff]  }
   0xd   :  { %v2184_v37 = vld [vmem:[%s3217_s0 + $0x54] ss:$8 sps:$4 sm:$0xff]   ;;  %v2186_v38 = vld [vmem:[%s3217_s0 + $0x1e4] ss:$8 sps:$4 sm:$0xff]   ;;  %v2188_v39 = vld [vmem:[%s3217_s0 + $0x50] ss:$8 sps:$4 sm:$0xff]  }
   0xe   :  { %757 = vmatpush1.bf16.msra.mxu0 %v2141_v4  ;;  %2124 = vmatpush1.bf16.msra.mxu1 %v2141_v4  ;;  %v2189_v40 = vld [vmem:[%s3217_s0 + $0x1e0] ss:$8 sps:$4 sm:$0xff]   ;;  %v2190_v41 = vld [vmem:[%s3217_s0 + $0x64] ss:$8 sps:$4 sm:$0xff]   ;;  %v2192_v42 = vld [vmem:[%s3217_s0 + $0x1f4] ss:$8 sps:$4 sm:$0xff]  }
   0xf   :  { %758 = vmatprep.subr.bf16.mxu0 %v2305_v0  ;;  %2109 = vmatprep.subr.bf16.mxu1 %v2305_v0  ;;  %v2194_v43 = vld [vmem:[%s3217_s0 + $0x60] ss:$8 sps:$4 sm:$0xff]   ;;  %v2195_v44 = vld [vmem:[%s3217_s0 + $0x1f0] ss:$8 sps:$4 sm:$0xff]   ;;  %v2196_v45 = vld [vmem:[%s3217_s0 + $0x74] ss:$8 sps:$4 sm:$0xff]  }
  0x10   :  { %v2198_v46 = vld [vmem:[%s3217_s0 + $0x204] ss:$8 sps:$4 sm:$0xff]   ;;  %v2200_v47 = vld [vmem:[%s3217_s0 + $0x70] ss:$8 sps:$4 sm:$0xff]   ;;  %v2201_v48 = vld [vmem:[%s3217_s0 + $0x200] ss:$8 sps:$4 sm:$0xff]  }
  0x11   :  { %v2202_v49 = vld [vmem:[%s3217_s0 + $0x84] ss:$8 sps:$4 sm:$0xff]   ;;  %v2204_v50 = vld [vmem:[%s3217_s0 + $0x214] ss:$8 sps:$4 sm:$0xff]   ;;  %v2206_v51 = vld [vmem:[%s3217_s0 + $0x80] ss:$8 sps:$4 sm:$0xff]  }
  0x12   :  { %759 = vmatpush1.bf16.msra.mxu0 %v2142_v5  ;;  %2125 = vmatpush1.bf16.msra.mxu1 %v2142_v5  ;;  %v2207_v52 = vld [vmem:[%s3217_s0 + $0x210] ss:$8 sps:$4 sm:$0xff]   ;;  %v2208_v53 = vld [vmem:[%s3217_s0 + $0x94] ss:$8 sps:$4 sm:$0xff]   ;;  %v2210_v54 = vld [vmem:[%s3217_s0 + $0x224] ss:$8 sps:$4 sm:$0xff]  }
  0x13   :  { %760 = vmatprep.subr.bf16.mxu0 %v2305_v0  ;;  %2110 = vmatprep.subr.bf16.mxu1 %v2305_v0  ;;  %v2212_v55 = vld [vmem:[%s3217_s0 + $0x90] ss:$8 sps:$4 sm:$0xff]   ;;  %v2213_v56 = vld [vmem:[%s3217_s0 + $0x220] ss:$8 sps:$4 sm:$0xff]   ;;  %v2214_v57 = vld [vmem:[%s3217_s0 + $0xa4] ss:$8 sps:$4 sm:$0xff]  }
  0x14   :  { %v2216_v58 = vld [vmem:[%s3217_s0 + $0x234] ss:$8 sps:$4 sm:$0xff]   ;;  %v2218_v59 = vld [vmem:[%s3217_s0 + $0xa0] ss:$8 sps:$4 sm:$0xff]   ;;  %v2219_v60 = vld [vmem:[%s3217_s0 + $0x230] ss:$8 sps:$4 sm:$0xff]  }
  0x15   :  { %v2220_v61 = vld [vmem:[%s3217_s0 + $0xb4] ss:$8 sps:$4 sm:$0xff]   ;;  %v2222_v62 = vld [vmem:[%s3217_s0 + $0x244] ss:$8 sps:$4 sm:$0xff]   ;;  %v2224_v63 = vld [vmem:[%s3217_s0 + $0xb0] ss:$8 sps:$4 sm:$0xff]  }
  0x16   :  { %761 = vmatpush1.bf16.msra.mxu0 %v2143_v7  ;;  %2126 = vmatpush1.bf16.msra.mxu1 %v2143_v7  ;;  %v2226_v1 = vld [vmem:[%s3217_s0 + $0xc4] ss:$8 sps:$4 sm:$0xff]   ;;  %v2228_v2 = vld [vmem:[%s3217_s0 + $0x254] ss:$8 sps:$4 sm:$0xff]   ;;  %v2230_v3 = vld [vmem:[%s3217_s0 + $0xc0] ss:$8 sps:$4 sm:$0xff]  }
  0x17   :  { %762 = vmatprep.subr.bf16.mxu0 %v2305_v0  ;;  %2111 = vmatprep.subr.bf16.mxu1 %v2305_v0  ;;  %v2231_v4 = vld [vmem:[%s3217_s0 + $0x250] ss:$8 sps:$4 sm:$0xff]   ;;  %v2232_v5 = vld [vmem:[%s3217_s0 + $0xd4] ss:$8 sps:$4 sm:$0xff]   ;;  %v2234_v6 = vld [vmem:[%s3217_s0 + $0x264] ss:$8 sps:$4 sm:$0xff]  }
  0x18   :  { %v2236_v7 = vld [vmem:[%s3217_s0 + $0xd0] ss:$8 sps:$4 sm:$0xff]   ;;  %v2237_v8 = vld [vmem:[%s3217_s0 + $0x260] ss:$8 sps:$4 sm:$0xff]  }
  0x1a   :  { %763 = vmatpush1.bf16.msra.mxu0 %v2144_v9  ;;  %2127 = vmatpush1.bf16.msra.mxu1 %v2144_v9  ;;  %v2238_v9 = vld [vmem:[%s3217_s0 + $0xe4] ss:$8 sps:$4 sm:$0xff]  }
  0x1b   :  { %764 = vmatprep.subr.bf16.mxu0 %v2305_v0  ;;  %2112 = vmatprep.subr.bf16.mxu1 %v2305_v0 }
  0x1e   :  { %765 = vmatpush1.bf16.msra.mxu0 %v2145_v10  ;;  %2128 = vmatpush1.bf16.msra.mxu1 %v2145_v10  ;;  %v2240_v10 = vld [vmem:[%s3217_s0 + $0x274] ss:$8 sps:$4 sm:$0xff]  }
  0x1f   :  { %766 = vmatprep.subr.bf16.mxu0 %v2305_v0  ;;  %2113 = vmatprep.subr.bf16.mxu1 %v2305_v0 }
  0x22   :  { %767 = vmatpush1.bf16.msra.mxu0 %v2146_v11  ;;  %2129 = vmatpush1.bf16.msra.mxu1 %v2146_v11  ;;  %v2242_v11 = vld [vmem:[%s3217_s0 + $0xe0] ss:$8 sps:$4 sm:$0xff]  }
  0x23   :  { %768 = vmatprep.subr.bf16.mxu0 %v2305_v0  ;;  %2114 = vmatprep.subr.bf16.mxu1 %v2305_v0 }
  0x26   :  { %769 = vmatpush1.bf16.msra.mxu0 %v2147_v12  ;;  %2130 = vmatpush1.bf16.msra.mxu1 %v2147_v12  ;;  %v2243_v12 = vld [vmem:[%s3217_s0 + $0x270] ss:$8 sps:$4 sm:$0xff]  }
  0x27   :  { %770 = vmatprep.subr.bf16.mxu0 %v2305_v0  ;;  %2115 = vmatprep.subr.bf16.mxu1 %v2305_v0 }
  0x2a   :  { %771 = vmatpush1.bf16.msra.mxu0 %v2148_v13  ;;  %2131 = vmatpush1.bf16.msra.mxu1 %v2148_v13  ;;  %v2244_v13 = vld [vmem:[%s3217_s0 + $0xf4] ss:$8 sps:$4 sm:$0xff]  }
  0x2b   :  { %772 = vmatprep.subr.bf16.mxu0 %v2305_v0  ;;  %2116 = vmatprep.subr.bf16.mxu1 %v2305_v0 }
  0x2e   :  { %773 = vmatpush1.bf16.msra.mxu0 %v2149_v14  ;;  %2132 = vmatpush1.bf16.msra.mxu1 %v2149_v14  ;;  %v2246_v14 = vld [vmem:[%s3217_s0 + $0x284] ss:$8 sps:$4 sm:$0xff]  }
  0x2f   :  { %774 = vmatprep.subr.bf16.mxu0 %v2305_v0  ;;  %2117 = vmatprep.subr.bf16.mxu1 %v2305_v0 }
  0x32   :  { %775 = vmatpush1.bf16.msra.mxu0 %v2150_v15  ;;  %2133 = vmatpush1.bf16.msra.mxu1 %v2150_v15  ;;  %v2248_v15 = vld [vmem:[%s3217_s0 + $0xf0] ss:$8 sps:$4 sm:$0xff]  }
  0x33   :  { %776 = vmatprep.subr.bf16.mxu0 %v2305_v0  ;;  %2118 = vmatprep.subr.bf16.mxu1 %v2305_v0 }
  0x36   :  { %777 = vmatpush1.bf16.msra.mxu0 %v2151_v16  ;;  %2134 = vmatpush1.bf16.msra.mxu1 %v2151_v16  ;;  %v2249_v16 = vld [vmem:[%s3217_s0 + $0x280] ss:$8 sps:$4 sm:$0xff]  }
  0x37   :  { %778 = vmatprep.subr.bf16.mxu0 %v2305_v0  ;;  %2119 = vmatprep.subr.bf16.mxu1 %v2305_v0 }
  0x3a   :  { %779 = vmatpush1.bf16.msra.mxu0 %v2152_v17  ;;  %2135 = vmatpush1.bf16.msra.mxu1 %v2152_v17  ;;  %v2250_v17 = vld [vmem:[%s3217_s0 + $0x104] ss:$8 sps:$4 sm:$0xff]  }
  0x3b   :  { %780 = vmatprep.subr.bf16.mxu0 %v2305_v0  ;;  %2120 = vmatprep.subr.bf16.mxu1 %v2305_v0  ;;  %v2225_v0 = vld [vmem:[%s3217_s0 + $0x240] ss:$8 sps:$4 sm:$0xff]  }
  0x3e   :  { %781 = vmatpush1.bf16.msra.mxu0 %v2153_v18  ;;  %2136 = vmatpush1.bf16.msra.mxu1 %v2153_v18  ;;  %v2252_v18 = vld [vmem:[%s3217_s0 + $0x294] ss:$8 sps:$4 sm:$0xff]  }
  0x41   :  { %783 = vmatmul.mubr.bf16.vlgmr.msra.gmra.mrb[0].mxu0 %v2154_v19  ;;  %983 = vmatmul.mubr.bf16.vlgmr.msra.gmra.mrb[0].mxu1 %v2157_v20  ;;  %v2254_v19 = vld [vmem:[%s3217_s0 + $0x100] ss:$8 sps:$4 sm:$0xff]   ;;  %v2255_v20 = vld [vmem:[%s3217_s0 + $0x290] ss:$8 sps:$4 sm:$0xff]  }
  0x42   :  { %790 = vmatprep.mubr.bf16.mxu0 %v2160_v21  ;;  %990 = vmatprep.mubr.bf16.mxu1 %v2162_v22  ;;  %v2256_v21 = vld [vmem:[%s3217_s0 + $0x114] ss:$8 sps:$4 sm:$0xff]   ;;  %v2258_v22 = vld [vmem:[%s3217_s0 + $0x2a4] ss:$8 sps:$4 sm:$0xff]  }
  0x49   :  { %791 = vmatmul.mubr.bf16.gmra.mrb[4].mxu0 %v2164_v23  ;;  %991 = vmatmul.mubr.bf16.gmra.mrb[4].mxu1 %v2165_v24  ;;  %v2260_v23 = vld [vmem:[%s3217_s0 + $0x110] ss:$8 sps:$4 sm:$0xff]   ;;  %v2261_v24 = vld [vmem:[%s3217_s0 + $0x2a0] ss:$8 sps:$4 sm:$0xff]  }
  0x4a   :  { %798 = vmatprep.mubr.bf16.mxu0 %v2166_v25  ;;  %998 = vmatprep.mubr.bf16.mxu1 %v2168_v26  ;;  %v2262_v25 = vld [vmem:[%s3217_s0 + $0x124] ss:$8 sps:$4 sm:$0xff]   ;;  %v2264_v26 = vld [vmem:[%s3217_s0 + $0x2b4] ss:$8 sps:$4 sm:$0xff]  }
  0x51   :  { %799 = vmatmul.mubr.bf16.gmra.mrb[8].mxu0 %v2170_v27  ;;  %999 = vmatmul.mubr.bf16.gmra.mrb[8].mxu1 %v2171_v28  ;;  %v2266_v27 = vld [vmem:[%s3217_s0 + $0x120] ss:$8 sps:$4 sm:$0xff]   ;;  %v2267_v28 = vld [vmem:[%s3217_s0 + $0x2b0] ss:$8 sps:$4 sm:$0xff]  }
  0x52   :  { %806 = vmatprep.mubr.bf16.mxu0 %v2172_v29  ;;  %1006 = vmatprep.mubr.bf16.mxu1 %v2174_v30  ;;  %v2268_v29 = vld [vmem:[%s3217_s0 + $0x134] ss:$8 sps:$4 sm:$0xff]   ;;  %v2270_v30 = vld [vmem:[%s3217_s0 + $0x2c4] ss:$8 sps:$4 sm:$0xff]  }
  0x59   :  { %807 = vmatmul.mubr.bf16.gmra.mrb[12].mxu0 %v2176_v31  ;;  %1007 = vmatmul.mubr.bf16.gmra.mrb[12].mxu1 %v2177_v32  ;;  %v2272_v31 = vld [vmem:[%s3217_s0 + $0x130] ss:$8 sps:$4 sm:$0xff]   ;;  %v2273_v32 = vld [vmem:[%s3217_s0 + $0x2c0] ss:$8 sps:$4 sm:$0xff]  }
  0x5a   :  { %814 = vmatprep.mubr.bf16.mxu0 %v2178_v33  ;;  %1014 = vmatprep.mubr.bf16.mxu1 %v2180_v34  ;;  %v2274_v33 = vld [vmem:[%s3217_s0 + $0x144] ss:$8 sps:$4 sm:$0xff]   ;;  %v2276_v34 = vld [vmem:[%s3217_s0 + $0x2d4] ss:$8 sps:$4 sm:$0xff]  }
  0x61   :  { %815 = vmatmul.mubr.bf16.gmra.mrb[16].mxu0 %v2182_v35  ;;  %1015 = vmatmul.mubr.bf16.gmra.mrb[16].mxu1 %v2183_v36  ;;  %v2278_v35 = vld [vmem:[%s3217_s0 + $0x140] ss:$8 sps:$4 sm:$0xff]   ;;  %v2279_v36 = vld [vmem:[%s3217_s0 + $0x2d0] ss:$8 sps:$4 sm:$0xff]  }
  0x62   :  { %822 = vmatprep.mubr.bf16.mxu0 %v2184_v37  ;;  %1022 = vmatprep.mubr.bf16.mxu1 %v2186_v38  ;;  %v2280_v37 = vld [vmem:[%s3217_s0 + $0x154] ss:$8 sps:$4 sm:$0xff]   ;;  %v2282_v38 = vld [vmem:[%s3217_s0 + $0x2e4] ss:$8 sps:$4 sm:$0xff]  }
  0x69   :  { %823 = vmatmul.mubr.bf16.gmra.mrb[20].mxu0 %v2188_v39  ;;  %1023 = vmatmul.mubr.bf16.gmra.mrb[20].mxu1 %v2189_v40  ;;  %v2284_v39 = vld [vmem:[%s3217_s0 + $0x150] ss:$8 sps:$4 sm:$0xff]   ;;  %v2285_v40 = vld [vmem:[%s3217_s0 + $0x2e0] ss:$8 sps:$4 sm:$0xff]  }
  0x6a   :  { %830 = vmatprep.mubr.bf16.mxu0 %v2190_v41  ;;  %1030 = vmatprep.mubr.bf16.mxu1 %v2192_v42  ;;  %v2286_v41 = vld [vmem:[%s3217_s0 + $0x164] ss:$8 sps:$4 sm:$0xff]   ;;  %v2288_v42 = vld [vmem:[%s3217_s0 + $0x2f4] ss:$8 sps:$4 sm:$0xff]  }
  0x71   :  { %831 = vmatmul.mubr.bf16.gmra.mrb[24].mxu0 %v2194_v43  ;;  %1031 = vmatmul.mubr.bf16.gmra.mrb[24].mxu1 %v2195_v44  ;;  %v2290_v43 = vld [vmem:[%s3217_s0 + $0x160] ss:$8 sps:$4 sm:$0xff]   ;;  %v2291_v44 = vld [vmem:[%s3217_s0 + $0x2f0] ss:$8 sps:$4 sm:$0xff]  }
  0x72   :  { %838 = vmatprep.mubr.bf16.mxu0 %v2196_v45  ;;  %1038 = vmatprep.mubr.bf16.mxu1 %v2198_v46  ;;  %v2292_v45 = vld [vmem:[%s3217_s0 + $0x174] ss:$8 sps:$4 sm:$0xff]   ;;  %v2294_v46 = vld [vmem:[%s3217_s0 + $0x304] ss:$8 sps:$4 sm:$0xff]  }
  0x79   :  { %839 = vmatmul.mubr.bf16.gmra.mrb[28].mxu0 %v2200_v47  ;;  %1039 = vmatmul.mubr.bf16.gmra.mrb[28].mxu1 %v2201_v48  ;;  %v2296_v47 = vld [vmem:[%s3217_s0 + $0x170] ss:$8 sps:$4 sm:$0xff]   ;;  %v2297_v48 = vld [vmem:[%s3217_s0 + $0x300] ss:$8 sps:$4 sm:$0xff]  }
  0x7a   :  { %846 = vmatprep.mubr.bf16.mxu0 %v2202_v49  ;;  %1046 = vmatprep.mubr.bf16.mxu1 %v2204_v50  ;;  %v2298_v49 = vld [vmem:[%s3217_s0 + $0x184] ss:$8 sps:$4 sm:$0xff]   ;;  %v2300_v50 = vld [vmem:[%s3217_s0 + $0x314] ss:$8 sps:$4 sm:$0xff]  }
  0x81   :  { %847 = vmatmul.mubr.bf16.gmra.mrb[32].mxu0 %v2206_v51  ;;  %1047 = vmatmul.mubr.bf16.gmra.mrb[32].mxu1 %v2207_v52  ;;  %v2302_v51 = vld [vmem:[%s3217_s0 + $0x180] ss:$8 sps:$4 sm:$0xff]   ;;  %v2303_v52 = vld [vmem:[%s3217_s0 + $0x310] ss:$8 sps:$4 sm:$0xff]  }
  0x82   :  { %854 = vmatprep.mubr.bf16.mxu0 %v2208_v53  ;;  %1054 = vmatprep.mubr.bf16.mxu1 %v2210_v54  ;;  %v2709_v53 = vld [vmem:[%s3218_s2] ss:$0 sm:$0xff] }
  0x89   :  { %855 = vmatmul.mubr.bf16.gmra.mrb[36].mxu0 %v2212_v55  ;;  %1055 = vmatmul.mubr.bf16.gmra.mrb[36].mxu1 %v2213_v56 }
  0x8a   :  { %862 = vmatprep.mubr.bf16.mxu0 %v2214_v57  ;;  %1062 = vmatprep.mubr.bf16.mxu1 %v2216_v58 }
  0x91   :  { %863 = vmatmul.mubr.bf16.gmra.mrb[40].mxu0 %v2218_v59  ;;  %1063 = vmatmul.mubr.bf16.gmra.mrb[40].mxu1 %v2219_v60 }
  0x92   :  { %870 = vmatprep.mubr.bf16.mxu0 %v2220_v61  ;;  %1070 = vmatprep.mubr.bf16.mxu1 %v2222_v62 }
  0x99   :  { %871 = vmatmul.mubr.bf16.gmra.mrb[44].mxu0 %v2224_v63  ;;  %1071 = vmatmul.mubr.bf16.gmra.mrb[44].mxu1 %v2225_v0 }
  0x9a   :  { %878 = vmatprep.mubr.bf16.mxu0 %v2226_v1  ;;  %1078 = vmatprep.mubr.bf16.mxu1 %v2228_v2 }
  0xa1   :  { %879 = vmatmul.mubr.bf16.gmra.mrb[48].mxu0 %v2230_v3  ;;  %1079 = vmatmul.mubr.bf16.gmra.mrb[48].mxu1 %v2231_v4 }
  0xa2   :  { %886 = vmatprep.mubr.bf16.mxu0 %v2232_v5  ;;  %1086 = vmatprep.mubr.bf16.mxu1 %v2234_v6 }
  0xa9   :  { %887 = vmatmul.mubr.bf16.gmra.mrb[52].mxu0 %v2236_v7  ;;  %1087 = vmatmul.mubr.bf16.gmra.mrb[52].mxu1 %v2237_v8 }
  0xaa   :  { %894 = vmatprep.mubr.bf16.mxu0 %v2238_v9  ;;  %1094 = vmatprep.mubr.bf16.mxu1 %v2240_v10 }
  0xb1   :  { %895 = vmatmul.mubr.bf16.gmra.mrb[56].mxu0 %v2242_v11  ;;  %1095 = vmatmul.mubr.bf16.gmra.mrb[56].mxu1 %v2243_v12 }
  0xb2   :  { %902 = vmatprep.mubr.bf16.mxu0 %v2244_v13  ;;  %1102 = vmatprep.mubr.bf16.mxu1 %v2246_v14 }
  0xb9   :  { %903 = vmatmul.mubr.bf16.gmra.mrb[60].mxu0 %v2248_v15  ;;  %1103 = vmatmul.mubr.bf16.gmra.mrb[60].mxu1 %v2249_v16 }
  0xba   :  { %910 = vmatprep.mubr.bf16.mxu0 %v2250_v17  ;;  %1110 = vmatprep.mubr.bf16.mxu1 %v2252_v18 }
  0xc1   :  { %911 = vmatmul.mubr.bf16.gmra.mrb[64].mxu0 %v2254_v19  ;;  %1111 = vmatmul.mubr.bf16.gmra.mrb[64].mxu1 %v2255_v20 }
  0xc2   :  { %918 = vmatprep.mubr.bf16.mxu0 %v2256_v21  ;;  %1118 = vmatprep.mubr.bf16.mxu1 %v2258_v22 }
  0xc9   :  { %919 = vmatmul.mubr.bf16.gmra.mrb[68].mxu0 %v2260_v23  ;;  %1119 = vmatmul.mubr.bf16.gmra.mrb[68].mxu1 %v2261_v24 }
  0xca   :  { %926 = vmatprep.mubr.bf16.mxu0 %v2262_v25  ;;  %1126 = vmatprep.mubr.bf16.mxu1 %v2264_v26 }
  0xd1   :  { %927 = vmatmul.mubr.bf16.gmra.mrb[72].mxu0 %v2266_v27  ;;  %1127 = vmatmul.mubr.bf16.gmra.mrb[72].mxu1 %v2267_v28 }
  0xd2   :  { %934 = vmatprep.mubr.bf16.mxu0 %v2268_v29  ;;  %1134 = vmatprep.mubr.bf16.mxu1 %v2270_v30 }
  0xd9   :  { %935 = vmatmul.mubr.bf16.gmra.mrb[76].mxu0 %v2272_v31  ;;  %1135 = vmatmul.mubr.bf16.gmra.mrb[76].mxu1 %v2273_v32 }
  0xda   :  { %942 = vmatprep.mubr.bf16.mxu0 %v2274_v33  ;;  %1142 = vmatprep.mubr.bf16.mxu1 %v2276_v34 }
  0xe1   :  { %943 = vmatmul.mubr.bf16.gmra.mrb[80].mxu0 %v2278_v35  ;;  %1143 = vmatmul.mubr.bf16.gmra.mrb[80].mxu1 %v2279_v36 }
  0xe2   :  { %950 = vmatprep.mubr.bf16.mxu0 %v2280_v37  ;;  %1150 = vmatprep.mubr.bf16.mxu1 %v2282_v38 }
  0xe9   :  { %951 = vmatmul.mubr.bf16.gmra.mrb[84].mxu0 %v2284_v39  ;;  %1151 = vmatmul.mubr.bf16.gmra.mrb[84].mxu1 %v2285_v40 }
  0xea   :  { %958 = vmatprep.mubr.bf16.mxu0 %v2286_v41  ;;  %1158 = vmatprep.mubr.bf16.mxu1 %v2288_v42 }
  0xf1   :  { %959 = vmatmul.mubr.bf16.gmra.mrb[88].mxu0 %v2290_v43  ;;  %1159 = vmatmul.mubr.bf16.gmra.mrb[88].mxu1 %v2291_v44 }
  0xf2   :  { %966 = vmatprep.mubr.bf16.mxu0 %v2292_v45  ;;  %1166 = vmatprep.mubr.bf16.mxu1 %v2294_v46 }
  0xf9   :  { %967 = vmatmul.mubr.bf16.gmra.mrb[92].mxu0 %v2296_v47  ;;  %1167 = vmatmul.mubr.bf16.gmra.mrb[92].mxu1 %v2297_v48 }
  0xfa   :  { %974 = vmatprep.mubr.bf16.mxu0 %v2298_v49  ;;  %1174 = vmatprep.mubr.bf16.mxu1 %v2300_v50 }
 0x101   :  { %975 = vmatmul.mubr.bf16.gmra.mrb[96].mxu0 %v2302_v51  ;;  %1175 = vmatmul.mubr.bf16.gmra.mrb[96].mxu1 %v2303_v52 }
 0x114   :  { %v784_v54 = vpop.f32.mrb[0].mxu0  ;;  %v984_v55 = vpop.f32.mrb[0].mxu1 }
 0x115   :  { %v785_v56 = vadd.f32 %v2709_v53, %v784_v54  ;;  %v985_v57 = vadd.f32 %v2709_v53, %v984_v55  ;;  %v786_v58 = vpop.f32.mrb[1].mxu0  ;;  %v986_v59 = vpop.f32.mrb[1].mxu1 }
 0x116   :  { %v787_v60 = vpop.f32.mrb[2].mxu0  ;;  %v987_v61 = vpop.f32.mrb[2].mxu1 }
 0x117   :  { %v1183_v62 = vmax.f32 %v785_v56, 0.0  ;;  %v1233_v63 = vmax.f32 %v985_v57, 0.0  ;;  %v788_v0 = vadd.f32 %v2709_v53, %v787_v60  ;;  %v988_v1 = vadd.f32 %v2709_v53, %v987_v61  ;;  %v789_v2 = vpop.f32.mrb[3].mxu0  ;;  %v989_v3 = vpop.f32.mrb[3].mxu1 }
 0x119   :  { %v2005_v4 = vpack.c.bf16 %v1183_v62, %v1183_v62  ;;  %v2055_v5 = vpack.c.bf16 %v1233_v63, %v1233_v63  ;;  %v1184_v6 = vmax.f32 %v788_v0, 0.0  ;;  %v1234_v7 = vmax.f32 %v988_v1, 0.0 }
 0x11b   :  { %1684 = vst.msk [vmem:[%s3219_s3] sm:$0xf] %vm1683_vm0, %v2005_v4  ;;  %1734 = vst.msk [vmem:[%s3219_s3 + $0xc8] sm:$0xf] %vm1683_vm0, %v2055_v5  ;;  %v2006_v8 = vpack.c.bf16 %v1184_v6, %v1184_v6  ;;  %v2056_v9 = vpack.c.bf16 %v1234_v7, %v1234_v7 }
 0x11c   :  { %v792_v10 = vpop.f32.mrb[4].mxu0  ;;  %v992_v11 = vpop.f32.mrb[4].mxu1 }
 0x11d   :  { %1685 = vst.msk [vmem:[%s3219_s3 + $0x4] sm:$0xf] %vm1683_vm0, %v2006_v8  ;;  %1735 = vst.msk [vmem:[%s3219_s3 + $0xcc] sm:$0xf] %vm1683_vm0, %v2056_v9  ;;  %v793_v12 = vadd.f32 %v2709_v53, %v792_v10  ;;  %v993_v13 = vadd.f32 %v2709_v53, %v992_v11  ;;  %v794_v14 = vpop.f32.mrb[5].mxu0  ;;  %v994_v15 = vpop.f32.mrb[5].mxu1 }
 0x11e   :  { %v795_v16 = vpop.f32.mrb[6].mxu0  ;;  %v995_v17 = vpop.f32.mrb[6].mxu1 }
 0x11f   :  { %v1185_v18 = vmax.f32 %v793_v12, 0.0  ;;  %v1235_v19 = vmax.f32 %v993_v13, 0.0  ;;  %v796_v20 = vadd.f32 %v2709_v53, %v795_v16  ;;  %v996_v21 = vadd.f32 %v2709_v53, %v995_v17  ;;  %v797_v22 = vpop.f32.mrb[7].mxu0  ;;  %v997_v23 = vpop.f32.mrb[7].mxu1 }
 0x121   :  { %v2007_v24 = vpack.c.bf16 %v1185_v18, %v1185_v18  ;;  %v2057_v25 = vpack.c.bf16 %v1235_v19, %v1235_v19  ;;  %v1186_v26 = vmax.f32 %v796_v20, 0.0  ;;  %v1236_v27 = vmax.f32 %v996_v21, 0.0 }
 0x123   :  { %1686 = vst.msk [vmem:[%s3219_s3 + $0x8] sm:$0xf] %vm1683_vm0, %v2007_v24  ;;  %1736 = vst.msk [vmem:[%s3219_s3 + $0xd0] sm:$0xf] %vm1683_vm0, %v2057_v25  ;;  %v2008_v28 = vpack.c.bf16 %v1186_v26, %v1186_v26  ;;  %v2058_v29 = vpack.c.bf16 %v1236_v27, %v1236_v27 }
 0x124   :  { %v800_v30 = vpop.f32.mrb[8].mxu0  ;;  %v1000_v31 = vpop.f32.mrb[8].mxu1 }
 0x125   :  { %1687 = vst.msk [vmem:[%s3219_s3 + $0xc] sm:$0xf] %vm1683_vm0, %v2008_v28  ;;  %1737 = vst.msk [vmem:[%s3219_s3 + $0xd4] sm:$0xf] %vm1683_vm0, %v2058_v29  ;;  %v801_v32 = vadd.f32 %v2709_v53, %v800_v30  ;;  %v1001_v33 = vadd.f32 %v2709_v53, %v1000_v31  ;;  %v802_v34 = vpop.f32.mrb[9].mxu0  ;;  %v1002_v35 = vpop.f32.mrb[9].mxu1 }
 0x126   :  { %v803_v36 = vpop.f32.mrb[10].mxu0  ;;  %v1003_v37 = vpop.f32.mrb[10].mxu1 }
 0x127   :  { %v1187_v38 = vmax.f32 %v801_v32, 0.0  ;;  %v1237_v39 = vmax.f32 %v1001_v33, 0.0  ;;  %v804_v40 = vadd.f32 %v2709_v53, %v803_v36  ;;  %v1004_v41 = vadd.f32 %v2709_v53, %v1003_v37  ;;  %v805_v42 = vpop.f32.mrb[11].mxu0  ;;  %v1005_v43 = vpop.f32.mrb[11].mxu1 }
 0x129   :  { %v2009_v44 = vpack.c.bf16 %v1187_v38, %v1187_v38  ;;  %v2059_v45 = vpack.c.bf16 %v1237_v39, %v1237_v39  ;;  %v1188_v46 = vmax.f32 %v804_v40, 0.0  ;;  %v1238_v47 = vmax.f32 %v1004_v41, 0.0 }
 0x12b   :  { %1688 = vst.msk [vmem:[%s3219_s3 + $0x10] sm:$0xf] %vm1683_vm0, %v2009_v44  ;;  %1738 = vst.msk [vmem:[%s3219_s3 + $0xd8] sm:$0xf] %vm1683_vm0, %v2059_v45  ;;  %v2010_v48 = vpack.c.bf16 %v1188_v46, %v1188_v46  ;;  %v2060_v49 = vpack.c.bf16 %v1238_v47, %v1238_v47 }
 0x12c   :  { %v808_v50 = vpop.f32.mrb[12].mxu0  ;;  %v1008_v51 = vpop.f32.mrb[12].mxu1 }
 0x12d   :  { %1689 = vst.msk [vmem:[%s3219_s3 + $0x14] sm:$0xf] %vm1683_vm0, %v2010_v48  ;;  %1739 = vst.msk [vmem:[%s3219_s3 + $0xdc] sm:$0xf] %vm1683_vm0, %v2060_v49  ;;  %v809_v52 = vadd.f32 %v2709_v53, %v808_v50  ;;  %v1009_v54 = vadd.f32 %v2709_v53, %v1008_v51  ;;  %v810_v55 = vpop.f32.mrb[13].mxu0  ;;  %v1010_v56 = vpop.f32.mrb[13].mxu1 }
 0x12e   :  { %v811_v57 = vpop.f32.mrb[14].mxu0  ;;  %v1011_v58 = vpop.f32.mrb[14].mxu1 }
 0x12f   :  { %v1189_v59 = vmax.f32 %v809_v52, 0.0  ;;  %v1239_v60 = vmax.f32 %v1009_v54, 0.0  ;;  %v812_v61 = vadd.f32 %v2709_v53, %v811_v57  ;;  %v1012_v62 = vadd.f32 %v2709_v53, %v1011_v58  ;;  %v813_v63 = vpop.f32.mrb[15].mxu0  ;;  %v1013_v0 = vpop.f32.mrb[15].mxu1 }
 0x131   :  { %v2011_v1 = vpack.c.bf16 %v1189_v59, %v1189_v59  ;;  %v2061_v2 = vpack.c.bf16 %v1239_v60, %v1239_v60  ;;  %v1190_v3 = vmax.f32 %v812_v61, 0.0  ;;  %v1240_v4 = vmax.f32 %v1012_v62, 0.0 }
 0x133   :  { %1690 = vst.msk [vmem:[%s3219_s3 + $0x18] sm:$0xf] %vm1683_vm0, %v2011_v1  ;;  %1740 = vst.msk [vmem:[%s3219_s3 + $0xe0] sm:$0xf] %vm1683_vm0, %v2061_v2  ;;  %v2012_v5 = vpack.c.bf16 %v1190_v3, %v1190_v3  ;;  %v2062_v6 = vpack.c.bf16 %v1240_v4, %v1240_v4 }
 0x134   :  { %v816_v7 = vpop.f32.mrb[16].mxu0  ;;  %v1016_v8 = vpop.f32.mrb[16].mxu1 }
 0x135   :  { %1691 = vst.msk [vmem:[%s3219_s3 + $0x1c] sm:$0xf] %vm1683_vm0, %v2012_v5  ;;  %1741 = vst.msk [vmem:[%s3219_s3 + $0xe4] sm:$0xf] %vm1683_vm0, %v2062_v6  ;;  %v817_v9 = vadd.f32 %v2709_v53, %v816_v7  ;;  %v1017_v10 = vadd.f32 %v2709_v53, %v1016_v8  ;;  %v818_v11 = vpop.f32.mrb[17].mxu0  ;;  %v1018_v12 = vpop.f32.mrb[17].mxu1 }
 0x136   :  { %v819_v13 = vpop.f32.mrb[18].mxu0  ;;  %v1019_v14 = vpop.f32.mrb[18].mxu1 }
 0x137   :  { %v1191_v15 = vmax.f32 %v817_v9, 0.0  ;;  %v1241_v16 = vmax.f32 %v1017_v10, 0.0  ;;  %v820_v17 = vadd.f32 %v2709_v53, %v819_v13  ;;  %v1020_v18 = vadd.f32 %v2709_v53, %v1019_v14  ;;  %v821_v19 = vpop.f32.mrb[19].mxu0  ;;  %v1021_v20 = vpop.f32.mrb[19].mxu1 }
 0x139   :  { %v2013_v21 = vpack.c.bf16 %v1191_v15, %v1191_v15  ;;  %v2063_v22 = vpack.c.bf16 %v1241_v16, %v1241_v16  ;;  %v1192_v23 = vmax.f32 %v820_v17, 0.0  ;;  %v1242_v24 = vmax.f32 %v1020_v18, 0.0 }
 0x13b   :  { %1692 = vst.msk [vmem:[%s3219_s3 + $0x20] sm:$0xf] %vm1683_vm0, %v2013_v21  ;;  %1742 = vst.msk [vmem:[%s3219_s3 + $0xe8] sm:$0xf] %vm1683_vm0, %v2063_v22  ;;  %v2014_v25 = vpack.c.bf16 %v1192_v23, %v1192_v23  ;;  %v2064_v26 = vpack.c.bf16 %v1242_v24, %v1242_v24 }
 0x13c   :  { %v824_v27 = vpop.f32.mrb[20].mxu0  ;;  %v1024_v28 = vpop.f32.mrb[20].mxu1 }
 0x13d   :  { %1693 = vst.msk [vmem:[%s3219_s3 + $0x24] sm:$0xf] %vm1683_vm0, %v2014_v25  ;;  %1743 = vst.msk [vmem:[%s3219_s3 + $0xec] sm:$0xf] %vm1683_vm0, %v2064_v26  ;;  %v825_v29 = vadd.f32 %v2709_v53, %v824_v27  ;;  %v1025_v30 = vadd.f32 %v2709_v53, %v1024_v28  ;;  %v826_v31 = vpop.f32.mrb[21].mxu0  ;;  %v1026_v32 = vpop.f32.mrb[21].mxu1 }
 0x13e   :  { %v827_v33 = vpop.f32.mrb[22].mxu0  ;;  %v1027_v34 = vpop.f32.mrb[22].mxu1 }
 0x13f   :  { %v1193_v35 = vmax.f32 %v825_v29, 0.0  ;;  %v1243_v36 = vmax.f32 %v1025_v30, 0.0  ;;  %v828_v37 = vadd.f32 %v2709_v53, %v827_v33  ;;  %v1028_v38 = vadd.f32 %v2709_v53, %v1027_v34  ;;  %v829_v39 = vpop.f32.mrb[23].mxu0  ;;  %v1029_v40 = vpop.f32.mrb[23].mxu1 }
 0x141   :  { %v2015_v41 = vpack.c.bf16 %v1193_v35, %v1193_v35  ;;  %v2065_v42 = vpack.c.bf16 %v1243_v36, %v1243_v36  ;;  %v1194_v43 = vmax.f32 %v828_v37, 0.0  ;;  %v1244_v44 = vmax.f32 %v1028_v38, 0.0 }
 0x143   :  { %1694 = vst.msk [vmem:[%s3219_s3 + $0x28] sm:$0xf] %vm1683_vm0, %v2015_v41  ;;  %1744 = vst.msk [vmem:[%s3219_s3 + $0xf0] sm:$0xf] %vm1683_vm0, %v2065_v42  ;;  %v2016_v45 = vpack.c.bf16 %v1194_v43, %v1194_v43  ;;  %v2066_v46 = vpack.c.bf16 %v1244_v44, %v1244_v44 }
 0x144   :  { %v832_v47 = vpop.f32.mrb[24].mxu0  ;;  %v1032_v48 = vpop.f32.mrb[24].mxu1 }
 0x145   :  { %1695 = vst.msk [vmem:[%s3219_s3 + $0x2c] sm:$0xf] %vm1683_vm0, %v2016_v45  ;;  %1745 = vst.msk [vmem:[%s3219_s3 + $0xf4] sm:$0xf] %vm1683_vm0, %v2066_v46  ;;  %v833_v49 = vadd.f32 %v2709_v53, %v832_v47  ;;  %v1033_v50 = vadd.f32 %v2709_v53, %v1032_v48  ;;  %v834_v51 = vpop.f32.mrb[25].mxu0  ;;  %v1034_v52 = vpop.f32.mrb[25].mxu1 }
 0x146   :  { %v835_v54 = vpop.f32.mrb[26].mxu0  ;;  %v1035_v55 = vpop.f32.mrb[26].mxu1 }
 0x147   :  { %v1195_v56 = vmax.f32 %v833_v49, 0.0  ;;  %v1245_v57 = vmax.f32 %v1033_v50, 0.0  ;;  %v836_v58 = vadd.f32 %v2709_v53, %v835_v54  ;;  %v1036_v59 = vadd.f32 %v2709_v53, %v1035_v55  ;;  %v837_v60 = vpop.f32.mrb[27].mxu0  ;;  %v1037_v61 = vpop.f32.mrb[27].mxu1 }
 0x149   :  { %v2017_v62 = vpack.c.bf16 %v1195_v56, %v1195_v56  ;;  %v2067_v63 = vpack.c.bf16 %v1245_v57, %v1245_v57  ;;  %v1196_v0 = vmax.f32 %v836_v58, 0.0  ;;  %v1246_v1 = vmax.f32 %v1036_v59, 0.0 }
 0x14b   :  { %1696 = vst.msk [vmem:[%s3219_s3 + $0x30] sm:$0xf] %vm1683_vm0, %v2017_v62  ;;  %1746 = vst.msk [vmem:[%s3219_s3 + $0xf8] sm:$0xf] %vm1683_vm0, %v2067_v63  ;;  %v2018_v2 = vpack.c.bf16 %v1196_v0, %v1196_v0  ;;  %v2068_v3 = vpack.c.bf16 %v1246_v1, %v1246_v1 }
 0x14c   :  { %v840_v4 = vpop.f32.mrb[28].mxu0  ;;  %v1040_v5 = vpop.f32.mrb[28].mxu1 }
 0x14d   :  { %1697 = vst.msk [vmem:[%s3219_s3 + $0x34] sm:$0xf] %vm1683_vm0, %v2018_v2  ;;  %1747 = vst.msk [vmem:[%s3219_s3 + $0xfc] sm:$0xf] %vm1683_vm0, %v2068_v3  ;;  %v841_v6 = vadd.f32 %v2709_v53, %v840_v4  ;;  %v1041_v7 = vadd.f32 %v2709_v53, %v1040_v5  ;;  %v842_v8 = vpop.f32.mrb[29].mxu0  ;;  %v1042_v9 = vpop.f32.mrb[29].mxu1 }
 0x14e   :  { %v843_v10 = vpop.f32.mrb[30].mxu0  ;;  %v1043_v11 = vpop.f32.mrb[30].mxu1 }
 0x14f   :  { %v1197_v12 = vmax.f32 %v841_v6, 0.0  ;;  %v1247_v13 = vmax.f32 %v1041_v7, 0.0  ;;  %v844_v14 = vadd.f32 %v2709_v53, %v843_v10  ;;  %v1044_v15 = vadd.f32 %v2709_v53, %v1043_v11  ;;  %v845_v16 = vpop.f32.mrb[31].mxu0  ;;  %v1045_v17 = vpop.f32.mrb[31].mxu1 }
 0x151   :  { %v2019_v18 = vpack.c.bf16 %v1197_v12, %v1197_v12  ;;  %v2069_v19 = vpack.c.bf16 %v1247_v13, %v1247_v13  ;;  %v1198_v20 = vmax.f32 %v844_v14, 0.0  ;;  %v1248_v21 = vmax.f32 %v1044_v15, 0.0 }
 0x153   :  { %1698 = vst.msk [vmem:[%s3219_s3 + $0x38] sm:$0xf] %vm1683_vm0, %v2019_v18  ;;  %1748 = vst.msk [vmem:[%s3219_s3 + $0x100] sm:$0xf] %vm1683_vm0, %v2069_v19  ;;  %v2020_v22 = vpack.c.bf16 %v1198_v20, %v1198_v20  ;;  %v2070_v23 = vpack.c.bf16 %v1248_v21, %v1248_v21 }
 0x154   :  { %v848_v24 = vpop.f32.mrb[32].mxu0  ;;  %v1048_v25 = vpop.f32.mrb[32].mxu1 }
 0x155   :  { %1699 = vst.msk [vmem:[%s3219_s3 + $0x3c] sm:$0xf] %vm1683_vm0, %v2020_v22  ;;  %1749 = vst.msk [vmem:[%s3219_s3 + $0x104] sm:$0xf] %vm1683_vm0, %v2070_v23  ;;  %v849_v26 = vadd.f32 %v2709_v53, %v848_v24  ;;  %v1049_v27 = vadd.f32 %v2709_v53, %v1048_v25  ;;  %v850_v28 = vpop.f32.mrb[33].mxu0  ;;  %v1050_v29 = vpop.f32.mrb[33].mxu1 }
 0x156   :  { %v851_v30 = vpop.f32.mrb[34].mxu0  ;;  %v1051_v31 = vpop.f32.mrb[34].mxu1 }
 0x157   :  { %v1199_v32 = vmax.f32 %v849_v26, 0.0  ;;  %v1249_v33 = vmax.f32 %v1049_v27, 0.0  ;;  %v852_v34 = vadd.f32 %v2709_v53, %v851_v30  ;;  %v1052_v35 = vadd.f32 %v2709_v53, %v1051_v31  ;;  %v853_v36 = vpop.f32.mrb[35].mxu0  ;;  %v1053_v37 = vpop.f32.mrb[35].mxu1 }
 0x159   :  { %v2021_v38 = vpack.c.bf16 %v1199_v32, %v1199_v32  ;;  %v2071_v39 = vpack.c.bf16 %v1249_v33, %v1249_v33  ;;  %v1200_v40 = vmax.f32 %v852_v34, 0.0  ;;  %v1250_v41 = vmax.f32 %v1052_v35, 0.0 }
 0x15b   :  { %1700 = vst.msk [vmem:[%s3219_s3 + $0x40] sm:$0xf] %vm1683_vm0, %v2021_v38  ;;  %1750 = vst.msk [vmem:[%s3219_s3 + $0x108] sm:$0xf] %vm1683_vm0, %v2071_v39  ;;  %v2022_v42 = vpack.c.bf16 %v1200_v40, %v1200_v40  ;;  %v2072_v43 = vpack.c.bf16 %v1250_v41, %v1250_v41 }
 0x15c   :  { %v856_v44 = vpop.f32.mrb[36].mxu0  ;;  %v1056_v45 = vpop.f32.mrb[36].mxu1 }
 0x15d   :  { %1701 = vst.msk [vmem:[%s3219_s3 + $0x44] sm:$0xf] %vm1683_vm0, %v2022_v42  ;;  %1751 = vst.msk [vmem:[%s3219_s3 + $0x10c] sm:$0xf] %vm1683_vm0, %v2072_v43  ;;  %v857_v46 = vadd.f32 %v2709_v53, %v856_v44  ;;  %v1057_v47 = vadd.f32 %v2709_v53, %v1056_v45  ;;  %v858_v48 = vpop.f32.mrb[37].mxu0  ;;  %v1058_v49 = vpop.f32.mrb[37].mxu1 }
 0x15e   :  { %v859_v50 = vpop.f32.mrb[38].mxu0  ;;  %v1059_v51 = vpop.f32.mrb[38].mxu1 }
 0x15f   :  { %v1201_v52 = vmax.f32 %v857_v46, 0.0  ;;  %v1251_v54 = vmax.f32 %v1057_v47, 0.0  ;;  %v860_v55 = vadd.f32 %v2709_v53, %v859_v50  ;;  %v1060_v56 = vadd.f32 %v2709_v53, %v1059_v51  ;;  %v861_v57 = vpop.f32.mrb[39].mxu0  ;;  %v1061_v58 = vpop.f32.mrb[39].mxu1 }
 0x161   :  { %v2023_v59 = vpack.c.bf16 %v1201_v52, %v1201_v52  ;;  %v2073_v60 = vpack.c.bf16 %v1251_v54, %v1251_v54  ;;  %v1202_v61 = vmax.f32 %v860_v55, 0.0  ;;  %v1252_v62 = vmax.f32 %v1060_v56, 0.0 }
 0x163   :  { %1702 = vst.msk [vmem:[%s3219_s3 + $0x48] sm:$0xf] %vm1683_vm0, %v2023_v59  ;;  %1752 = vst.msk [vmem:[%s3219_s3 + $0x110] sm:$0xf] %vm1683_vm0, %v2073_v60  ;;  %v2024_v63 = vpack.c.bf16 %v1202_v61, %v1202_v61  ;;  %v2074_v0 = vpack.c.bf16 %v1252_v62, %v1252_v62 }
 0x164   :  { %v864_v1 = vpop.f32.mrb[40].mxu0  ;;  %v1064_v2 = vpop.f32.mrb[40].mxu1 }
 0x165   :  { %1703 = vst.msk [vmem:[%s3219_s3 + $0x4c] sm:$0xf] %vm1683_vm0, %v2024_v63  ;;  %1753 = vst.msk [vmem:[%s3219_s3 + $0x114] sm:$0xf] %vm1683_vm0, %v2074_v0  ;;  %v865_v3 = vadd.f32 %v2709_v53, %v864_v1  ;;  %v1065_v4 = vadd.f32 %v2709_v53, %v1064_v2  ;;  %v866_v5 = vpop.f32.mrb[41].mxu0  ;;  %v1066_v6 = vpop.f32.mrb[41].mxu1 }
 0x166   :  { %v867_v7 = vpop.f32.mrb[42].mxu0  ;;  %v1067_v8 = vpop.f32.mrb[42].mxu1 }
 0x167   :  { %v1203_v9 = vmax.f32 %v865_v3, 0.0  ;;  %v1253_v10 = vmax.f32 %v1065_v4, 0.0  ;;  %v868_v11 = vadd.f32 %v2709_v53, %v867_v7  ;;  %v1068_v12 = vadd.f32 %v2709_v53, %v1067_v8  ;;  %v869_v13 = vpop.f32.mrb[43].mxu0  ;;  %v1069_v14 = vpop.f32.mrb[43].mxu1 }
 0x169   :  { %v2025_v15 = vpack.c.bf16 %v1203_v9, %v1203_v9  ;;  %v2075_v16 = vpack.c.bf16 %v1253_v10, %v1253_v10  ;;  %v1204_v17 = vmax.f32 %v868_v11, 0.0  ;;  %v1254_v18 = vmax.f32 %v1068_v12, 0.0 }
 0x16b   :  { %1704 = vst.msk [vmem:[%s3219_s3 + $0x50] sm:$0xf] %vm1683_vm0, %v2025_v15  ;;  %1754 = vst.msk [vmem:[%s3219_s3 + $0x118] sm:$0xf] %vm1683_vm0, %v2075_v16  ;;  %v2026_v19 = vpack.c.bf16 %v1204_v17, %v1204_v17  ;;  %v2076_v20 = vpack.c.bf16 %v1254_v18, %v1254_v18 }
 0x16c   :  { %v872_v21 = vpop.f32.mrb[44].mxu0  ;;  %v1072_v22 = vpop.f32.mrb[44].mxu1 }
 0x16d   :  { %1705 = vst.msk [vmem:[%s3219_s3 + $0x54] sm:$0xf] %vm1683_vm0, %v2026_v19  ;;  %1755 = vst.msk [vmem:[%s3219_s3 + $0x11c] sm:$0xf] %vm1683_vm0, %v2076_v20  ;;  %v873_v23 = vadd.f32 %v2709_v53, %v872_v21  ;;  %v1073_v24 = vadd.f32 %v2709_v53, %v1072_v22  ;;  %v874_v25 = vpop.f32.mrb[45].mxu0  ;;  %v1074_v26 = vpop.f32.mrb[45].mxu1 }
 0x16e   :  { %v875_v27 = vpop.f32.mrb[46].mxu0  ;;  %v1075_v28 = vpop.f32.mrb[46].mxu1 }
 0x16f   :  { %v1205_v29 = vmax.f32 %v873_v23, 0.0  ;;  %v1255_v30 = vmax.f32 %v1073_v24, 0.0  ;;  %v876_v31 = vadd.f32 %v2709_v53, %v875_v27  ;;  %v1076_v32 = vadd.f32 %v2709_v53, %v1075_v28  ;;  %v877_v33 = vpop.f32.mrb[47].mxu0  ;;  %v1077_v34 = vpop.f32.mrb[47].mxu1 }
 0x171   :  { %v2027_v35 = vpack.c.bf16 %v1205_v29, %v1205_v29  ;;  %v2077_v36 = vpack.c.bf16 %v1255_v30, %v1255_v30  ;;  %v1206_v37 = vmax.f32 %v876_v31, 0.0  ;;  %v1256_v38 = vmax.f32 %v1076_v32, 0.0 }
 0x173   :  { %1706 = vst.msk [vmem:[%s3219_s3 + $0x58] sm:$0xf] %vm1683_vm0, %v2027_v35  ;;  %1756 = vst.msk [vmem:[%s3219_s3 + $0x120] sm:$0xf] %vm1683_vm0, %v2077_v36  ;;  %v2028_v39 = vpack.c.bf16 %v1206_v37, %v1206_v37  ;;  %v2078_v40 = vpack.c.bf16 %v1256_v38, %v1256_v38 }
 0x174   :  { %v880_v41 = vpop.f32.mrb[48].mxu0  ;;  %v1080_v42 = vpop.f32.mrb[48].mxu1 }
 0x175   :  { %1707 = vst.msk [vmem:[%s3219_s3 + $0x5c] sm:$0xf] %vm1683_vm0, %v2028_v39  ;;  %1757 = vst.msk [vmem:[%s3219_s3 + $0x124] sm:$0xf] %vm1683_vm0, %v2078_v40  ;;  %v881_v43 = vadd.f32 %v2709_v53, %v880_v41  ;;  %v1081_v44 = vadd.f32 %v2709_v53, %v1080_v42  ;;  %v882_v45 = vpop.f32.mrb[49].mxu0  ;;  %v1082_v46 = vpop.f32.mrb[49].mxu1 }
 0x176   :  { %v883_v47 = vpop.f32.mrb[50].mxu0  ;;  %v1083_v48 = vpop.f32.mrb[50].mxu1 }
 0x177   :  { %v1207_v49 = vmax.f32 %v881_v43, 0.0  ;;  %v1257_v50 = vmax.f32 %v1081_v44, 0.0  ;;  %v884_v51 = vadd.f32 %v2709_v53, %v883_v47  ;;  %v1084_v52 = vadd.f32 %v2709_v53, %v1083_v48  ;;  %v885_v54 = vpop.f32.mrb[51].mxu0  ;;  %v1085_v55 = vpop.f32.mrb[51].mxu1 }
 0x179   :  { %v2029_v56 = vpack.c.bf16 %v1207_v49, %v1207_v49  ;;  %v2079_v57 = vpack.c.bf16 %v1257_v50, %v1257_v50  ;;  %v1208_v58 = vmax.f32 %v884_v51, 0.0  ;;  %v1258_v59 = vmax.f32 %v1084_v52, 0.0 }
 0x17b   :  { %1708 = vst.msk [vmem:[%s3219_s3 + $0x60] sm:$0xf] %vm1683_vm0, %v2029_v56  ;;  %1758 = vst.msk [vmem:[%s3219_s3 + $0x128] sm:$0xf] %vm1683_vm0, %v2079_v57  ;;  %v2030_v60 = vpack.c.bf16 %v1208_v58, %v1208_v58  ;;  %v2080_v61 = vpack.c.bf16 %v1258_v59, %v1258_v59 }
 0x17c   :  { %v888_v62 = vpop.f32.mrb[52].mxu0  ;;  %v1088_v63 = vpop.f32.mrb[52].mxu1 }
 0x17d   :  { %1709 = vst.msk [vmem:[%s3219_s3 + $0x64] sm:$0xf] %vm1683_vm0, %v2030_v60  ;;  %1759 = vst.msk [vmem:[%s3219_s3 + $0x12c] sm:$0xf] %vm1683_vm0, %v2080_v61  ;;  %v889_v0 = vadd.f32 %v2709_v53, %v888_v62  ;;  %v1089_v1 = vadd.f32 %v2709_v53, %v1088_v63  ;;  %v890_v2 = vpop.f32.mrb[53].mxu0  ;;  %v1090_v3 = vpop.f32.mrb[53].mxu1 }
 0x17e   :  { %v891_v4 = vpop.f32.mrb[54].mxu0  ;;  %v1091_v5 = vpop.f32.mrb[54].mxu1 }
 0x17f   :  { %v1209_v6 = vmax.f32 %v889_v0, 0.0  ;;  %v1259_v7 = vmax.f32 %v1089_v1, 0.0  ;;  %v892_v8 = vadd.f32 %v2709_v53, %v891_v4  ;;  %v1092_v9 = vadd.f32 %v2709_v53, %v1091_v5  ;;  %v893_v10 = vpop.f32.mrb[55].mxu0  ;;  %v1093_v11 = vpop.f32.mrb[55].mxu1 }
 0x181   :  { %v2031_v12 = vpack.c.bf16 %v1209_v6, %v1209_v6  ;;  %v2081_v13 = vpack.c.bf16 %v1259_v7, %v1259_v7  ;;  %v1210_v14 = vmax.f32 %v892_v8, 0.0  ;;  %v1260_v15 = vmax.f32 %v1092_v9, 0.0 }
 0x183   :  { %1710 = vst.msk [vmem:[%s3219_s3 + $0x68] sm:$0xf] %vm1683_vm0, %v2031_v12  ;;  %1760 = vst.msk [vmem:[%s3219_s3 + $0x130] sm:$0xf] %vm1683_vm0, %v2081_v13  ;;  %v2032_v16 = vpack.c.bf16 %v1210_v14, %v1210_v14  ;;  %v2082_v17 = vpack.c.bf16 %v1260_v15, %v1260_v15 }
 0x184   :  { %v896_v18 = vpop.f32.mrb[56].mxu0  ;;  %v1096_v19 = vpop.f32.mrb[56].mxu1 }
 0x185   :  { %1711 = vst.msk [vmem:[%s3219_s3 + $0x6c] sm:$0xf] %vm1683_vm0, %v2032_v16  ;;  %1761 = vst.msk [vmem:[%s3219_s3 + $0x134] sm:$0xf] %vm1683_vm0, %v2082_v17  ;;  %v897_v20 = vadd.f32 %v2709_v53, %v896_v18  ;;  %v1097_v21 = vadd.f32 %v2709_v53, %v1096_v19  ;;  %v898_v22 = vpop.f32.mrb[57].mxu0  ;;  %v1098_v23 = vpop.f32.mrb[57].mxu1 }
 0x186   :  { %v899_v24 = vpop.f32.mrb[58].mxu0  ;;  %v1099_v25 = vpop.f32.mrb[58].mxu1 }
 0x187   :  { %v1211_v26 = vmax.f32 %v897_v20, 0.0  ;;  %v1261_v27 = vmax.f32 %v1097_v21, 0.0  ;;  %v900_v28 = vadd.f32 %v2709_v53, %v899_v24  ;;  %v1100_v29 = vadd.f32 %v2709_v53, %v1099_v25  ;;  %v901_v30 = vpop.f32.mrb[59].mxu0  ;;  %v1101_v31 = vpop.f32.mrb[59].mxu1 }
 0x189   :  { %v2033_v32 = vpack.c.bf16 %v1211_v26, %v1211_v26  ;;  %v2083_v33 = vpack.c.bf16 %v1261_v27, %v1261_v27  ;;  %v1212_v34 = vmax.f32 %v900_v28, 0.0  ;;  %v1262_v35 = vmax.f32 %v1100_v29, 0.0 }
 0x18b   :  { %1712 = vst.msk [vmem:[%s3219_s3 + $0x70] sm:$0xf] %vm1683_vm0, %v2033_v32  ;;  %1762 = vst.msk [vmem:[%s3219_s3 + $0x138] sm:$0xf] %vm1683_vm0, %v2083_v33  ;;  %v2034_v36 = vpack.c.bf16 %v1212_v34, %v1212_v34  ;;  %v2084_v37 = vpack.c.bf16 %v1262_v35, %v1262_v35 }
 0x18c   :  { %v904_v38 = vpop.f32.mrb[60].mxu0  ;;  %v1104_v39 = vpop.f32.mrb[60].mxu1 }
 0x18d   :  { %1713 = vst.msk [vmem:[%s3219_s3 + $0x74] sm:$0xf] %vm1683_vm0, %v2034_v36  ;;  %1763 = vst.msk [vmem:[%s3219_s3 + $0x13c] sm:$0xf] %vm1683_vm0, %v2084_v37  ;;  %v905_v40 = vadd.f32 %v2709_v53, %v904_v38  ;;  %v1105_v41 = vadd.f32 %v2709_v53, %v1104_v39  ;;  %v906_v42 = vpop.f32.mrb[61].mxu0  ;;  %v1106_v43 = vpop.f32.mrb[61].mxu1 }
 0x18e   :  { %v907_v44 = vpop.f32.mrb[62].mxu0  ;;  %v1107_v45 = vpop.f32.mrb[62].mxu1 }
 0x18f   :  { %v1213_v46 = vmax.f32 %v905_v40, 0.0  ;;  %v1263_v47 = vmax.f32 %v1105_v41, 0.0  ;;  %v908_v48 = vadd.f32 %v2709_v53, %v907_v44  ;;  %v1108_v49 = vadd.f32 %v2709_v53, %v1107_v45  ;;  %v909_v50 = vpop.f32.mrb[63].mxu0  ;;  %v1109_v51 = vpop.f32.mrb[63].mxu1 }
 0x191   :  { %v2035_v52 = vpack.c.bf16 %v1213_v46, %v1213_v46  ;;  %v2085_v54 = vpack.c.bf16 %v1263_v47, %v1263_v47  ;;  %v1214_v55 = vmax.f32 %v908_v48, 0.0  ;;  %v1264_v56 = vmax.f32 %v1108_v49, 0.0 }
 0x193   :  { %1714 = vst.msk [vmem:[%s3219_s3 + $0x78] sm:$0xf] %vm1683_vm0, %v2035_v52  ;;  %1764 = vst.msk [vmem:[%s3219_s3 + $0x140] sm:$0xf] %vm1683_vm0, %v2085_v54  ;;  %v2036_v57 = vpack.c.bf16 %v1214_v55, %v1214_v55  ;;  %v2086_v58 = vpack.c.bf16 %v1264_v56, %v1264_v56 }
 0x194   :  { %v912_v59 = vpop.f32.mrb[64].mxu0  ;;  %v1112_v60 = vpop.f32.mrb[64].mxu1 }
 0x195   :  { %1715 = vst.msk [vmem:[%s3219_s3 + $0x7c] sm:$0xf] %vm1683_vm0, %v2036_v57  ;;  %1765 = vst.msk [vmem:[%s3219_s3 + $0x144] sm:$0xf] %vm1683_vm0, %v2086_v58  ;;  %v913_v61 = vadd.f32 %v2709_v53, %v912_v59  ;;  %v1113_v62 = vadd.f32 %v2709_v53, %v1112_v60  ;;  %v914_v63 = vpop.f32.mrb[65].mxu0  ;;  %v1114_v0 = vpop.f32.mrb[65].mxu1 }
 0x196   :  { %v915_v1 = vpop.f32.mrb[66].mxu0  ;;  %v1115_v2 = vpop.f32.mrb[66].mxu1 }
 0x197   :  { %v1215_v3 = vmax.f32 %v913_v61, 0.0  ;;  %v1265_v4 = vmax.f32 %v1113_v62, 0.0  ;;  %v916_v5 = vadd.f32 %v2709_v53, %v915_v1  ;;  %v1116_v6 = vadd.f32 %v2709_v53, %v1115_v2  ;;  %v917_v7 = vpop.f32.mrb[67].mxu0  ;;  %v1117_v8 = vpop.f32.mrb[67].mxu1 }
 0x199   :  { %v2037_v9 = vpack.c.bf16 %v1215_v3, %v1215_v3  ;;  %v2087_v10 = vpack.c.bf16 %v1265_v4, %v1265_v4  ;;  %v1216_v11 = vmax.f32 %v916_v5, 0.0  ;;  %v1266_v12 = vmax.f32 %v1116_v6, 0.0 }
 0x19b   :  { %1716 = vst.msk [vmem:[%s3219_s3 + $0x80] sm:$0xf] %vm1683_vm0, %v2037_v9  ;;  %1766 = vst.msk [vmem:[%s3219_s3 + $0x148] sm:$0xf] %vm1683_vm0, %v2087_v10  ;;  %v2038_v13 = vpack.c.bf16 %v1216_v11, %v1216_v11  ;;  %v2088_v14 = vpack.c.bf16 %v1266_v12, %v1266_v12 }
 0x19c   :  { %v920_v15 = vpop.f32.mrb[68].mxu0  ;;  %v1120_v16 = vpop.f32.mrb[68].mxu1 }
 0x19d   :  { %1717 = vst.msk [vmem:[%s3219_s3 + $0x84] sm:$0xf] %vm1683_vm0, %v2038_v13  ;;  %1767 = vst.msk [vmem:[%s3219_s3 + $0x14c] sm:$0xf] %vm1683_vm0, %v2088_v14  ;;  %v921_v17 = vadd.f32 %v2709_v53, %v920_v15  ;;  %v1121_v18 = vadd.f32 %v2709_v53, %v1120_v16  ;;  %v922_v19 = vpop.f32.mrb[69].mxu0  ;;  %v1122_v20 = vpop.f32.mrb[69].mxu1 }
 0x19e   :  { %v923_v21 = vpop.f32.mrb[70].mxu0  ;;  %v1123_v22 = vpop.f32.mrb[70].mxu1 }
 0x19f   :  { %v1217_v23 = vmax.f32 %v921_v17, 0.0  ;;  %v1267_v24 = vmax.f32 %v1121_v18, 0.0  ;;  %v924_v25 = vadd.f32 %v2709_v53, %v923_v21  ;;  %v1124_v26 = vadd.f32 %v2709_v53, %v1123_v22  ;;  %v925_v27 = vpop.f32.mrb[71].mxu0  ;;  %v1125_v28 = vpop.f32.mrb[71].mxu1 }
 0x1a1   :  { %v2039_v29 = vpack.c.bf16 %v1217_v23, %v1217_v23  ;;  %v2089_v30 = vpack.c.bf16 %v1267_v24, %v1267_v24  ;;  %v1218_v31 = vmax.f32 %v924_v25, 0.0  ;;  %v1268_v32 = vmax.f32 %v1124_v26, 0.0 }
 0x1a3   :  { %1718 = vst.msk [vmem:[%s3219_s3 + $0x88] sm:$0xf] %vm1683_vm0, %v2039_v29  ;;  %1768 = vst.msk [vmem:[%s3219_s3 + $0x150] sm:$0xf] %vm1683_vm0, %v2089_v30  ;;  %v2040_v33 = vpack.c.bf16 %v1218_v31, %v1218_v31  ;;  %v2090_v34 = vpack.c.bf16 %v1268_v32, %v1268_v32 }
 0x1a4   :  { %v928_v35 = vpop.f32.mrb[72].mxu0  ;;  %v1128_v36 = vpop.f32.mrb[72].mxu1 }
 0x1a5   :  { %1719 = vst.msk [vmem:[%s3219_s3 + $0x8c] sm:$0xf] %vm1683_vm0, %v2040_v33  ;;  %1769 = vst.msk [vmem:[%s3219_s3 + $0x154] sm:$0xf] %vm1683_vm0, %v2090_v34  ;;  %v929_v37 = vadd.f32 %v2709_v53, %v928_v35  ;;  %v1129_v38 = vadd.f32 %v2709_v53, %v1128_v36  ;;  %v930_v39 = vpop.f32.mrb[73].mxu0  ;;  %v1130_v40 = vpop.f32.mrb[73].mxu1 }
 0x1a6   :  { %v931_v41 = vpop.f32.mrb[74].mxu0  ;;  %v1131_v42 = vpop.f32.mrb[74].mxu1 }
 0x1a7   :  { %v1219_v43 = vmax.f32 %v929_v37, 0.0  ;;  %v1269_v44 = vmax.f32 %v1129_v38, 0.0  ;;  %v932_v45 = vadd.f32 %v2709_v53, %v931_v41  ;;  %v1132_v46 = vadd.f32 %v2709_v53, %v1131_v42  ;;  %v933_v47 = vpop.f32.mrb[75].mxu0  ;;  %v1133_v48 = vpop.f32.mrb[75].mxu1  ;;  %v3136_v42 = vld [vmem:[%s3218_s2] ss:$0 sm:$0xff] }
 0x1a9   :  { %v2041_v49 = vpack.c.bf16 %v1219_v43, %v1219_v43  ;;  %v2091_v50 = vpack.c.bf16 %v1269_v44, %v1269_v44  ;;  %v1220_v51 = vmax.f32 %v932_v45, 0.0  ;;  %v1270_v52 = vmax.f32 %v1132_v46, 0.0 }
 0x1ab   :  { %1720 = vst.msk [vmem:[%s3219_s3 + $0x90] sm:$0xf] %vm1683_vm0, %v2041_v49  ;;  %1770 = vst.msk [vmem:[%s3219_s3 + $0x158] sm:$0xf] %vm1683_vm0, %v2091_v50  ;;  %v2042_v54 = vpack.c.bf16 %v1220_v51, %v1220_v51  ;;  %v2092_v55 = vpack.c.bf16 %v1270_v52, %v1270_v52 }
 0x1ac   :  { %v936_v56 = vpop.f32.mrb[76].mxu0  ;;  %v1136_v57 = vpop.f32.mrb[76].mxu1 }
 0x1ad   :  { %1721 = vst.msk [vmem:[%s3219_s3 + $0x94] sm:$0xf] %vm1683_vm0, %v2042_v54  ;;  %1771 = vst.msk [vmem:[%s3219_s3 + $0x15c] sm:$0xf] %vm1683_vm0, %v2092_v55  ;;  %v937_v58 = vadd.f32 %v2709_v53, %v936_v56  ;;  %v1137_v59 = vadd.f32 %v2709_v53, %v1136_v57  ;;  %v938_v60 = vpop.f32.mrb[77].mxu0  ;;  %v1138_v61 = vpop.f32.mrb[77].mxu1 }
 0x1ae   :  { %v939_v62 = vpop.f32.mrb[78].mxu0  ;;  %v1139_v63 = vpop.f32.mrb[78].mxu1 }
 0x1af   :  { %v1221_v0 = vmax.f32 %v937_v58, 0.0  ;;  %v1271_v1 = vmax.f32 %v1137_v59, 0.0  ;;  %v940_v2 = vadd.f32 %v2709_v53, %v939_v62  ;;  %v1140_v3 = vadd.f32 %v2709_v53, %v1139_v63  ;;  %v941_v4 = vpop.f32.mrb[79].mxu0  ;;  %v1141_v5 = vpop.f32.mrb[79].mxu1 }
 0x1b1   :  { %v2043_v6 = vpack.c.bf16 %v1221_v0, %v1221_v0  ;;  %v2093_v7 = vpack.c.bf16 %v1271_v1, %v1271_v1  ;;  %v1222_v8 = vmax.f32 %v940_v2, 0.0  ;;  %v1272_v9 = vmax.f32 %v1140_v3, 0.0 }
 0x1b3   :  { %1722 = vst.msk [vmem:[%s3219_s3 + $0x98] sm:$0xf] %vm1683_vm0, %v2043_v6  ;;  %1772 = vst.msk [vmem:[%s3219_s3 + $0x160] sm:$0xf] %vm1683_vm0, %v2093_v7  ;;  %v2044_v10 = vpack.c.bf16 %v1222_v8, %v1222_v8  ;;  %v2094_v11 = vpack.c.bf16 %v1272_v9, %v1272_v9 }
 0x1b4   :  { %v944_v12 = vpop.f32.mrb[80].mxu0  ;;  %v1144_v13 = vpop.f32.mrb[80].mxu1 }
 0x1b5   :  { %1723 = vst.msk [vmem:[%s3219_s3 + $0x9c] sm:$0xf] %vm1683_vm0, %v2044_v10  ;;  %1773 = vst.msk [vmem:[%s3219_s3 + $0x164] sm:$0xf] %vm1683_vm0, %v2094_v11  ;;  %v945_v14 = vadd.f32 %v2709_v53, %v944_v12  ;;  %v1145_v15 = vadd.f32 %v2709_v53, %v1144_v13  ;;  %v946_v16 = vpop.f32.mrb[81].mxu0  ;;  %v1146_v17 = vpop.f32.mrb[81].mxu1 }
 0x1b6   :  { %v947_v18 = vpop.f32.mrb[82].mxu0  ;;  %v1147_v19 = vpop.f32.mrb[82].mxu1 }
 0x1b7   :  { %v1223_v20 = vmax.f32 %v945_v14, 0.0  ;;  %v1273_v21 = vmax.f32 %v1145_v15, 0.0  ;;  %v948_v22 = vadd.f32 %v2709_v53, %v947_v18  ;;  %v1148_v23 = vadd.f32 %v2709_v53, %v1147_v19  ;;  %v949_v24 = vpop.f32.mrb[83].mxu0  ;;  %v1149_v25 = vpop.f32.mrb[83].mxu1 }
 0x1b9   :  { %v2045_v26 = vpack.c.bf16 %v1223_v20, %v1223_v20  ;;  %v2095_v27 = vpack.c.bf16 %v1273_v21, %v1273_v21  ;;  %v1224_v28 = vmax.f32 %v948_v22, 0.0  ;;  %v1274_v29 = vmax.f32 %v1148_v23, 0.0 }
 0x1bb   :  { %1724 = vst.msk [vmem:[%s3219_s3 + $0xa0] sm:$0xf] %vm1683_vm0, %v2045_v26  ;;  %1774 = vst.msk [vmem:[%s3219_s3 + $0x168] sm:$0xf] %vm1683_vm0, %v2095_v27  ;;  %v2046_v30 = vpack.c.bf16 %v1224_v28, %v1224_v28  ;;  %v2096_v31 = vpack.c.bf16 %v1274_v29, %v1274_v29 }
 0x1bc   :  { %v952_v32 = vpop.f32.mrb[84].mxu0  ;;  %v1152_v33 = vpop.f32.mrb[84].mxu1 }
 0x1bd   :  { %1725 = vst.msk [vmem:[%s3219_s3 + $0xa4] sm:$0xf] %vm1683_vm0, %v2046_v30  ;;  %1775 = vst.msk [vmem:[%s3219_s3 + $0x16c] sm:$0xf] %vm1683_vm0, %v2096_v31  ;;  %v953_v34 = vadd.f32 %v2709_v53, %v952_v32  ;;  %v1153_v35 = vadd.f32 %v2709_v53, %v1152_v33  ;;  %v954_v36 = vpop.f32.mrb[85].mxu0  ;;  %v1154_v37 = vpop.f32.mrb[85].mxu1 }
 0x1be   :  { %v955_v38 = vpop.f32.mrb[86].mxu0  ;;  %v1155_v39 = vpop.f32.mrb[86].mxu1 }
 0x1bf   :  { %v1225_v40 = vmax.f32 %v953_v34, 0.0  ;;  %v1275_v41 = vmax.f32 %v1153_v35, 0.0  ;;  %v956_v43 = vadd.f32 %v3136_v42, %v955_v38  ;;  %v1156_v44 = vadd.f32 %v3136_v42, %v1155_v39  ;;  %v957_v45 = vpop.f32.mrb[87].mxu0  ;;  %v1157_v46 = vpop.f32.mrb[87].mxu1 }
 0x1c1   :  { %v2047_v47 = vpack.c.bf16 %v1225_v40, %v1225_v40  ;;  %v2097_v48 = vpack.c.bf16 %v1275_v41, %v1275_v41  ;;  %v1226_v53 = vmax.f32 %v956_v43, 0.0  ;;  %v1276_v49 = vmax.f32 %v1156_v44, 0.0 }
 0x1c3   :  { %1726 = vst.msk [vmem:[%s3219_s3 + $0xa8] sm:$0xf] %vm1683_vm0, %v2047_v47  ;;  %1776 = vst.msk [vmem:[%s3219_s3 + $0x170] sm:$0xf] %vm1683_vm0, %v2097_v48  ;;  %v2048_v50 = vpack.c.bf16 %v1226_v53, %v1226_v53  ;;  %v2098_v51 = vpack.c.bf16 %v1276_v49, %v1276_v49 }
 0x1c4   :  { %v960_v52 = vpop.f32.mrb[88].mxu0  ;;  %v1160_v54 = vpop.f32.mrb[88].mxu1 }
 0x1c5   :  { %1727 = vst.msk [vmem:[%s3219_s3 + $0xac] sm:$0xf] %vm1683_vm0, %v2048_v50  ;;  %1777 = vst.msk [vmem:[%s3219_s3 + $0x174] sm:$0xf] %vm1683_vm0, %v2098_v51  ;;  %v961_v55 = vadd.f32 %v3136_v42, %v960_v52  ;;  %v1161_v56 = vadd.f32 %v3136_v42, %v1160_v54  ;;  %v962_v57 = vpop.f32.mrb[89].mxu0  ;;  %v1162_v58 = vpop.f32.mrb[89].mxu1 }
 0x1c6   :  { %v963_v59 = vpop.f32.mrb[90].mxu0  ;;  %v1163_v60 = vpop.f32.mrb[90].mxu1 }
 0x1c7   :  { %v1227_v61 = vmax.f32 %v961_v55, 0.0  ;;  %v1277_v62 = vmax.f32 %v1161_v56, 0.0  ;;  %v964_v63 = vadd.f32 %v3136_v42, %v963_v59  ;;  %v1164_v0 = vadd.f32 %v3136_v42, %v1163_v60  ;;  %v965_v1 = vpop.f32.mrb[91].mxu0  ;;  %v1165_v2 = vpop.f32.mrb[91].mxu1 }
 0x1c9   :  { %v2049_v3 = vpack.c.bf16 %v1227_v61, %v1227_v61  ;;  %v2099_v4 = vpack.c.bf16 %v1277_v62, %v1277_v62  ;;  %v1228_v5 = vmax.f32 %v964_v63, 0.0  ;;  %v1278_v6 = vmax.f32 %v1164_v0, 0.0 }
 0x1cb   :  { %1728 = vst.msk [vmem:[%s3219_s3 + $0xb0] sm:$0xf] %vm1683_vm0, %v2049_v3  ;;  %1778 = vst.msk [vmem:[%s3219_s3 + $0x178] sm:$0xf] %vm1683_vm0, %v2099_v4  ;;  %v2050_v7 = vpack.c.bf16 %v1228_v5, %v1228_v5  ;;  %v2100_v8 = vpack.c.bf16 %v1278_v6, %v1278_v6 }
 0x1cc   :  { %v968_v9 = vpop.f32.mrb[92].mxu0  ;;  %v1168_v10 = vpop.f32.mrb[92].mxu1 }
 0x1cd   :  { %1729 = vst.msk [vmem:[%s3219_s3 + $0xb4] sm:$0xf] %vm1683_vm0, %v2050_v7  ;;  %1779 = vst.msk [vmem:[%s3219_s3 + $0x17c] sm:$0xf] %vm1683_vm0, %v2100_v8  ;;  %v969_v11 = vadd.f32 %v3136_v42, %v968_v9  ;;  %v1169_v12 = vadd.f32 %v3136_v42, %v1168_v10  ;;  %v970_v13 = vpop.f32.mrb[93].mxu0  ;;  %v1170_v14 = vpop.f32.mrb[93].mxu1 }
 0x1ce   :  { %v971_v15 = vpop.f32.mrb[94].mxu0  ;;  %v1171_v16 = vpop.f32.mrb[94].mxu1 }
 0x1cf   :  { %v1229_v17 = vmax.f32 %v969_v11, 0.0  ;;  %v1279_v18 = vmax.f32 %v1169_v12, 0.0  ;;  %v972_v19 = vadd.f32 %v3136_v42, %v971_v15  ;;  %v1172_v20 = vadd.f32 %v3136_v42, %v1171_v16  ;;  %v973_v21 = vpop.f32.mrb[95].mxu0  ;;  %v1173_v22 = vpop.f32.mrb[95].mxu1 }
 0x1d1   :  { %v2051_v23 = vpack.c.bf16 %v1229_v17, %v1229_v17  ;;  %v2101_v24 = vpack.c.bf16 %v1279_v18, %v1279_v18  ;;  %v1230_v25 = vmax.f32 %v972_v19, 0.0  ;;  %v1280_v26 = vmax.f32 %v1172_v20, 0.0 }
 0x1d3   :  { %1730 = vst.msk [vmem:[%s3219_s3 + $0xb8] sm:$0xf] %vm1683_vm0, %v2051_v23  ;;  %1780 = vst.msk [vmem:[%s3219_s3 + $0x180] sm:$0xf] %vm1683_vm0, %v2101_v24  ;;  %v2052_v27 = vpack.c.bf16 %v1230_v25, %v1230_v25  ;;  %v2102_v28 = vpack.c.bf16 %v1280_v26, %v1280_v26 }
 0x1d4   :  { %v976_v29 = vpop.f32.mrb[96].mxu0  ;;  %v1176_v30 = vpop.f32.mrb[96].mxu1 }
 0x1d5   :  { %1731 = vst.msk [vmem:[%s3219_s3 + $0xbc] sm:$0xf] %vm1683_vm0, %v2052_v27  ;;  %1781 = vst.msk [vmem:[%s3219_s3 + $0x184] sm:$0xf] %vm1683_vm0, %v2102_v28  ;;  %v977_v31 = vadd.f32 %v3136_v42, %v976_v29  ;;  %v1177_v32 = vadd.f32 %v3136_v42, %v1176_v30  ;;  %v978_v33 = vpop.f32.mrb[97].mxu0  ;;  %v1178_v34 = vpop.f32.mrb[97].mxu1 }
 0x1d6   :  { %v979_v35 = vpop.f32.mrb[98].mxu0  ;;  %v1179_v36 = vpop.f32.mrb[98].mxu1 }
 0x1d7   :  { %v1231_v37 = vmax.f32 %v977_v31, 0.0  ;;  %v1281_v38 = vmax.f32 %v1177_v32, 0.0  ;;  %v980_v39 = vadd.f32 %v3136_v42, %v979_v35  ;;  %v1180_v40 = vadd.f32 %v3136_v42, %v1179_v36  ;;  %v981_v41 = vpop.f32.mrb[99].mxu0  ;;  %v1181_v43 = vpop.f32.mrb[99].mxu1 }
 0x1d9   :  { %v2053_v44 = vpack.c.bf16 %v1231_v37, %v1231_v37  ;;  %v2103_v45 = vpack.c.bf16 %v1281_v38, %v1281_v38  ;;  %v1232_v46 = vmax.f32 %v980_v39, 0.0  ;;  %v1282_v47 = vmax.f32 %v1180_v40, 0.0 }
 0x1db   :  { %1732 = vst.msk [vmem:[%s3219_s3 + $0xc0] sm:$0xf] %vm1683_vm0, %v2053_v44  ;;  %1782 = vst.msk [vmem:[%s3219_s3 + $0x188] sm:$0xf] %vm1683_vm0, %v2103_v45  ;;  %v2054_v48 = vpack.c.bf16 %v1232_v46, %v1232_v46  ;;  %v2104_v53 = vpack.c.bf16 %v1282_v47, %v1282_v47 }
 0x1dd   :  { %1733 = vst.msk [vmem:[%s3219_s3 + $0xc4] sm:$0xf] %vm1683_vm0, %v2054_v48  ;;  %1783 = vst.msk [vmem:[%s3219_s3 + $0x18c] sm:$0xf] %vm1683_vm0, %v2104_v53 }

// kernel: cnn_base_forward.5
= control target key start
LH: loop header
LB: loop body
LE: loop exit
PB: predicated region body
PF: predicated region fallthrough
CT: control target
= control target key end

     0   :  { %vm880_vm0 = vcmask 519168   ;;  %vm901_vm1 = vcmask 516096   ;;  %s1637_s1 = inlined_call_operand.vmem [shape: bf16[512,64], index: 1, kind: input, shape index: {}]   ;;  %s1638_s0 = inlined_call_operand.vmem [shape: bf16[162,512], index: 0, kind: input, shape index: {}]   ;;  %s1639_s2 = inlined_call_operand.vmem [shape: f32[1,64], index: 2, kind: input, shape index: {}]   ;;  %s1640_s3 = inlined_call_operand.vmem [shape: bf16[162,64], index: 3, kind: output, shape index: {}]  }
   0x1   :  { %v1190_v0 = vld [vmem:[%s1637_s1 + $0x40] sm:$0xff]   ;;  %v1194_v4 = vld [vmem:[%s1637_s1 + $0x48] sm:$0xff]   ;;  %v1198_v8 = vld [vmem:[%s1637_s1 + $0x50] sm:$0xff]  }
   0x2   :  { %v1191_v1 = vld [vmem:[%s1637_s1 + $0xc0] sm:$0xff]   ;;  %1026 = vmatprep.subr.bf16.mxu0 %v1190_v0  ;;  %v1195_v5 = vld [vmem:[%s1637_s1 + $0xc8] sm:$0xff]   ;;  %v1199_v9 = vld [vmem:[%s1637_s1 + $0xd0] sm:$0xff]  }
   0x3   :  { %v1192_v2 = vld [vmem:[%s1637_s1] sm:$0xff]   ;;  %1108 = vmatprep.subr.bf16.mxu1 %v1191_v1  ;;  %v1196_v6 = vld [vmem:[%s1637_s1 + $0x8] sm:$0xff]   ;;  %v1200_v10 = vld [vmem:[%s1637_s1 + $0x10] sm:$0xff]  }
   0x4   :  { %v1193_v3 = vld [vmem:[%s1637_s1 + $0x80] sm:$0xff]   ;;  %1027 = vmatpush3.bf16.msra.mxu0 %v1192_v2  ;;  %v1197_v7 = vld [vmem:[%s1637_s1 + $0x88] sm:$0xff]   ;;  %v1201_v11 = vld [vmem:[%s1637_s1 + $0x90] sm:$0xff]  }
   0x5   :  { %1109 = vmatpush3.bf16.msra.mxu1 %v1193_v3  ;;  %1028 = vmatprep.subr.bf16.mxu0 %v1194_v4  ;;  %v1202_v12 = vld [vmem:[%s1637_s1 + $0x58] sm:$0xff]   ;;  %v1206_v16 = vld [vmem:[%s1637_s1 + $0x60] sm:$0xff]   ;;  %v1210_v20 = vld [vmem:[%s1637_s1 + $0x68] sm:$0xff]  }
   0x6   :  { %1110 = vmatprep.subr.bf16.mxu1 %v1195_v5  ;;  %v1203_v13 = vld [vmem:[%s1637_s1 + $0xd8] sm:$0xff]   ;;  %v1207_v17 = vld [vmem:[%s1637_s1 + $0xe0] sm:$0xff]   ;;  %v1211_v21 = vld [vmem:[%s1637_s1 + $0xe8] sm:$0xff]  }
   0x7   :  { %v1204_v14 = vld [vmem:[%s1637_s1 + $0x18] sm:$0xff]   ;;  %v1208_v18 = vld [vmem:[%s1637_s1 + $0x20] sm:$0xff]   ;;  %v1212_v22 = vld [vmem:[%s1637_s1 + $0x28] sm:$0xff]  }
   0x8   :  { %1029 = vmatpush3.bf16.msra.mxu0 %v1196_v6  ;;  %v1205_v15 = vld [vmem:[%s1637_s1 + $0x98] sm:$0xff]   ;;  %v1209_v19 = vld [vmem:[%s1637_s1 + $0xa0] sm:$0xff]   ;;  %v1213_v23 = vld [vmem:[%s1637_s1 + $0xa8] sm:$0xff]  }
   0x9   :  { %1111 = vmatpush3.bf16.msra.mxu1 %v1197_v7  ;;  %1030 = vmatprep.subr.bf16.mxu0 %v1198_v8  ;;  %v1214_v24 = vld [vmem:[%s1637_s1 + $0x70] sm:$0xff]   ;;  %v1218_v28 = vld [vmem:[%s1637_s1 + $0x78] sm:$0xff]   ;;  %v55_v6 = vld [vmem:[%s1638_s0 + $0x140] sm:$0x11] }
   0xa   :  { %1112 = vmatprep.subr.bf16.mxu1 %v1199_v9  ;;  %v1215_v25 = vld [vmem:[%s1637_s1 + $0xf0] sm:$0xff]   ;;  %v1219_v29 = vld [vmem:[%s1637_s1 + $0xf8] sm:$0xff]   ;;  %v56_v7 = vld [vmem:[%s1638_s0 + $0x148] sm:$0x11] }
   0xb   :  { %v1216_v26 = vld [vmem:[%s1637_s1 + $0x30] sm:$0xff]   ;;  %v1220_v30 = vld [vmem:[%s1637_s1 + $0x38] sm:$0xff]  }
   0xc   :  { %1031 = vmatpush3.bf16.msra.mxu0 %v1200_v10  ;;  %v1217_v27 = vld [vmem:[%s1637_s1 + $0xb0] sm:$0xff]   ;;  %v1221_v31 = vld [vmem:[%s1637_s1 + $0xb8] sm:$0xff]   ;;  %v949_v10 = vcombine.high %v55_v6, %v55_v6 }
   0xd   :  { %1113 = vmatpush3.bf16.msra.mxu1 %v1201_v11  ;;  %1032 = vmatprep.subr.bf16.mxu0 %v1202_v12  ;;  %v1222_v32 = vld [vmem:[%s1638_s0] ss:$16 sps:$4 sm:$0xff]   ;;  %v1224_v33 = vld [vmem:[%s1638_s0 + $0x4] ss:$16 sps:$4 sm:$0xff]   ;;  %v1225_v34 = vld [vmem:[%s1638_s0 + $0x8] ss:$16 sps:$4 sm:$0xff]   ;;  %v951_v11 = vcombine.high %v56_v7, %v56_v7  ;;  %v948_v12 = vcombine.low %v55_v6, %v55_v6 }
   0xe   :  { %1114 = vmatprep.subr.bf16.mxu1 %v1203_v13  ;;  %v1227_v35 = vld [vmem:[%s1638_s0 + $0xc] ss:$16 sps:$4 sm:$0xff]   ;;  %566 = vmatprep.mubr.bf16.mxu0 %v1224_v33  ;;  %v1228_v36 = vld [vmem:[%s1638_s0 + $0x24] ss:$16 sps:$4 sm:$0xff]   ;;  %v1232_v38 = vld [vmem:[%s1638_s0 + $0x20] ss:$16 sps:$4 sm:$0xff]   ;;  %v950_v13 = vcombine.low %v56_v7, %v56_v7 }
   0xf   :  { %686 = vmatprep.mubr.bf16.mxu1 %v1227_v35  ;;  %v1230_v37 = vld [vmem:[%s1638_s0 + $0x2c] ss:$16 sps:$4 sm:$0xff]   ;;  %v1233_v39 = vld [vmem:[%s1638_s0 + $0x28] ss:$16 sps:$4 sm:$0xff]   ;;  %v1234_v40 = vld [vmem:[%s1638_s0 + $0x44] ss:$16 sps:$4 sm:$0xff]  }
  0x10   :  { %1033 = vmatpush3.bf16.msra.mxu0 %v1204_v14  ;;  %v1236_v41 = vld [vmem:[%s1638_s0 + $0x4c] ss:$16 sps:$4 sm:$0xff]   ;;  %v1238_v42 = vld [vmem:[%s1638_s0 + $0x40] ss:$16 sps:$4 sm:$0xff]   ;;  %v1239_v43 = vld [vmem:[%s1638_s0 + $0x48] ss:$16 sps:$4 sm:$0xff]  }
  0x11   :  { %1115 = vmatpush3.bf16.msra.mxu1 %v1205_v15  ;;  %1034 = vmatprep.subr.bf16.mxu0 %v1206_v16  ;;  %v1240_v44 = vld [vmem:[%s1638_s0 + $0x64] ss:$16 sps:$4 sm:$0xff]   ;;  %v1242_v45 = vld [vmem:[%s1638_s0 + $0x6c] ss:$16 sps:$4 sm:$0xff]   ;;  %v1244_v46 = vld [vmem:[%s1638_s0 + $0x60] ss:$16 sps:$4 sm:$0xff]  }
  0x12   :  { %1116 = vmatprep.subr.bf16.mxu1 %v1207_v17  ;;  %v1245_v47 = vld [vmem:[%s1638_s0 + $0x68] ss:$16 sps:$4 sm:$0xff]   ;;  %v1246_v48 = vld [vmem:[%s1638_s0 + $0x84] ss:$16 sps:$4 sm:$0xff]   ;;  %v1248_v49 = vld [vmem:[%s1638_s0 + $0x8c] ss:$16 sps:$4 sm:$0xff]  }
  0x13   :  { %v1250_v50 = vld [vmem:[%s1638_s0 + $0x80] ss:$16 sps:$4 sm:$0xff]   ;;  %v1251_v51 = vld [vmem:[%s1638_s0 + $0x88] ss:$16 sps:$4 sm:$0xff]   ;;  %v1252_v52 = vld [vmem:[%s1638_s0 + $0xa4] ss:$16 sps:$4 sm:$0xff]  }
  0x14   :  { %1035 = vmatpush3.bf16.msra.mxu0 %v1208_v18  ;;  %v1254_v53 = vld [vmem:[%s1638_s0 + $0xac] ss:$16 sps:$4 sm:$0xff]   ;;  %v1256_v54 = vld [vmem:[%s1638_s0 + $0xa0] ss:$16 sps:$4 sm:$0xff]   ;;  %v1257_v55 = vld [vmem:[%s1638_s0 + $0xa8] ss:$16 sps:$4 sm:$0xff]  }
  0x15   :  { %1117 = vmatpush3.bf16.msra.mxu1 %v1209_v19  ;;  %1036 = vmatprep.subr.bf16.mxu0 %v1210_v20  ;;  %v1258_v56 = vld [vmem:[%s1638_s0 + $0xc4] ss:$16 sps:$4 sm:$0xff]   ;;  %v1260_v57 = vld [vmem:[%s1638_s0 + $0xcc] ss:$16 sps:$4 sm:$0xff]   ;;  %v1262_v58 = vld [vmem:[%s1638_s0 + $0xc0] ss:$16 sps:$4 sm:$0xff]  }
  0x16   :  { %1118 = vmatprep.subr.bf16.mxu1 %v1211_v21  ;;  %v1263_v59 = vld [vmem:[%s1638_s0 + $0xc8] ss:$16 sps:$4 sm:$0xff]   ;;  %v1264_v60 = vld [vmem:[%s1638_s0 + $0xe4] ss:$16 sps:$4 sm:$0xff]   ;;  %v1266_v61 = vld [vmem:[%s1638_s0 + $0xec] ss:$16 sps:$4 sm:$0xff]  }
  0x17   :  { %v1268_v62 = vld [vmem:[%s1638_s0 + $0xe0] ss:$16 sps:$4 sm:$0xff]   ;;  %v1269_v63 = vld [vmem:[%s1638_s0 + $0xe8] ss:$16 sps:$4 sm:$0xff]   ;;  %v1270_v0 = vld [vmem:[%s1638_s0 + $0x104] ss:$16 sps:$4 sm:$0xff]  }
  0x18   :  { %1037 = vmatpush3.bf16.msra.mxu0 %v1212_v22  ;;  %v1272_v1 = vld [vmem:[%s1638_s0 + $0x10c] ss:$16 sps:$4 sm:$0xff]   ;;  %v1274_v2 = vld [vmem:[%s1638_s0 + $0x100] ss:$16 sps:$4 sm:$0xff]   ;;  %v1275_v3 = vld [vmem:[%s1638_s0 + $0x108] ss:$16 sps:$4 sm:$0xff]  }
  0x19   :  { %1119 = vmatpush3.bf16.msra.mxu1 %v1213_v23  ;;  %1038 = vmatprep.subr.bf16.mxu0 %v1214_v24  ;;  %v1276_v4 = vld [vmem:[%s1638_s0 + $0x124] ss:$16 sps:$4 sm:$0xff]   ;;  %v1278_v5 = vld [vmem:[%s1638_s0 + $0x12c] ss:$16 sps:$4 sm:$0xff]   ;;  %v1280_v8 = vld [vmem:[%s1638_s0 + $0x120] ss:$16 sps:$4 sm:$0xff]  }
  0x1a   :  { %1120 = vmatprep.subr.bf16.mxu1 %v1215_v25  ;;  %v1281_v9 = vld [vmem:[%s1638_s0 + $0x128] ss:$16 sps:$4 sm:$0xff]   ;;  %v1531_v16 = vld [vmem:[%s1639_s2] ss:$0 sm:$0xff] }
  0x1c   :  { %1039 = vmatpush3.bf16.msra.mxu0 %v1216_v26 }
  0x1d   :  { %1121 = vmatpush3.bf16.msra.mxu1 %v1217_v27  ;;  %1040 = vmatprep.subr.bf16.mxu0 %v1218_v28 }
  0x1e   :  { %1122 = vmatprep.subr.bf16.mxu1 %v1219_v29 }
  0x20   :  { %1041 = vmatpush3.bf16.msra.mxu0 %v1220_v30 }
  0x21   :  { %1123 = vmatpush3.bf16.msra.mxu1 %v1221_v31 }
  0x23   :  { %567 = vmatmul.mubr.bf16.vlgmr.msra.gmra.mrb[0].mxu0 %v1222_v32 }
  0x24   :  { %687 = vmatmul.mubr.bf16.vlgmr.msra.gmra.mrb[0].mxu1 %v1225_v34  ;;  %574 = vmatprep.mubr.bf16.mxu0 %v1228_v36 }
  0x25   :  { %694 = vmatprep.mubr.bf16.mxu1 %v1230_v37 }
  0x2b   :  { %575 = vmatmul.mubr.bf16.gmra.mrb[4].mxu0 %v1232_v38 }
  0x2c   :  { %695 = vmatmul.mubr.bf16.gmra.mrb[4].mxu1 %v1233_v39  ;;  %582 = vmatprep.mubr.bf16.mxu0 %v1234_v40 }
  0x2d   :  { %702 = vmatprep.mubr.bf16.mxu1 %v1236_v41 }
  0x33   :  { %583 = vmatmul.mubr.bf16.gmra.mrb[8].mxu0 %v1238_v42 }
  0x34   :  { %703 = vmatmul.mubr.bf16.gmra.mrb[8].mxu1 %v1239_v43  ;;  %590 = vmatprep.mubr.bf16.mxu0 %v1240_v44 }
  0x35   :  { %710 = vmatprep.mubr.bf16.mxu1 %v1242_v45 }
  0x3b   :  { %591 = vmatmul.mubr.bf16.gmra.mrb[12].mxu0 %v1244_v46 }
  0x3c   :  { %711 = vmatmul.mubr.bf16.gmra.mrb[12].mxu1 %v1245_v47  ;;  %598 = vmatprep.mubr.bf16.mxu0 %v1246_v48 }
  0x3d   :  { %718 = vmatprep.mubr.bf16.mxu1 %v1248_v49 }
  0x43   :  { %599 = vmatmul.mubr.bf16.gmra.mrb[16].mxu0 %v1250_v50 }
  0x44   :  { %719 = vmatmul.mubr.bf16.gmra.mrb[16].mxu1 %v1251_v51  ;;  %606 = vmatprep.mubr.bf16.mxu0 %v1252_v52 }
  0x45   :  { %726 = vmatprep.mubr.bf16.mxu1 %v1254_v53 }
  0x4b   :  { %607 = vmatmul.mubr.bf16.gmra.mrb[20].mxu0 %v1256_v54 }
  0x4c   :  { %727 = vmatmul.mubr.bf16.gmra.mrb[20].mxu1 %v1257_v55  ;;  %614 = vmatprep.mubr.bf16.mxu0 %v1258_v56 }
  0x4d   :  { %734 = vmatprep.mubr.bf16.mxu1 %v1260_v57 }
  0x53   :  { %615 = vmatmul.mubr.bf16.gmra.mrb[24].mxu0 %v1262_v58 }
  0x54   :  { %735 = vmatmul.mubr.bf16.gmra.mrb[24].mxu1 %v1263_v59  ;;  %622 = vmatprep.mubr.bf16.mxu0 %v1264_v60 }
  0x55   :  { %742 = vmatprep.mubr.bf16.mxu1 %v1266_v61 }
  0x5b   :  { %623 = vmatmul.mubr.bf16.gmra.mrb[28].mxu0 %v1268_v62 }
  0x5c   :  { %743 = vmatmul.mubr.bf16.gmra.mrb[28].mxu1 %v1269_v63  ;;  %630 = vmatprep.mubr.bf16.mxu0 %v1270_v0 }
  0x5d   :  { %750 = vmatprep.mubr.bf16.mxu1 %v1272_v1 }
  0x63   :  { %631 = vmatmul.mubr.bf16.gmra.mrb[32].mxu0 %v1274_v2 }
  0x64   :  { %751 = vmatmul.mubr.bf16.gmra.mrb[32].mxu1 %v1275_v3  ;;  %638 = vmatprep.mubr.bf16.mxu0 %v1276_v4 }
  0x65   :  { %758 = vmatprep.mubr.bf16.mxu1 %v1278_v5 }
  0x6b   :  { %639 = vmatmul.mubr.bf16.gmra.mrb[36].mxu0 %v1280_v8 }
  0x6c   :  { %759 = vmatmul.mubr.bf16.gmra.mrb[36].mxu1 %v1281_v9  ;;  %646 = vmatprep.mubr.bf16.mxu0 %v949_v10 }
  0x6d   :  { %766 = vmatprep.mubr.bf16.mxu1 %v951_v11 }
  0x73   :  { %647 = vmatmul.mubr.bf16.gmra.mrb[40].mxu0 %v948_v12 }
  0x74   :  { %767 = vmatmul.mubr.bf16.gmra.mrb[40].mxu1 %v950_v13 }
  0xf6   :  { %v1042_v14 = vpop.f32.mrb[0].mxu0 }
  0xf7   :  { %v1124_v15 = vpop.f32.mrb[0].mxu1  ;;  %v1043_v17 = vpop.f32.mrb[1].mxu0 }
  0xf8   :  { %v1044_v18 = vadd.f32 %v1043_v17, %v1042_v14  ;;  %v1125_v19 = vpop.f32.mrb[1].mxu1  ;;  %v1045_v20 = vpop.f32.mrb[2].mxu0 }
  0xf9   :  { %v1126_v21 = vadd.f32 %v1125_v19, %v1124_v15  ;;  %v1127_v22 = vpop.f32.mrb[2].mxu1  ;;  %v1046_v23 = vpop.f32.mrb[3].mxu0 }
  0xfa   :  { %v569_v24 = vadd.f32 %v1044_v18, %v1531_v16  ;;  %v1047_v25 = vadd.f32 %v1046_v23, %v1045_v20  ;;  %v1128_v26 = vpop.f32.mrb[3].mxu1 }
  0xfb   :  { %v1129_v27 = vadd.f32 %v1128_v26, %v1127_v22 }
  0xfc   :  { %v689_v28 = vadd.f32 %v1126_v21, %v569_v24  ;;  %v572_v29 = vadd.f32 %v1047_v25, %v1531_v16 }
  0xfe   :  { %v774_v30 = vmax.f32 %v689_v28, 0.0  ;;  %v692_v31 = vadd.f32 %v1129_v27, %v572_v29  ;;  %v1048_v32 = vpop.f32.mrb[4].mxu0 }
  0xff   :  { %v1130_v33 = vpop.f32.mrb[4].mxu1  ;;  %v1049_v34 = vpop.f32.mrb[5].mxu0 }
 0x100   :  { %v1005_v35 = vpack.c.bf16 %v774_v30, %v774_v30  ;;  %v775_v36 = vmax.f32 %v692_v31, 0.0  ;;  %v1050_v37 = vadd.f32 %v1049_v34, %v1048_v32  ;;  %v1131_v38 = vpop.f32.mrb[5].mxu1  ;;  %v1051_v39 = vpop.f32.mrb[6].mxu0 }
 0x101   :  { %v1132_v40 = vadd.f32 %v1131_v38, %v1130_v33  ;;  %v1133_v41 = vpop.f32.mrb[6].mxu1  ;;  %v1052_v42 = vpop.f32.mrb[7].mxu0 }
 0x102   :  { %881 = vst.msk [vmem:[%s1640_s3] sm:$0xf] %vm880_vm0, %v1005_v35  ;;  %v1006_v43 = vpack.c.bf16 %v775_v36, %v775_v36  ;;  %v577_v44 = vadd.f32 %v1050_v37, %v1531_v16  ;;  %v1053_v45 = vadd.f32 %v1052_v42, %v1051_v39  ;;  %v1134_v46 = vpop.f32.mrb[7].mxu1 }
 0x103   :  { %v1135_v47 = vadd.f32 %v1134_v46, %v1133_v41 }
 0x104   :  { %882 = vst.msk [vmem:[%s1640_s3 + $0x4] sm:$0xf] %vm880_vm0, %v1006_v43  ;;  %v697_v48 = vadd.f32 %v1132_v40, %v577_v44  ;;  %v580_v49 = vadd.f32 %v1053_v45, %v1531_v16 }
 0x106   :  { %v776_v50 = vmax.f32 %v697_v48, 0.0  ;;  %v700_v51 = vadd.f32 %v1135_v47, %v580_v49  ;;  %v1054_v52 = vpop.f32.mrb[8].mxu0 }
 0x107   :  { %v1136_v53 = vpop.f32.mrb[8].mxu1  ;;  %v1055_v54 = vpop.f32.mrb[9].mxu0 }
 0x108   :  { %v1007_v55 = vpack.c.bf16 %v776_v50, %v776_v50  ;;  %v777_v56 = vmax.f32 %v700_v51, 0.0  ;;  %v1056_v57 = vadd.f32 %v1055_v54, %v1054_v52  ;;  %v1137_v58 = vpop.f32.mrb[9].mxu1  ;;  %v1057_v59 = vpop.f32.mrb[10].mxu0 }
 0x109   :  { %v1138_v60 = vadd.f32 %v1137_v58, %v1136_v53  ;;  %v1139_v61 = vpop.f32.mrb[10].mxu1  ;;  %v1058_v62 = vpop.f32.mrb[11].mxu0 }
 0x10a   :  { %883 = vst.msk [vmem:[%s1640_s3 + $0x8] sm:$0xf] %vm880_vm0, %v1007_v55  ;;  %v1008_v63 = vpack.c.bf16 %v777_v56, %v777_v56  ;;  %v585_v0 = vadd.f32 %v1056_v57, %v1531_v16  ;;  %v1059_v1 = vadd.f32 %v1058_v62, %v1057_v59  ;;  %v1140_v2 = vpop.f32.mrb[11].mxu1 }
 0x10b   :  { %v1141_v3 = vadd.f32 %v1140_v2, %v1139_v61 }
 0x10c   :  { %884 = vst.msk [vmem:[%s1640_s3 + $0xc] sm:$0xf] %vm880_vm0, %v1008_v63  ;;  %v705_v4 = vadd.f32 %v1138_v60, %v585_v0  ;;  %v588_v5 = vadd.f32 %v1059_v1, %v1531_v16 }
 0x10e   :  { %v778_v6 = vmax.f32 %v705_v4, 0.0  ;;  %v708_v7 = vadd.f32 %v1141_v3, %v588_v5  ;;  %v1060_v8 = vpop.f32.mrb[12].mxu0 }
 0x10f   :  { %v1142_v9 = vpop.f32.mrb[12].mxu1  ;;  %v1061_v10 = vpop.f32.mrb[13].mxu0 }
 0x110   :  { %v1009_v11 = vpack.c.bf16 %v778_v6, %v778_v6  ;;  %v779_v12 = vmax.f32 %v708_v7, 0.0  ;;  %v1062_v13 = vadd.f32 %v1061_v10, %v1060_v8  ;;  %v1143_v14 = vpop.f32.mrb[13].mxu1  ;;  %v1063_v15 = vpop.f32.mrb[14].mxu0 }
 0x111   :  { %v1144_v17 = vadd.f32 %v1143_v14, %v1142_v9  ;;  %v1145_v18 = vpop.f32.mrb[14].mxu1  ;;  %v1064_v19 = vpop.f32.mrb[15].mxu0 }
 0x112   :  { %885 = vst.msk [vmem:[%s1640_s3 + $0x10] sm:$0xf] %vm880_vm0, %v1009_v11  ;;  %v1010_v20 = vpack.c.bf16 %v779_v12, %v779_v12  ;;  %v593_v21 = vadd.f32 %v1062_v13, %v1531_v16  ;;  %v1065_v22 = vadd.f32 %v1064_v19, %v1063_v15  ;;  %v1146_v23 = vpop.f32.mrb[15].mxu1 }
 0x113   :  { %v1147_v24 = vadd.f32 %v1146_v23, %v1145_v18 }
 0x114   :  { %886 = vst.msk [vmem:[%s1640_s3 + $0x14] sm:$0xf] %vm880_vm0, %v1010_v20  ;;  %v713_v25 = vadd.f32 %v1144_v17, %v593_v21  ;;  %v596_v26 = vadd.f32 %v1065_v22, %v1531_v16 }
 0x116   :  { %v780_v27 = vmax.f32 %v713_v25, 0.0  ;;  %v716_v28 = vadd.f32 %v1147_v24, %v596_v26  ;;  %v1066_v29 = vpop.f32.mrb[16].mxu0 }
 0x117   :  { %v1148_v30 = vpop.f32.mrb[16].mxu1  ;;  %v1067_v31 = vpop.f32.mrb[17].mxu0 }
 0x118   :  { %v1011_v32 = vpack.c.bf16 %v780_v27, %v780_v27  ;;  %v781_v33 = vmax.f32 %v716_v28, 0.0  ;;  %v1068_v34 = vadd.f32 %v1067_v31, %v1066_v29  ;;  %v1149_v35 = vpop.f32.mrb[17].mxu1  ;;  %v1069_v36 = vpop.f32.mrb[18].mxu0 }
 0x119   :  { %v1150_v37 = vadd.f32 %v1149_v35, %v1148_v30  ;;  %v1151_v38 = vpop.f32.mrb[18].mxu1  ;;  %v1070_v39 = vpop.f32.mrb[19].mxu0 }
 0x11a   :  { %887 = vst.msk [vmem:[%s1640_s3 + $0x18] sm:$0xf] %vm880_vm0, %v1011_v32  ;;  %v1012_v40 = vpack.c.bf16 %v781_v33, %v781_v33  ;;  %v601_v41 = vadd.f32 %v1068_v34, %v1531_v16  ;;  %v1071_v42 = vadd.f32 %v1070_v39, %v1069_v36  ;;  %v1152_v43 = vpop.f32.mrb[19].mxu1 }
 0x11b   :  { %v1153_v44 = vadd.f32 %v1152_v43, %v1151_v38 }
 0x11c   :  { %888 = vst.msk [vmem:[%s1640_s3 + $0x1c] sm:$0xf] %vm880_vm0, %v1012_v40  ;;  %v721_v45 = vadd.f32 %v1150_v37, %v601_v41  ;;  %v604_v46 = vadd.f32 %v1071_v42, %v1531_v16 }
 0x11e   :  { %v782_v47 = vmax.f32 %v721_v45, 0.0  ;;  %v724_v48 = vadd.f32 %v1153_v44, %v604_v46  ;;  %v1072_v49 = vpop.f32.mrb[20].mxu0 }
 0x11f   :  { %v1154_v50 = vpop.f32.mrb[20].mxu1  ;;  %v1073_v51 = vpop.f32.mrb[21].mxu0 }
 0x120   :  { %v1013_v52 = vpack.c.bf16 %v782_v47, %v782_v47  ;;  %v783_v53 = vmax.f32 %v724_v48, 0.0  ;;  %v1074_v54 = vadd.f32 %v1073_v51, %v1072_v49  ;;  %v1155_v55 = vpop.f32.mrb[21].mxu1  ;;  %v1075_v56 = vpop.f32.mrb[22].mxu0 }
 0x121   :  { %v1156_v57 = vadd.f32 %v1155_v55, %v1154_v50  ;;  %v1157_v58 = vpop.f32.mrb[22].mxu1  ;;  %v1076_v59 = vpop.f32.mrb[23].mxu0 }
 0x122   :  { %889 = vst.msk [vmem:[%s1640_s3 + $0x20] sm:$0xf] %vm880_vm0, %v1013_v52  ;;  %v1014_v60 = vpack.c.bf16 %v783_v53, %v783_v53  ;;  %v609_v61 = vadd.f32 %v1074_v54, %v1531_v16  ;;  %v1077_v62 = vadd.f32 %v1076_v59, %v1075_v56  ;;  %v1158_v63 = vpop.f32.mrb[23].mxu1 }
 0x123   :  { %v1159_v0 = vadd.f32 %v1158_v63, %v1157_v58 }
 0x124   :  { %890 = vst.msk [vmem:[%s1640_s3 + $0x24] sm:$0xf] %vm880_vm0, %v1014_v60  ;;  %v729_v1 = vadd.f32 %v1156_v57, %v609_v61  ;;  %v612_v2 = vadd.f32 %v1077_v62, %v1531_v16 }
 0x126   :  { %v784_v3 = vmax.f32 %v729_v1, 0.0  ;;  %v732_v4 = vadd.f32 %v1159_v0, %v612_v2  ;;  %v1078_v5 = vpop.f32.mrb[24].mxu0 }
 0x127   :  { %v1160_v6 = vpop.f32.mrb[24].mxu1  ;;  %v1079_v7 = vpop.f32.mrb[25].mxu0 }
 0x128   :  { %v1015_v8 = vpack.c.bf16 %v784_v3, %v784_v3  ;;  %v785_v9 = vmax.f32 %v732_v4, 0.0  ;;  %v1080_v10 = vadd.f32 %v1079_v7, %v1078_v5  ;;  %v1161_v11 = vpop.f32.mrb[25].mxu1  ;;  %v1081_v12 = vpop.f32.mrb[26].mxu0 }
 0x129   :  { %v1162_v13 = vadd.f32 %v1161_v11, %v1160_v6  ;;  %v1163_v14 = vpop.f32.mrb[26].mxu1  ;;  %v1082_v15 = vpop.f32.mrb[27].mxu0 }
 0x12a   :  { %891 = vst.msk [vmem:[%s1640_s3 + $0x28] sm:$0xf] %vm880_vm0, %v1015_v8  ;;  %v1016_v17 = vpack.c.bf16 %v785_v9, %v785_v9  ;;  %v617_v18 = vadd.f32 %v1080_v10, %v1531_v16  ;;  %v1083_v19 = vadd.f32 %v1082_v15, %v1081_v12  ;;  %v1164_v20 = vpop.f32.mrb[27].mxu1 }
 0x12b   :  { %v1165_v21 = vadd.f32 %v1164_v20, %v1163_v14 }
 0x12c   :  { %892 = vst.msk [vmem:[%s1640_s3 + $0x2c] sm:$0xf] %vm880_vm0, %v1016_v17  ;;  %v737_v22 = vadd.f32 %v1162_v13, %v617_v18  ;;  %v620_v23 = vadd.f32 %v1083_v19, %v1531_v16 }
 0x12e   :  { %v786_v24 = vmax.f32 %v737_v22, 0.0  ;;  %v740_v25 = vadd.f32 %v1165_v21, %v620_v23  ;;  %v1084_v26 = vpop.f32.mrb[28].mxu0 }
 0x12f   :  { %v1166_v27 = vpop.f32.mrb[28].mxu1  ;;  %v1085_v28 = vpop.f32.mrb[29].mxu0 }
 0x130   :  { %v1017_v29 = vpack.c.bf16 %v786_v24, %v786_v24  ;;  %v787_v30 = vmax.f32 %v740_v25, 0.0  ;;  %v1086_v31 = vadd.f32 %v1085_v28, %v1084_v26  ;;  %v1167_v32 = vpop.f32.mrb[29].mxu1  ;;  %v1087_v33 = vpop.f32.mrb[30].mxu0 }
 0x131   :  { %v1168_v34 = vadd.f32 %v1167_v32, %v1166_v27  ;;  %v1169_v35 = vpop.f32.mrb[30].mxu1  ;;  %v1088_v36 = vpop.f32.mrb[31].mxu0 }
 0x132   :  { %893 = vst.msk [vmem:[%s1640_s3 + $0x30] sm:$0xf] %vm880_vm0, %v1017_v29  ;;  %v1018_v37 = vpack.c.bf16 %v787_v30, %v787_v30  ;;  %v625_v38 = vadd.f32 %v1086_v31, %v1531_v16  ;;  %v1089_v39 = vadd.f32 %v1088_v36, %v1087_v33  ;;  %v1170_v40 = vpop.f32.mrb[31].mxu1 }
 0x133   :  { %v1171_v41 = vadd.f32 %v1170_v40, %v1169_v35 }
 0x134   :  { %894 = vst.msk [vmem:[%s1640_s3 + $0x34] sm:$0xf] %vm880_vm0, %v1018_v37  ;;  %v745_v42 = vadd.f32 %v1168_v34, %v625_v38  ;;  %v628_v43 = vadd.f32 %v1089_v39, %v1531_v16 }
 0x136   :  { %v788_v44 = vmax.f32 %v745_v42, 0.0  ;;  %v748_v45 = vadd.f32 %v1171_v41, %v628_v43  ;;  %v1090_v46 = vpop.f32.mrb[32].mxu0 }
 0x137   :  { %v1172_v47 = vpop.f32.mrb[32].mxu1  ;;  %v1091_v48 = vpop.f32.mrb[33].mxu0 }
 0x138   :  { %v1019_v49 = vpack.c.bf16 %v788_v44, %v788_v44  ;;  %v789_v50 = vmax.f32 %v748_v45, 0.0  ;;  %v1092_v51 = vadd.f32 %v1091_v48, %v1090_v46  ;;  %v1173_v52 = vpop.f32.mrb[33].mxu1  ;;  %v1093_v53 = vpop.f32.mrb[34].mxu0 }
 0x139   :  { %v1174_v54 = vadd.f32 %v1173_v52, %v1172_v47  ;;  %v1175_v55 = vpop.f32.mrb[34].mxu1  ;;  %v1094_v56 = vpop.f32.mrb[35].mxu0 }
 0x13a   :  { %895 = vst.msk [vmem:[%s1640_s3 + $0x38] sm:$0xf] %vm880_vm0, %v1019_v49  ;;  %v1020_v57 = vpack.c.bf16 %v789_v50, %v789_v50  ;;  %v633_v58 = vadd.f32 %v1092_v51, %v1531_v16  ;;  %v1095_v59 = vadd.f32 %v1094_v56, %v1093_v53  ;;  %v1176_v60 = vpop.f32.mrb[35].mxu1 }
 0x13b   :  { %v1177_v61 = vadd.f32 %v1176_v60, %v1175_v55 }
 0x13c   :  { %896 = vst.msk [vmem:[%s1640_s3 + $0x3c] sm:$0xf] %vm880_vm0, %v1020_v57  ;;  %v753_v62 = vadd.f32 %v1174_v54, %v633_v58  ;;  %v636_v63 = vadd.f32 %v1095_v59, %v1531_v16 }
 0x13e   :  { %v790_v0 = vmax.f32 %v753_v62, 0.0  ;;  %v756_v1 = vadd.f32 %v1177_v61, %v636_v63  ;;  %v1096_v2 = vpop.f32.mrb[36].mxu0 }
 0x13f   :  { %v1178_v3 = vpop.f32.mrb[36].mxu1  ;;  %v1097_v4 = vpop.f32.mrb[37].mxu0 }
 0x140   :  { %v1021_v5 = vpack.c.bf16 %v790_v0, %v790_v0  ;;  %v791_v6 = vmax.f32 %v756_v1, 0.0  ;;  %v1098_v7 = vadd.f32 %v1097_v4, %v1096_v2  ;;  %v1179_v8 = vpop.f32.mrb[37].mxu1  ;;  %v1099_v9 = vpop.f32.mrb[38].mxu0 }
 0x141   :  { %v1180_v10 = vadd.f32 %v1179_v8, %v1178_v3  ;;  %v1181_v11 = vpop.f32.mrb[38].mxu1  ;;  %v1100_v12 = vpop.f32.mrb[39].mxu0 }
 0x142   :  { %897 = vst.msk [vmem:[%s1640_s3 + $0x40] sm:$0xf] %vm880_vm0, %v1021_v5  ;;  %v1022_v13 = vpack.c.bf16 %v791_v6, %v791_v6  ;;  %v641_v14 = vadd.f32 %v1098_v7, %v1531_v16  ;;  %v1101_v15 = vadd.f32 %v1100_v12, %v1099_v9  ;;  %v1182_v17 = vpop.f32.mrb[39].mxu1 }
 0x143   :  { %v1183_v18 = vadd.f32 %v1182_v17, %v1181_v11 }
 0x144   :  { %898 = vst.msk [vmem:[%s1640_s3 + $0x44] sm:$0xf] %vm880_vm0, %v1022_v13  ;;  %v761_v19 = vadd.f32 %v1180_v10, %v641_v14  ;;  %v644_v20 = vadd.f32 %v1101_v15, %v1531_v16 }
 0x146   :  { %v792_v21 = vmax.f32 %v761_v19, 0.0  ;;  %v764_v22 = vadd.f32 %v1183_v18, %v644_v20  ;;  %v1102_v23 = vpop.f32.mrb[40].mxu0 }
 0x147   :  { %v1184_v24 = vpop.f32.mrb[40].mxu1  ;;  %v1103_v25 = vpop.f32.mrb[41].mxu0 }
 0x148   :  { %v1023_v26 = vpack.c.bf16 %v792_v21, %v792_v21  ;;  %v793_v27 = vmax.f32 %v764_v22, 0.0  ;;  %v1104_v28 = vadd.f32 %v1103_v25, %v1102_v23  ;;  %v1185_v29 = vpop.f32.mrb[41].mxu1  ;;  %v1105_v30 = vpop.f32.mrb[42].mxu0 }
 0x149   :  { %v1186_v31 = vadd.f32 %v1185_v29, %v1184_v24  ;;  %v1187_v32 = vpop.f32.mrb[42].mxu1  ;;  %v1106_v33 = vpop.f32.mrb[43].mxu0 }
 0x14a   :  { %899 = vst.msk [vmem:[%s1640_s3 + $0x48] sm:$0xf] %vm880_vm0, %v1023_v26  ;;  %v1024_v34 = vpack.c.bf16 %v793_v27, %v793_v27  ;;  %v649_v35 = vadd.f32 %v1104_v28, %v1531_v16  ;;  %v1188_v36 = vpop.f32.mrb[43].mxu1 }
 0x14c   :  { %900 = vst.msk [vmem:[%s1640_s3 + $0x4c] sm:$0xf] %vm880_vm0, %v1024_v34  ;;  %v769_v37 = vadd.f32 %v1186_v31, %v649_v35 }
 0x14e   :  { %v794_v38 = vmax.f32 %v769_v37, 0.0 }
 0x150   :  { %v1025_v39 = vpack.c.bf16 %v794_v38, %v794_v38 }
 0x152   :  { %902 = vst.msk [vmem:[%s1640_s3 + $0x50] sm:$0x1] %vm901_vm1, %v1025_v39 }

// kernel: cnn_base_forward.6
= control target key start
LH: loop header
LB: loop body
LE: loop exit
PB: predicated region body
PF: predicated region fallthrough
CT: control target
= control target key end

     0   :  { %v1248_v34 = vmov 0.0   ;;  %vm1249_vm0 = vmmov 0   ;;  %vm516_vm1 = vcmask 523264   ;;  %vm868_vm2 = vcmask 257024   ;;  %s1599_s1 = inlined_call_operand.vmem [shape: bf16[576,32], index: 1, kind: input, shape index: {}]   ;;  %s1600_s0 = inlined_call_operand.vmem [shape: bf16[98,576], index: 0, kind: input, shape index: {}]   ;;  %s1601_s2 = inlined_call_operand.vmem [shape: f32[1,32], index: 2, kind: input, shape index: {}]   ;;  %s1602_s3 = inlined_call_operand.vmem [shape: bf16[98,32], index: 3, kind: output, shape index: {}]  }
   0x1   :  { %v1165_v0 = vld [vmem:[%s1599_s1 + $0x40] sm:$0xff]   ;;  %v1169_v4 = vld [vmem:[%s1599_s1 + $0x48] sm:$0xff]   ;;  %v1173_v8 = vld [vmem:[%s1599_s1 + $0x50] sm:$0xff]   ;;  %vm881_vm3 = vcmask 253952  }
   0x2   :  { %v1166_v1 = vld [vmem:[%s1599_s1 + $0xc0] sm:$0xff]   ;;  %992 = vmatprep.subr.bf16.mxu0 %v1165_v0  ;;  %v1170_v5 = vld [vmem:[%s1599_s1 + $0xc8] sm:$0xff]   ;;  %v1174_v9 = vld [vmem:[%s1599_s1 + $0xd0] sm:$0xff]  }
   0x3   :  { %v1167_v2 = vld [vmem:[%s1599_s1] sm:$0xff]   ;;  %1050 = vmatprep.subr.bf16.mxu1 %v1166_v1  ;;  %v1171_v6 = vld [vmem:[%s1599_s1 + $0x8] sm:$0xff]   ;;  %v1175_v10 = vld [vmem:[%s1599_s1 + $0x10] sm:$0xff]  }
   0x4   :  { %v1168_v3 = vld [vmem:[%s1599_s1 + $0x80] sm:$0xff]   ;;  %993 = vmatpush3.bf16.msra.mxu0 %v1167_v2  ;;  %v1172_v7 = vld [vmem:[%s1599_s1 + $0x88] sm:$0xff]   ;;  %v1176_v11 = vld [vmem:[%s1599_s1 + $0x90] sm:$0xff]  }
   0x5   :  { %1051 = vmatpush3.bf16.msra.mxu1 %v1168_v3  ;;  %994 = vmatprep.subr.bf16.mxu0 %v1169_v4  ;;  %v1177_v12 = vld [vmem:[%s1599_s1 + $0x58] sm:$0xff]   ;;  %v1181_v16 = vld [vmem:[%s1599_s1 + $0x60] sm:$0xff]   ;;  %v1185_v20 = vld [vmem:[%s1599_s1 + $0x68] sm:$0xff]  }
   0x6   :  { %1052 = vmatprep.subr.bf16.mxu1 %v1170_v5  ;;  %v1178_v13 = vld [vmem:[%s1599_s1 + $0xd8] sm:$0xff]   ;;  %v1182_v17 = vld [vmem:[%s1599_s1 + $0xe0] sm:$0xff]   ;;  %v1186_v21 = vld [vmem:[%s1599_s1 + $0xe8] sm:$0xff]  }
   0x7   :  { %v1179_v14 = vld [vmem:[%s1599_s1 + $0x18] sm:$0xff]   ;;  %v1183_v18 = vld [vmem:[%s1599_s1 + $0x20] sm:$0xff]   ;;  %v1187_v22 = vld [vmem:[%s1599_s1 + $0x28] sm:$0xff]  }
   0x8   :  { %995 = vmatpush3.bf16.msra.mxu0 %v1171_v6  ;;  %v1180_v15 = vld [vmem:[%s1599_s1 + $0x98] sm:$0xff]   ;;  %v1184_v19 = vld [vmem:[%s1599_s1 + $0xa0] sm:$0xff]   ;;  %v1188_v23 = vld [vmem:[%s1599_s1 + $0xa8] sm:$0xff]  }
   0x9   :  { %1053 = vmatpush3.bf16.msra.mxu1 %v1172_v7  ;;  %996 = vmatprep.subr.bf16.mxu0 %v1173_v8  ;;  %v1189_v24 = vld [vmem:[%s1599_s1 + $0x70] sm:$0xff]   ;;  %v1193_v28 = vld [vmem:[%s1599_s1 + $0x78] sm:$0xff]   ;;  %v1202_v36 = vld [vmem:[%s1600_s0 + $0xc] ss:$20 sps:$4 sm:$0xff]  }
   0xa   :  { %1054 = vmatprep.subr.bf16.mxu1 %v1174_v9  ;;  %v1190_v25 = vld [vmem:[%s1599_s1 + $0xf0] sm:$0xff]   ;;  %v1194_v29 = vld [vmem:[%s1599_s1 + $0xf8] sm:$0xff]   ;;  %v1203_v37 = vld [vmem:[%s1599_s1 + $0x100] sm:$0xff]   ;;  %658 = vmatprep.mubr.bf16.mxu1 %v1202_v36 }
   0xb   :  { %v1191_v26 = vld [vmem:[%s1599_s1 + $0x30] sm:$0xff]   ;;  %v1195_v30 = vld [vmem:[%s1599_s1 + $0x38] sm:$0xff]   ;;  %v1204_v38 = vld [vmem:[%s1600_s0 + $0x2c] ss:$20 sps:$4 sm:$0xff]  }
   0xc   :  { %997 = vmatpush3.bf16.msra.mxu0 %v1175_v10  ;;  %v1192_v27 = vld [vmem:[%s1599_s1 + $0xb0] sm:$0xff]   ;;  %v1196_v31 = vld [vmem:[%s1599_s1 + $0xb8] sm:$0xff]   ;;  %v1214_v43 = vld [vmem:[%s1599_s1 + $0x108] sm:$0xff]  }
   0xd   :  { %1055 = vmatpush3.bf16.msra.mxu1 %v1176_v11  ;;  %998 = vmatprep.subr.bf16.mxu0 %v1177_v12  ;;  %v1197_v32 = vld [vmem:[%s1600_s0] ss:$20 sps:$4 sm:$0xff]   ;;  %v1199_v33 = vld [vmem:[%s1600_s0 + $0x4] ss:$20 sps:$4 sm:$0xff]   ;;  %v1200_v35 = vld [vmem:[%s1600_s0 + $0x8] ss:$20 sps:$4 sm:$0xff]  }
   0xe   :  { %1056 = vmatprep.subr.bf16.mxu1 %v1178_v13  ;;  %570 = vmatprep.mubr.bf16.mxu0 %v1199_v33  ;;  %v1206_v39 = vld [vmem:[%s1600_s0 + $0x34] ss:$20 sps:$4 sm:$0xff]   ;;  %v1209_v41 = vld [vmem:[%s1600_s0 + $0x30] ss:$20 sps:$4 sm:$0xff]   ;;  %v1216_v47 = vld [vmem:[%s1600_s0 + $0x58] ss:$20 sps:$4 sm:$0xff]  }
   0xf   :  { %v1208_v40 = vld [vmem:[%s1600_s0 + $0x28] ss:$20 sps:$4 sm:$0xff]   ;;  %v1223_v45 = vld [vmem:[%s1599_s1 + $0x110] sm:$0xff]   ;;  %v1219_v49 = vld [vmem:[%s1600_s0 + $0x84] ss:$20 sps:$4 sm:$0xff]  }
  0x10   :  { %999 = vmatpush3.bf16.msra.mxu0 %v1179_v14  ;;  %v1210_v42 = vld [vmem:[%s1600_s0 + $0x54] ss:$20 sps:$4 sm:$0xff]   ;;  %v1212_v44 = vld [vmem:[%s1600_s0 + $0x5c] ss:$20 sps:$4 sm:$0xff]   ;;  %v1221_v51 = vld [vmem:[%s1600_s0 + $0x78] ss:$20 sps:$4 sm:$0xff]  }
  0x11   :  { %1057 = vmatpush3.bf16.msra.mxu1 %v1180_v15  ;;  %1000 = vmatprep.subr.bf16.mxu0 %v1181_v16  ;;  %v1215_v46 = vld [vmem:[%s1600_s0 + $0x50] ss:$20 sps:$4 sm:$0xff]   ;;  %v1236_v50 = vld [vmem:[%s1599_s1 + $0x118] sm:$0xff]   ;;  %v1222_v52 = vld [vmem:[%s1600_s0 + $0x80] ss:$20 sps:$4 sm:$0xff]  }
  0x12   :  { %1058 = vmatprep.subr.bf16.mxu1 %v1182_v17  ;;  %v1217_v48 = vld [vmem:[%s1600_s0 + $0x7c] ss:$20 sps:$4 sm:$0xff]   ;;  %v1224_v53 = vld [vmem:[%s1600_s0 + $0xa4] ss:$20 sps:$4 sm:$0xff]   ;;  %v1226_v54 = vld [vmem:[%s1600_s0 + $0xac] ss:$20 sps:$4 sm:$0xff]  }
  0x13   :  { %v1228_v55 = vld [vmem:[%s1600_s0 + $0xa0] ss:$20 sps:$4 sm:$0xff]   ;;  %v1229_v56 = vld [vmem:[%s1600_s0 + $0xa8] ss:$20 sps:$4 sm:$0xff]   ;;  %v1235_v62 = vld [vmem:[%s1600_s0 + $0xd0] ss:$20 sps:$4 sm:$0xff]  }
  0x14   :  { %1001 = vmatpush3.bf16.msra.mxu0 %v1183_v18  ;;  %v1230_v57 = vld [vmem:[%s1600_s0 + $0xcc] ss:$20 sps:$4 sm:$0xff]   ;;  %v1232_v58 = vld [vmem:[%s1600_s0 + $0xd4] ss:$20 sps:$4 sm:$0xff]   ;;  %v52_v60 = vld [vmem:[%s1600_s0 + $0xf8] sm:$0x11] }
  0x15   :  { %1059 = vmatpush3.bf16.msra.mxu1 %v1184_v19  ;;  %1002 = vmatprep.subr.bf16.mxu0 %v1185_v20  ;;  %v51_v59 = vld [vmem:[%s1600_s0 + $0xf0] sm:$0x11]  ;;  %v1234_v61 = vld [vmem:[%s1600_s0 + $0xc8] ss:$20 sps:$4 sm:$0xff]   ;;  %v921_v0 = vcombine.high %v52_v60, %v52_v60  ;;  %v920_v2 = vcombine.low %v52_v60, %v52_v60  ;;  %v1243_v5 = vld [vmem:[%s1600_s0 + $0x38] ss:$20 sps:$4 sm:$0xff]  }
  0x16   :  { %1060 = vmatprep.subr.bf16.mxu1 %v1186_v21  ;;  %v919_v63 = vcombine.high %v51_v59, %v51_v59  ;;  %v918_v1 = vcombine.low %v51_v59, %v51_v59  ;;  %v1241_v3 = vld [vmem:[%s1600_s0 + $0x10] ss:$20 sps:$4 sm:$0xff]   ;;  %v1244_v6 = vld [vmem:[%s1600_s0 + $0xd8] ss:$20 sps:$4 sm:$0xff]   ;;  %v1245_v7 = vld [vmem:[%s1600_s0 + $0x60] ss:$20 sps:$4 sm:$0xff]  }
  0x17   :  { %v1242_v4 = vld [vmem:[%s1600_s0 + $0xb0] ss:$20 sps:$4 sm:$0xff]   ;;  %v1246_v8 = vld [vmem:[%s1600_s0 + $0x100] ss:$0 sps:$4 sm:$0x11]  }
  0x18   :  { %1003 = vmatpush3.bf16.msra.mxu0 %v1187_v22  ;;  %v1247_v9 = vld [vmem:[%s1600_s0 + $0x88] ss:$20 sps:$4 sm:$0xff]   ;;  %v1509_v11 = vld [vmem:[%s1601_s2] ss:$0 sm:$0xff] }
  0x19   :  { %1061 = vmatpush3.bf16.msra.mxu1 %v1188_v23  ;;  %1004 = vmatprep.subr.bf16.mxu0 %v1189_v24 }
  0x1a   :  { %1062 = vmatprep.subr.bf16.mxu1 %v1190_v25 }
  0x1c   :  { %1005 = vmatpush3.bf16.msra.mxu0 %v1191_v26 }
  0x1d   :  { %1063 = vmatpush3.bf16.msra.mxu1 %v1192_v27  ;;  %1006 = vmatprep.subr.bf16.mxu0 %v1193_v28 }
  0x1e   :  { %1064 = vmatprep.subr.bf16.mxu1 %v1194_v29 }
  0x20   :  { %1007 = vmatpush3.bf16.msra.mxu0 %v1195_v30 }
  0x21   :  { %1065 = vmatpush3.bf16.msra.mxu1 %v1196_v31  ;;  %1119 = vmatprep.subr.bf16.mxu0 %v1248_v34 }
  0x22   :  { %1155 = vmatprep.subr.bf16.mxu1 %v1248_v34 }
  0x23   :  { %571 = vmatmul.mubr.bf16.vlgmr.msra.gmra.mrb[0].mxu0 %v1197_v32 }
  0x24   :  { %659 = vmatmul.mubr.bf16.vlgmr.msra.gmra.mrb[0].mxu1 %v1200_v35  ;;  %1120 = vmatpush3.bf16.msra.mxu0 %v1203_v37 }
  0x25   :  { %578 = vmatprep.mubr.bf16.mxu0 %v1204_v38  ;;  %1159 = vmatpush3.bf16.msra.mxu1 %v1203_v37 }
  0x26   :  { %666 = vmatprep.mubr.bf16.mxu1 %v1206_v39  ;;  %1121 = vmatprep.subr.bf16.mxu0 %v1248_v34 }
  0x27   :  { %1156 = vmatprep.subr.bf16.mxu1 %v1248_v34 }
  0x28   :  { %1122 = vmatpush3.bf16.msra.mxu0 %v1214_v43 }
  0x29   :  { %1160 = vmatpush3.bf16.msra.mxu1 %v1214_v43  ;;  %1123 = vmatprep.subr.bf16.mxu0 %v1248_v34 }
  0x2a   :  { %1157 = vmatprep.subr.bf16.mxu1 %v1248_v34 }
  0x2b   :  { %579 = vmatmul.mubr.bf16.gmra.mrb[4].mxu0 %v1208_v40 }
  0x2c   :  { %667 = vmatmul.mubr.bf16.gmra.mrb[4].mxu1 %v1209_v41  ;;  %586 = vmatprep.mubr.bf16.mxu0 %v1210_v42 }
  0x2d   :  { %674 = vmatprep.mubr.bf16.mxu1 %v1212_v44  ;;  %1124 = vmatpush3.bf16.msra.mxu0 %v1223_v45 }
  0x2e   :  { %1161 = vmatpush3.bf16.msra.mxu1 %v1223_v45  ;;  %1125 = vmatprep.subr.bf16.mxu0 %v1248_v34 }
  0x2f   :  { %1158 = vmatprep.subr.bf16.mxu1 %v1248_v34 }
  0x31   :  { %1126 = vmatpush3.bf16.msra.mxu0 %v1236_v50 }
  0x32   :  { %1162 = vmatpush3.bf16.msra.mxu1 %v1236_v50 }
  0x33   :  { %587 = vmatmul.mubr.bf16.gmra.mrb[8].mxu0 %v1215_v46 }
  0x34   :  { %675 = vmatmul.mubr.bf16.gmra.mrb[8].mxu1 %v1216_v47  ;;  %594 = vmatprep.mubr.bf16.mxu0 %v1217_v48 }
  0x35   :  { %682 = vmatprep.mubr.bf16.mxu1 %v1219_v49 }
  0x3b   :  { %595 = vmatmul.mubr.bf16.gmra.mrb[12].mxu0 %v1221_v51 }
  0x3c   :  { %683 = vmatmul.mubr.bf16.gmra.mrb[12].mxu1 %v1222_v52  ;;  %602 = vmatprep.mubr.bf16.mxu0 %v1224_v53 }
  0x3d   :  { %690 = vmatprep.mubr.bf16.mxu1 %v1226_v54 }
  0x43   :  { %603 = vmatmul.mubr.bf16.gmra.mrb[16].mxu0 %v1228_v55 }
  0x44   :  { %691 = vmatmul.mubr.bf16.gmra.mrb[16].mxu1 %v1229_v56  ;;  %610 = vmatprep.mubr.bf16.mxu0 %v1230_v57 }
  0x45   :  { %698 = vmatprep.mubr.bf16.mxu1 %v1232_v58 }
  0x4b   :  { %611 = vmatmul.mubr.bf16.gmra.mrb[20].mxu0 %v1234_v61 }
  0x4c   :  { %699 = vmatmul.mubr.bf16.gmra.mrb[20].mxu1 %v1235_v62  ;;  %618 = vmatprep.mubr.bf16.mxu0 %v919_v63 }
  0x4d   :  { %706 = vmatprep.mubr.bf16.mxu1 %v921_v0 }
  0x53   :  { %619 = vmatmul.mubr.bf16.gmra.mrb[24].mxu0 %v918_v1 }
  0x54   :  { %707 = vmatmul.mubr.bf16.gmra.mrb[24].mxu1 %v920_v2  ;;  %1127 = vmatprep.mubr.msk.bf16.mxu0 %vm1249_vm0, %v1248_v34 }
  0x55   :  { %1143 = vmatprep.mubr.msk.bf16.mxu1 %vm1249_vm0, %v1248_v34 }
  0x5b   :  { %1128 = vmatmul.mubr.msk.bf16.vlgmr.msra.gmra.mrb[28].mxu0 %vm516_vm1, %v1241_v3 }
  0x5c   :  { %1144 = vmatmul.mubr.msk.bf16.vlgmr.msra.gmra.mrb[28].mxu1 %vm516_vm1, %v1242_v4  ;;  %1131 = vmatprep.mubr.msk.bf16.mxu0 %vm1249_vm0, %v1248_v34 }
  0x5d   :  { %1147 = vmatprep.mubr.msk.bf16.mxu1 %vm1249_vm0, %v1248_v34 }
  0x63   :  { %1132 = vmatmul.mubr.msk.bf16.gmra.mrb[32].mxu0 %vm516_vm1, %v1243_v5 }
  0x64   :  { %1148 = vmatmul.mubr.msk.bf16.gmra.mrb[32].mxu1 %vm516_vm1, %v1244_v6  ;;  %1135 = vmatprep.mubr.msk.bf16.mxu0 %vm1249_vm0, %v1248_v34 }
  0x65   :  { %1151 = vmatprep.mubr.msk.bf16.mxu1 %vm1249_vm0, %v1248_v34 }
  0x6b   :  { %1136 = vmatmul.mubr.msk.bf16.gmra.mrb[36].mxu0 %vm516_vm1, %v1245_v7 }
  0x6c   :  { %1152 = vmatmul.mubr.msk.bf16.gmra.mrb[36].mxu1 %vm516_vm1, %v1246_v8  ;;  %1139 = vmatprep.mubr.msk.bf16.mxu0 %vm1249_vm0, %v1248_v34 }
  0x73   :  { %1140 = vmatmul.mubr.msk.bf16.gmra.mrb[40].mxu0 %vm516_vm1, %v1247_v9 }
  0xf6   :  { %v1008_v10 = vpop.f32.mrb[0].mxu0 }
  0xf7   :  { %v1009_v12 = vpop.f32.mrb[1].mxu0  ;;  %v1066_v13 = vpop.f32.mrb[0].mxu1 }
  0xf8   :  { %v1010_v14 = vadd.f32 %v1009_v12, %v1008_v10  ;;  %v1011_v15 = vpop.f32.mrb[2].mxu0  ;;  %v1067_v16 = vpop.f32.mrb[1].mxu1 }
  0xf9   :  { %v1012_v17 = vpop.f32.mrb[3].mxu0  ;;  %v1068_v18 = vadd.f32 %v1067_v16, %v1066_v13  ;;  %v1069_v19 = vpop.f32.mrb[2].mxu1 }
  0xfa   :  { %v573_v20 = vadd.f32 %v1010_v14, %v1509_v11  ;;  %v1013_v21 = vadd.f32 %v1012_v17, %v1011_v15  ;;  %v1070_v22 = vpop.f32.mrb[3].mxu1 }
  0xfb   :  { %v1071_v23 = vadd.f32 %v1070_v22, %v1069_v19 }
  0xfc   :  { %v576_v24 = vadd.f32 %v1013_v21, %v1509_v11  ;;  %v1513_v25 = vadd.f32 %v1068_v18, %v573_v20 }
  0xfe   :  { %v1014_v26 = vpop.f32.mrb[4].mxu0  ;;  %v1515_v27 = vadd.f32 %v1071_v23, %v576_v24 }
  0xff   :  { %v1015_v28 = vpop.f32.mrb[5].mxu0  ;;  %v1072_v29 = vpop.f32.mrb[4].mxu1 }
 0x100   :  { %v1016_v30 = vadd.f32 %v1015_v28, %v1014_v26  ;;  %v1017_v31 = vpop.f32.mrb[6].mxu0  ;;  %v1073_v32 = vpop.f32.mrb[5].mxu1 }
 0x101   :  { %v1018_v33 = vpop.f32.mrb[7].mxu0  ;;  %v1074_v34 = vadd.f32 %v1073_v32, %v1072_v29  ;;  %v1075_v35 = vpop.f32.mrb[6].mxu1 }
 0x102   :  { %v581_v36 = vadd.f32 %v1016_v30, %v1509_v11  ;;  %v1019_v37 = vadd.f32 %v1018_v33, %v1017_v31  ;;  %v1076_v38 = vpop.f32.mrb[7].mxu1 }
 0x103   :  { %v1077_v39 = vadd.f32 %v1076_v38, %v1075_v35 }
 0x104   :  { %v584_v40 = vadd.f32 %v1019_v37, %v1509_v11  ;;  %v1519_v41 = vadd.f32 %v1074_v34, %v581_v36 }
 0x106   :  { %v1020_v42 = vpop.f32.mrb[8].mxu0  ;;  %v1521_v43 = vadd.f32 %v1077_v39, %v584_v40 }
 0x107   :  { %v1021_v44 = vpop.f32.mrb[9].mxu0  ;;  %v1078_v45 = vpop.f32.mrb[8].mxu1 }
 0x108   :  { %v1022_v46 = vadd.f32 %v1021_v44, %v1020_v42  ;;  %v1023_v47 = vpop.f32.mrb[10].mxu0  ;;  %v1079_v48 = vpop.f32.mrb[9].mxu1 }
 0x109   :  { %v1024_v49 = vpop.f32.mrb[11].mxu0  ;;  %v1080_v50 = vadd.f32 %v1079_v48, %v1078_v45  ;;  %v1081_v51 = vpop.f32.mrb[10].mxu1 }
 0x10a   :  { %v589_v52 = vadd.f32 %v1022_v46, %v1509_v11  ;;  %v1025_v53 = vadd.f32 %v1024_v49, %v1023_v47  ;;  %v1082_v54 = vpop.f32.mrb[11].mxu1 }
 0x10b   :  { %v1083_v55 = vadd.f32 %v1082_v54, %v1081_v51 }
 0x10c   :  { %v592_v56 = vadd.f32 %v1025_v53, %v1509_v11  ;;  %v1525_v57 = vadd.f32 %v1080_v50, %v589_v52 }
 0x10e   :  { %v1026_v58 = vpop.f32.mrb[12].mxu0  ;;  %v1527_v59 = vadd.f32 %v1083_v55, %v592_v56 }
 0x10f   :  { %v1027_v60 = vpop.f32.mrb[13].mxu0  ;;  %v1084_v61 = vpop.f32.mrb[12].mxu1 }
 0x110   :  { %v1028_v62 = vadd.f32 %v1027_v60, %v1026_v58  ;;  %v1029_v63 = vpop.f32.mrb[14].mxu0  ;;  %v1085_v0 = vpop.f32.mrb[13].mxu1 }
 0x111   :  { %v1030_v1 = vpop.f32.mrb[15].mxu0  ;;  %v1086_v2 = vadd.f32 %v1085_v0, %v1084_v61  ;;  %v1087_v3 = vpop.f32.mrb[14].mxu1 }
 0x112   :  { %v597_v4 = vadd.f32 %v1028_v62, %v1509_v11  ;;  %v1031_v5 = vadd.f32 %v1030_v1, %v1029_v63  ;;  %v1088_v6 = vpop.f32.mrb[15].mxu1 }
 0x113   :  { %v1089_v7 = vadd.f32 %v1088_v6, %v1087_v3 }
 0x114   :  { %v600_v8 = vadd.f32 %v1031_v5, %v1509_v11  ;;  %v1531_v9 = vadd.f32 %v1086_v2, %v597_v4 }
 0x116   :  { %v1032_v10 = vpop.f32.mrb[16].mxu0  ;;  %v1533_v12 = vadd.f32 %v1089_v7, %v600_v8 }
 0x117   :  { %v1033_v13 = vpop.f32.mrb[17].mxu0  ;;  %v1090_v14 = vpop.f32.mrb[16].mxu1 }
 0x118   :  { %v1034_v15 = vadd.f32 %v1033_v13, %v1032_v10  ;;  %v1035_v16 = vpop.f32.mrb[18].mxu0  ;;  %v1091_v17 = vpop.f32.mrb[17].mxu1 }
 0x119   :  { %v1036_v18 = vpop.f32.mrb[19].mxu0  ;;  %v1092_v19 = vadd.f32 %v1091_v17, %v1090_v14  ;;  %v1093_v20 = vpop.f32.mrb[18].mxu1 }
 0x11a   :  { %v605_v21 = vadd.f32 %v1034_v15, %v1509_v11  ;;  %v1037_v22 = vadd.f32 %v1036_v18, %v1035_v16  ;;  %v1094_v23 = vpop.f32.mrb[19].mxu1 }
 0x11b   :  { %v1095_v24 = vadd.f32 %v1094_v23, %v1093_v20 }
 0x11c   :  { %v608_v26 = vadd.f32 %v1037_v22, %v1509_v11  ;;  %v693_v28 = vadd.f32 %v1092_v19, %v605_v21 }
 0x11e   :  { %v1038_v29 = vpop.f32.mrb[20].mxu0  ;;  %v696_v30 = vadd.f32 %v1095_v24, %v608_v26 }
 0x11f   :  { %v1039_v31 = vpop.f32.mrb[21].mxu0  ;;  %v1096_v32 = vpop.f32.mrb[20].mxu1 }
 0x120   :  { %v1040_v33 = vadd.f32 %v1039_v31, %v1038_v29  ;;  %v1041_v34 = vpop.f32.mrb[22].mxu0  ;;  %v1097_v35 = vpop.f32.mrb[21].mxu1 }
 0x121   :  { %v1042_v36 = vpop.f32.mrb[23].mxu0  ;;  %v1098_v37 = vadd.f32 %v1097_v35, %v1096_v32  ;;  %v1099_v38 = vpop.f32.mrb[22].mxu1 }
 0x122   :  { %v613_v39 = vadd.f32 %v1040_v33, %v1509_v11  ;;  %v1043_v40 = vadd.f32 %v1042_v36, %v1041_v34  ;;  %v1100_v42 = vpop.f32.mrb[23].mxu1 }
 0x123   :  { %v1101_v44 = vadd.f32 %v1100_v42, %v1099_v38 }
 0x124   :  { %v616_v45 = vadd.f32 %v1043_v40, %v1509_v11  ;;  %v701_v46 = vadd.f32 %v1098_v37, %v613_v39 }
 0x126   :  { %v1044_v47 = vpop.f32.mrb[24].mxu0  ;;  %v704_v48 = vadd.f32 %v1101_v44, %v616_v45 }
 0x127   :  { %v1045_v49 = vpop.f32.mrb[25].mxu0  ;;  %v1102_v50 = vpop.f32.mrb[24].mxu1 }
 0x128   :  { %v1046_v51 = vadd.f32 %v1045_v49, %v1044_v47  ;;  %v1047_v52 = vpop.f32.mrb[26].mxu0  ;;  %v1103_v53 = vpop.f32.mrb[25].mxu1 }
 0x129   :  { %v1048_v54 = vpop.f32.mrb[27].mxu0  ;;  %v1104_v55 = vadd.f32 %v1103_v53, %v1102_v50  ;;  %v1105_v56 = vpop.f32.mrb[26].mxu1 }
 0x12a   :  { %v621_v58 = vadd.f32 %v1046_v51, %v1509_v11  ;;  %v1106_v60 = vpop.f32.mrb[27].mxu1 }
 0x12c   :  { %v709_v61 = vadd.f32 %v1104_v55, %v621_v58 }
 0x12e   :  { %v748_v62 = vpop.f32.mrb[28].mxu0 }
 0x12f   :  { %v749_v63 = vadd.f32 %v748_v62, %v1513_v25  ;;  %v780_v0 = vpop.f32.mrb[28].mxu1  ;;  %v1129_v1 = vpop.f32.mrb[29].mxu0 }
 0x130   :  { %v781_v2 = vadd.f32 %v780_v0, %v693_v28  ;;  %v1145_v3 = vpop.f32.mrb[29].mxu1  ;;  %v751_v4 = vpop.f32.mrb[30].mxu0 }
 0x131   :  { %v802_v5 = vmax.f32 %v749_v63, 0.0  ;;  %v752_v6 = vadd.f32 %v751_v4, %v1515_v27  ;;  %v783_v7 = vpop.f32.mrb[30].mxu1  ;;  %v1130_v8 = vpop.f32.mrb[31].mxu0 }
 0x132   :  { %v810_v10 = vmax.f32 %v781_v2, 0.0  ;;  %v784_v13 = vadd.f32 %v783_v7, %v696_v30  ;;  %v1146_v14 = vpop.f32.mrb[31].mxu1 }
 0x133   :  { %v979_v11 = vpack.c.bf16 %v802_v5, %v802_v5  ;;  %v803_v15 = vmax.f32 %v752_v6, 0.0 }
 0x134   :  { %v987_v16 = vpack.c.bf16 %v810_v10, %v810_v10  ;;  %v811_v17 = vmax.f32 %v784_v13, 0.0 }
 0x135   :  { %869 = vst.msk [vmem:[%s1602_s3] sm:$0xf] %vm868_vm2, %v979_v11  ;;  %v980_v25 = vpack.c.bf16 %v803_v15, %v803_v15 }
 0x136   :  { %877 = vst.msk [vmem:[%s1602_s3 + $0x20] sm:$0xf] %vm868_vm2, %v987_v16  ;;  %v988_v27 = vpack.c.bf16 %v811_v17, %v811_v17  ;;  %v756_v18 = vpop.f32.mrb[32].mxu0 }
 0x137   :  { %870 = vst.msk [vmem:[%s1602_s3 + $0x4] sm:$0xf] %vm868_vm2, %v980_v25  ;;  %v757_v19 = vadd.f32 %v756_v18, %v1519_v41  ;;  %v788_v20 = vpop.f32.mrb[32].mxu1  ;;  %v1133_v21 = vpop.f32.mrb[33].mxu0 }
 0x138   :  { %878 = vst.msk [vmem:[%s1602_s3 + $0x24] sm:$0xf] %vm868_vm2, %v988_v27  ;;  %v789_v22 = vadd.f32 %v788_v20, %v701_v46  ;;  %v1149_v23 = vpop.f32.mrb[33].mxu1  ;;  %v759_v24 = vpop.f32.mrb[34].mxu0 }
 0x139   :  { %v804_v26 = vmax.f32 %v757_v19, 0.0  ;;  %v760_v28 = vadd.f32 %v759_v24, %v1521_v43  ;;  %v791_v29 = vpop.f32.mrb[34].mxu1  ;;  %v1134_v30 = vpop.f32.mrb[35].mxu0 }
 0x13a   :  { %v812_v31 = vmax.f32 %v789_v22, 0.0  ;;  %v792_v32 = vadd.f32 %v791_v29, %v704_v48  ;;  %v1150_v33 = vpop.f32.mrb[35].mxu1 }
 0x13b   :  { %v981_v34 = vpack.c.bf16 %v804_v26, %v804_v26  ;;  %v805_v41 = vmax.f32 %v760_v28, 0.0 }
 0x13c   :  { %v989_v35 = vpack.c.bf16 %v812_v31, %v812_v31  ;;  %v813_v36 = vmax.f32 %v792_v32, 0.0 }
 0x13d   :  { %871 = vst.msk [vmem:[%s1602_s3 + $0x8] sm:$0xf] %vm868_vm2, %v981_v34  ;;  %v982_v37 = vpack.c.bf16 %v805_v41, %v805_v41 }
 0x13e   :  { %879 = vst.msk [vmem:[%s1602_s3 + $0x28] sm:$0xf] %vm868_vm2, %v989_v35  ;;  %v990_v43 = vpack.c.bf16 %v813_v36, %v813_v36  ;;  %v764_v38 = vpop.f32.mrb[36].mxu0 }
 0x13f   :  { %872 = vst.msk [vmem:[%s1602_s3 + $0xc] sm:$0xf] %vm868_vm2, %v982_v37  ;;  %v765_v39 = vadd.f32 %v764_v38, %v1525_v57  ;;  %v796_v40 = vpop.f32.mrb[36].mxu1  ;;  %v1137_v42 = vpop.f32.mrb[37].mxu0 }
 0x140   :  { %880 = vst.msk [vmem:[%s1602_s3 + $0x2c] sm:$0xf] %vm868_vm2, %v990_v43  ;;  %v797_v44 = vadd.f32 %v796_v40, %v709_v61  ;;  %v767_v45 = vpop.f32.mrb[38].mxu0  ;;  %v1153_v46 = vpop.f32.mrb[37].mxu1 }
 0x141   :  { %v806_v47 = vmax.f32 %v765_v39, 0.0  ;;  %v768_v48 = vadd.f32 %v767_v45, %v1527_v59  ;;  %v1138_v49 = vpop.f32.mrb[39].mxu0  ;;  %v799_v50 = vpop.f32.mrb[38].mxu1 }
 0x142   :  { %v814_v51 = vmax.f32 %v797_v44, 0.0  ;;  %v1154_v52 = vpop.f32.mrb[39].mxu1 }
 0x143   :  { %v983_v53 = vpack.c.bf16 %v806_v47, %v806_v47  ;;  %v807_v57 = vmax.f32 %v768_v48, 0.0 }
 0x144   :  { %v991_v54 = vpack.c.bf16 %v814_v51, %v814_v51 }
 0x145   :  { %873 = vst.msk [vmem:[%s1602_s3 + $0x10] sm:$0xf] %vm868_vm2, %v983_v53  ;;  %v984_v55 = vpack.c.bf16 %v807_v57, %v807_v57 }
 0x146   :  { %882 = vst.msk [vmem:[%s1602_s3 + $0x30] sm:$0x1] %vm881_vm3, %v991_v54  ;;  %v772_v56 = vpop.f32.mrb[40].mxu0 }
 0x147   :  { %874 = vst.msk [vmem:[%s1602_s3 + $0x14] sm:$0xf] %vm868_vm2, %v984_v55  ;;  %v773_v59 = vadd.f32 %v772_v56, %v1531_v9  ;;  %v1141_v58 = vpop.f32.mrb[41].mxu0 }
 0x148   :  { %v775_v60 = vpop.f32.mrb[42].mxu0 }
 0x149   :  { %v808_v61 = vmax.f32 %v773_v59, 0.0  ;;  %v776_v62 = vadd.f32 %v775_v60, %v1533_v12  ;;  %v1142_v63 = vpop.f32.mrb[43].mxu0 }
 0x14b   :  { %v985_v0 = vpack.c.bf16 %v808_v61, %v808_v61  ;;  %v809_v1 = vmax.f32 %v776_v62, 0.0 }
 0x14d   :  { %875 = vst.msk [vmem:[%s1602_s3 + $0x18] sm:$0xf] %vm868_vm2, %v985_v0  ;;  %v986_v2 = vpack.c.bf16 %v809_v1, %v809_v1 }
 0x14f   :  { %876 = vst.msk [vmem:[%s1602_s3 + $0x1c] sm:$0xf] %vm868_vm2, %v986_v2 }

// kernel: cnn_base_forward.7
= control target key start
LH: loop header
LB: loop body
LE: loop exit
PB: predicated region body
PF: predicated region fallthrough
CT: control target
= control target key end

     0   :  { %s2101_s0 = inlined_call_operand.vmem [shape: bf16[2,1568], index: 0, kind: input, shape index: {}]   ;;  %s2102_s1 = inlined_call_operand.vmem [shape: bf16[1568,32], index: 1, kind: input, shape index: {}]   ;;  %s2103_s2 = inlined_call_operand.vmem [shape: f32[1,32], index: 2, kind: input, shape index: {}]   ;;  %s2104_s3 = inlined_call_operand.vmem [shape: f32[32,1], index: 3, kind: input, shape index: {}]   ;;  %s2105_s4 = inlined_call_operand.<no memory space> [shape: f32[1,1], index: 4, kind: input, shape index: {}]   ;;  %s2106_s5 = inlined_call_operand.hbm [shape: f32[2,32], index: 5, kind: output, shape index: {0}]   ;;  %s2107_s6 = inlined_call_operand.vmem [shape: f32[2,1], index: 6, kind: output, shape index: {1}]  }
   0x1   :  { %v12_v0 = vstv %s2105_s4 }
   0x2   :  { %13 = vst [vmem:[#allocation2] sm:$0x1] %v12_v0 }
   0x3   :  { %v1584_v1 = vld [vmem:[%s2102_s1 + $0x40] sm:$0xff]   ;;  %v1588_v5 = vld [vmem:[%s2102_s1 + $0x48] sm:$0xff]   ;;  %v1592_v9 = vld [vmem:[%s2102_s1 + $0x50] sm:$0xff]   ;;  %v237_v30 = vlaneseq  ;;  %v1708_v36 = vmov 1966171168  }
   0x4   :  { %v1585_v2 = vld [vmem:[%s2102_s1] sm:$0xff]   ;;  %1414 = vmatprep.subr.bf16.mxu0 %v1584_v1  ;;  %v1589_v6 = vld [vmem:[%s2102_s1 + $0x8] sm:$0xff]   ;;  %v1593_v10 = vld [vmem:[%s2102_s1 + $0x10] sm:$0xff]   ;;  %v235_v37 = vunpack.c.l.s4 %v1708_v36 }
   0x5   :  { %v1586_v3 = vld [vmem:[%s2102_s1 + $0xc0] sm:$0xff]   ;;  %1415 = vmatpush3.bf16.msra.mxu0 %v1585_v2  ;;  %v1590_v7 = vld [vmem:[%s2102_s1 + $0xc8] sm:$0xff]   ;;  %v1594_v11 = vld [vmem:[%s2102_s1 + $0xd0] sm:$0xff]   ;;  %v238_v34 = vshrl.u32 %v237_v30, 7 }
   0x6   :  { %v1587_v4 = vld [vmem:[%s2102_s1 + $0x80] sm:$0xff]   ;;  %1436 = vmatprep.subr.bf16.mxu1 %v1586_v3  ;;  %1416 = vmatprep.subr.bf16.mxu0 %v1588_v5  ;;  %v1591_v8 = vld [vmem:[%s2102_s1 + $0x88] sm:$0xff]   ;;  %v1595_v12 = vld [vmem:[%s2102_s1 + $0x90] sm:$0xff]   ;;  %v236_v40 = vunpack.c.0.s8 %v235_v37 }
   0x7   :  { %1437 = vmatpush3.bf16.msra.mxu1 %v1587_v4  ;;  %v1596_v13 = vld [vmem:[%s2102_s1 + $0x58] sm:$0xff]   ;;  %v1600_v17 = vld [vmem:[%s2102_s1 + $0x60] sm:$0xff]   ;;  %v1604_v21 = vld [vmem:[%s2102_s1 + $0x68] sm:$0xff]  }
   0x8   :  { %1438 = vmatprep.subr.bf16.mxu1 %v1590_v7  ;;  %v1597_v14 = vld [vmem:[%s2102_s1 + $0x18] sm:$0xff]   ;;  %v1601_v18 = vld [vmem:[%s2102_s1 + $0x20] sm:$0xff]   ;;  %v1605_v22 = vld [vmem:[%s2102_s1 + $0x28] sm:$0xff]   ;;  %v1856_v42 = vsub.s32 %v236_v40, %v238_v34 }
   0x9   :  { %1417 = vmatpush3.bf16.msra.mxu0 %v1589_v6  ;;  %v1598_v15 = vld [vmem:[%s2102_s1 + $0xd8] sm:$0xff]   ;;  %v1602_v19 = vld [vmem:[%s2102_s1 + $0xe0] sm:$0xff]   ;;  %v1606_v23 = vld [vmem:[%s2102_s1 + $0xe8] sm:$0xff]  }
   0xa   :  { %1418 = vmatprep.subr.bf16.mxu0 %v1592_v9  ;;  %v1599_v16 = vld [vmem:[%s2102_s1 + $0x98] sm:$0xff]   ;;  %v1603_v20 = vld [vmem:[%s2102_s1 + $0xa0] sm:$0xff]   ;;  %v1607_v24 = vld [vmem:[%s2102_s1 + $0xa8] sm:$0xff]  }
   0xb   :  { %1439 = vmatpush3.bf16.msra.mxu1 %v1591_v8  ;;  %v1608_v25 = vld [vmem:[%s2102_s1 + $0x70] sm:$0xff]   ;;  %v1612_v29 = vld [vmem:[%s2102_s1 + $0x78] sm:$0xff]   ;;  %v1617_v35 = vld [vmem:[%s2102_s1 + $0x140] sm:$0xff]  }
   0xc   :  { %1440 = vmatprep.subr.bf16.mxu1 %v1594_v11  ;;  %v1609_v26 = vld [vmem:[%s2102_s1 + $0x30] sm:$0xff]   ;;  %v1613_v31 = vld [vmem:[%s2102_s1 + $0x38] sm:$0xff]   ;;  %v26_v38 = vld [vmem:[%s2101_s0] sm:$0xff] }
   0xd   :  { %1419 = vmatpush3.bf16.msra.mxu0 %v1593_v10  ;;  %v1610_v27 = vld [vmem:[%s2102_s1 + $0xf0] sm:$0xff]   ;;  %v1614_v32 = vld [vmem:[%s2102_s1 + $0xf8] sm:$0xff]   ;;  %v233_v39 = vcombine.high %v26_v38, %v26_v38  ;;  %v1619_v41 = vld [vmem:[%s2102_s1 + $0x1c0] sm:$0xff]   ;;  %v240_v43 = vrot.slane %v26_v38, %v1856_v42 }
   0xe   :  { %1420 = vmatprep.subr.bf16.mxu0 %v1596_v13  ;;  %v1611_v28 = vld [vmem:[%s2102_s1 + $0xb0] sm:$0xff]   ;;  %v1615_v33 = vld [vmem:[%s2102_s1 + $0xb8] sm:$0xff]   ;;  %v1618_v49 = vld [vmem:[%s2102_s1 + $0x100] sm:$0xff]  }
   0xf   :  { %1441 = vmatpush3.bf16.msra.mxu1 %v1595_v12  ;;  %v1860_v44 = vrot.slane %v233_v39, %v1856_v42  ;;  %v248_v45 = vcombine.high %v240_v43, %v240_v43  ;;  %v256_v46 = vrot.slane %v240_v43, %v1856_v42  ;;  %v1621_v52 = vld [vmem:[%s2102_s1 + $0x148] sm:$0xff]   ;;  %v1620_v54 = vld [vmem:[%s2102_s1 + $0x180] sm:$0xff]   ;;  %v1625_v58 = vld [vmem:[%s2102_s1 + $0x150] sm:$0xff]  }
  0x10   :  { %1442 = vmatprep.subr.bf16.mxu1 %v1598_v15  ;;  %v1623_v55 = vld [vmem:[%s2102_s1 + $0x1c8] sm:$0xff]   ;;  %v1627_v60 = vld [vmem:[%s2102_s1 + $0x1d0] sm:$0xff]   ;;  %v1629_v62 = vld [vmem:[%s2102_s1 + $0x158] sm:$0xff]  }
  0x11   :  { %1421 = vmatpush3.bf16.msra.mxu0 %v1597_v14  ;;  %v249_v47 = vcombine.high %v1860_v44, %v1860_v44  ;;  %v270_v48 = vrot.slane %v248_v45, %v1856_v42  ;;  %v278_v51 = vcombine.high %v256_v46, %v256_v46  ;;  %v1622_v57 = vld [vmem:[%s2102_s1 + $0x108] sm:$0xff]   ;;  %v1626_v61 = vld [vmem:[%s2102_s1 + $0x110] sm:$0xff]   ;;  %v1631_v0 = vld [vmem:[%s2102_s1 + $0x1d8] sm:$0xff]  }
  0x12   :  { %1422 = vmatprep.subr.bf16.mxu0 %v1600_v17  ;;  %v1624_v59 = vld [vmem:[%s2102_s1 + $0x188] sm:$0xff]   ;;  %v1628_v63 = vld [vmem:[%s2102_s1 + $0x190] sm:$0xff]   ;;  %v1630_v1 = vld [vmem:[%s2102_s1 + $0x118] sm:$0xff]  }
  0x13   :  { %1443 = vmatpush3.bf16.msra.mxu1 %v1599_v16  ;;  %v277_v50 = vrot.slane %v249_v47, %v1856_v42  ;;  %957 = vmatprep.mubr.bf16.mxu0 %v270_v48  ;;  %v280_v53 = vcombine.high %v270_v48, %v270_v48  ;;  %v1633_v2 = vld [vmem:[%s2102_s1 + $0x160] sm:$0xff]   ;;  %v1632_v3 = vld [vmem:[%s2102_s1 + $0x198] sm:$0xff]   ;;  %v1637_v6 = vld [vmem:[%s2102_s1 + $0x168] sm:$0xff]  }
  0x14   :  { %1444 = vmatprep.subr.bf16.mxu1 %v1602_v19  ;;  %v1635_v4 = vld [vmem:[%s2102_s1 + $0x1e0] sm:$0xff]   ;;  %v1639_v8 = vld [vmem:[%s2102_s1 + $0x1e8] sm:$0xff]   ;;  %v1641_v10 = vld [vmem:[%s2102_s1 + $0x170] sm:$0xff]  }
  0x15   :  { %1423 = vmatpush3.bf16.msra.mxu0 %v1601_v18  ;;  %v281_v56 = vcombine.high %v277_v50, %v277_v50  ;;  %997 = vmatprep.mubr.bf16.mxu1 %v280_v53  ;;  %v1634_v5 = vld [vmem:[%s2102_s1 + $0x120] sm:$0xff]   ;;  %v1638_v9 = vld [vmem:[%s2102_s1 + $0x128] sm:$0xff]   ;;  %v1643_v12 = vld [vmem:[%s2102_s1 + $0x1f0] sm:$0xff]   ;;  %v263_v18 = vrot.slane %v1860_v44, %v1856_v42 }
  0x16   :  { %1424 = vmatprep.subr.bf16.mxu0 %v1604_v21  ;;  %v1636_v7 = vld [vmem:[%s2102_s1 + $0x1a0] sm:$0xff]   ;;  %v1640_v11 = vld [vmem:[%s2102_s1 + $0x1a8] sm:$0xff]   ;;  %v1642_v13 = vld [vmem:[%s2102_s1 + $0x130] sm:$0xff]  }
  0x17   :  { %1445 = vmatpush3.bf16.msra.mxu1 %v1603_v20  ;;  %v1645_v14 = vld [vmem:[%s2102_s1 + $0x178] sm:$0xff]   ;;  %v1644_v15 = vld [vmem:[%s2102_s1 + $0x1b0] sm:$0xff]   ;;  %v1649_v19 = vld [vmem:[%s2102_s1 + $0x240] sm:$0xff]  }
  0x18   :  { %1446 = vmatprep.subr.bf16.mxu1 %v1606_v23  ;;  %v1647_v16 = vld [vmem:[%s2102_s1 + $0x1f8] sm:$0xff]   ;;  %v1651_v21 = vld [vmem:[%s2102_s1 + $0x2c0] sm:$0xff]   ;;  %v279_v23 = vcombine.high %v263_v18, %v263_v18  ;;  %v1659_v30 = vld [vmem:[%s2102_s1 + $0x2d0] sm:$0xff]  }
  0x19   :  { %1425 = vmatpush3.bf16.msra.mxu0 %v1605_v22  ;;  %v1646_v17 = vld [vmem:[%s2102_s1 + $0x138] sm:$0xff]   ;;  %v1650_v22 = vld [vmem:[%s2102_s1 + $0x200] sm:$0xff]   ;;  %v1669_v40 = vld [vmem:[%s2102_s1 + $0x268] sm:$0xff]  }
  0x1a   :  { %1426 = vmatprep.subr.bf16.mxu0 %v1608_v25  ;;  %v1648_v20 = vld [vmem:[%s2102_s1 + $0x1b8] sm:$0xff]   ;;  %v1652_v25 = vld [vmem:[%s2102_s1 + $0x280] sm:$0xff]   ;;  %v1671_v43 = vld [vmem:[%s2102_s1 + $0x2e8] sm:$0xff]  }
  0x1b   :  { %1447 = vmatpush3.bf16.msra.mxu1 %v1607_v24  ;;  %v1653_v24 = vld [vmem:[%s2102_s1 + $0x248] sm:$0xff]   ;;  %v1663_v34 = vld [vmem:[%s2102_s1 + $0x2d8] sm:$0xff]   ;;  %v1665_v36 = vld [vmem:[%s2102_s1 + $0x260] sm:$0xff]  }
  0x1c   :  { %1448 = vmatprep.subr.bf16.mxu1 %v1610_v27  ;;  %v1654_v27 = vld [vmem:[%s2102_s1 + $0x208] sm:$0xff]   ;;  %v1664_v37 = vld [vmem:[%s2102_s1 + $0x298] sm:$0xff]   ;;  %v1667_v38 = vld [vmem:[%s2102_s1 + $0x2e0] sm:$0xff]  }
  0x1d   :  { %1427 = vmatpush3.bf16.msra.mxu0 %v1609_v26  ;;  %v1655_v26 = vld [vmem:[%s2102_s1 + $0x2c8] sm:$0xff]   ;;  %v1666_v39 = vld [vmem:[%s2102_s1 + $0x220] sm:$0xff]   ;;  %v1673_v45 = vld [vmem:[%s2102_s1 + $0x270] sm:$0xff]  }
  0x1e   :  { %1428 = vmatprep.subr.bf16.mxu0 %v1612_v29  ;;  %v1656_v29 = vld [vmem:[%s2102_s1 + $0x288] sm:$0xff]  }
  0x1f   :  { %1449 = vmatpush3.bf16.msra.mxu1 %v1611_v28  ;;  %v1657_v28 = vld [vmem:[%s2102_s1 + $0x250] sm:$0xff]   ;;  %v1670_v44 = vld [vmem:[%s2102_s1 + $0x228] sm:$0xff]  }
  0x20   :  { %1450 = vmatprep.subr.bf16.mxu1 %v1614_v32  ;;  %v1661_v32 = vld [vmem:[%s2102_s1 + $0x258] sm:$0xff]   ;;  %v1672_v47 = vld [vmem:[%s2102_s1 + $0x2a8] sm:$0xff]  }
  0x21   :  { %1429 = vmatpush3.bf16.msra.mxu0 %v1613_v31  ;;  %v1658_v31 = vld [vmem:[%s2102_s1 + $0x210] sm:$0xff]  }
  0x22   :  { %1458 = vmatprep.subr.bf16.mxu0 %v1617_v35  ;;  %v1662_v35 = vld [vmem:[%s2102_s1 + $0x218] sm:$0xff]  }
  0x23   :  { %1451 = vmatpush3.bf16.msra.mxu1 %v1615_v33  ;;  %v1660_v33 = vld [vmem:[%s2102_s1 + $0x290] sm:$0xff]  }
  0x24   :  { %1480 = vmatprep.subr.bf16.mxu1 %v1619_v41  ;;  %958 = vmatmul.mubr.bf16.vlgmr.msra.gmra.mrb[0].mxu0 %v256_v46  ;;  %v1668_v41 = vld [vmem:[%s2102_s1 + $0x2a0] sm:$0xff]   ;;  %v27_v46 = vld [vmem:[%s2101_s0 + $0x8] sm:$0x1f] }
  0x25   :  { %1459 = vmatpush3.bf16.msra.mxu0 %v1618_v49  ;;  %1037 = vmatprep.mubr.bf16.mxu0 %v277_v50  ;;  %v289_v48 = vrot.slane %v27_v46, %v1856_v42  ;;  %v1675_v49 = vld [vmem:[%s2102_s1 + $0x2f0] sm:$0xff]  }
  0x26   :  { %998 = vmatmul.mubr.bf16.vlgmr.msra.gmra.mrb[0].mxu1 %v278_v51  ;;  %1460 = vmatprep.subr.bf16.mxu0 %v1621_v52 }
  0x27   :  { %1481 = vmatpush3.bf16.msra.mxu1 %v1620_v54  ;;  %1077 = vmatprep.mubr.bf16.mxu1 %v281_v56 }
  0x28   :  { %1482 = vmatprep.subr.bf16.mxu1 %v1623_v55 }
  0x29   :  { %1461 = vmatpush3.bf16.msra.mxu0 %v1622_v57 }
  0x2a   :  { %1462 = vmatprep.subr.bf16.mxu0 %v1625_v58 }
  0x2b   :  { %1483 = vmatpush3.bf16.msra.mxu1 %v1624_v59 }
  0x2c   :  { %1484 = vmatprep.subr.bf16.mxu1 %v1627_v60 }
  0x2d   :  { %1463 = vmatpush3.bf16.msra.mxu0 %v1626_v61 }
  0x2e   :  { %1464 = vmatprep.subr.bf16.mxu0 %v1629_v62 }
  0x2f   :  { %1485 = vmatpush3.bf16.msra.mxu1 %v1628_v63 }
  0x30   :  { %1486 = vmatprep.subr.bf16.mxu1 %v1631_v0 }
  0x31   :  { %1465 = vmatpush3.bf16.msra.mxu0 %v1630_v1 }
  0x32   :  { %1466 = vmatprep.subr.bf16.mxu0 %v1633_v2 }
  0x33   :  { %1487 = vmatpush3.bf16.msra.mxu1 %v1632_v3 }
  0x34   :  { %1488 = vmatprep.subr.bf16.mxu1 %v1635_v4 }
  0x35   :  { %1467 = vmatpush3.bf16.msra.mxu0 %v1634_v5 }
  0x36   :  { %1468 = vmatprep.subr.bf16.mxu0 %v1637_v6 }
  0x37   :  { %1489 = vmatpush3.bf16.msra.mxu1 %v1636_v7 }
  0x38   :  { %1490 = vmatprep.subr.bf16.mxu1 %v1639_v8 }
  0x39   :  { %1469 = vmatpush3.bf16.msra.mxu0 %v1638_v9 }
  0x3a   :  { %1470 = vmatprep.subr.bf16.mxu0 %v1641_v10 }
  0x3b   :  { %1491 = vmatpush3.bf16.msra.mxu1 %v1640_v11 }
  0x3c   :  { %1492 = vmatprep.subr.bf16.mxu1 %v1643_v12 }
  0x3d   :  { %1471 = vmatpush3.bf16.msra.mxu0 %v1642_v13 }
  0x3e   :  { %1472 = vmatprep.subr.bf16.mxu0 %v1645_v14 }
  0x3f   :  { %1493 = vmatpush3.bf16.msra.mxu1 %v1644_v15 }
  0x40   :  { %1494 = vmatprep.subr.bf16.mxu1 %v1647_v16 }
  0x41   :  { %1473 = vmatpush3.bf16.msra.mxu0 %v1646_v17 }
  0x42   :  { %1502 = vmatprep.subr.bf16.mxu0 %v1649_v19 }
  0x43   :  { %1495 = vmatpush3.bf16.msra.mxu1 %v1648_v20 }
  0x44   :  { %1038 = vmatmul.mubr.bf16.vlgmr.msra.gmra.mrb[4].mxu0 %v263_v18  ;;  %1524 = vmatprep.subr.bf16.mxu1 %v1651_v21 }
  0x45   :  { %1503 = vmatpush3.bf16.msra.mxu0 %v1650_v22 }
  0x46   :  { %1078 = vmatmul.mubr.bf16.vlgmr.msra.gmra.mrb[4].mxu1 %v279_v23  ;;  %1504 = vmatprep.subr.bf16.mxu0 %v1653_v24 }
  0x47   :  { %1525 = vmatpush3.bf16.msra.mxu1 %v1652_v25 }
  0x48   :  { %1526 = vmatprep.subr.bf16.mxu1 %v1655_v26 }
  0x49   :  { %1505 = vmatpush3.bf16.msra.mxu0 %v1654_v27 }
  0x4a   :  { %1506 = vmatprep.subr.bf16.mxu0 %v1657_v28 }
  0x4b   :  { %1527 = vmatpush3.bf16.msra.mxu1 %v1656_v29 }
  0x4c   :  { %1528 = vmatprep.subr.bf16.mxu1 %v1659_v30 }
  0x4d   :  { %1507 = vmatpush3.bf16.msra.mxu0 %v1658_v31 }
  0x4e   :  { %1508 = vmatprep.subr.bf16.mxu0 %v1661_v32 }
  0x4f   :  { %1529 = vmatpush3.bf16.msra.mxu1 %v1660_v33 }
  0x50   :  { %1530 = vmatprep.subr.bf16.mxu1 %v1663_v34 }
  0x51   :  { %1509 = vmatpush3.bf16.msra.mxu0 %v1662_v35 }
  0x52   :  { %1510 = vmatprep.subr.bf16.mxu0 %v1665_v36 }
  0x53   :  { %1531 = vmatpush3.bf16.msra.mxu1 %v1664_v37 }
  0x54   :  { %1532 = vmatprep.subr.bf16.mxu1 %v1667_v38 }
  0x55   :  { %1511 = vmatpush3.bf16.msra.mxu0 %v1666_v39 }
  0x56   :  { %1512 = vmatprep.subr.bf16.mxu0 %v1669_v40 }
  0x57   :  { %1533 = vmatpush3.bf16.msra.mxu1 %v1668_v41 }
  0x58   :  { %1534 = vmatprep.subr.bf16.mxu1 %v1671_v43 }
  0x59   :  { %14 = vsyncpa [#allocation4], 0  ;;  %1513 = vmatpush3.bf16.msra.mxu0 %v1670_v44  ;;  %v1674_v50 = vld [vmem:[%s2102_s1 + $0x230] sm:$0xff]   ;;  %v297_v51 = vcombine.high %v289_v48, %v289_v48  ;;  %v1677_v52 = vld [vmem:[%s2102_s1 + $0x278] sm:$0xff]   ;;  %v304_v58 = vrot.slane %v289_v48, %v1856_v42  ;;  %v282_v60 = vcombine.high %v27_v46, %v27_v46  ;;  %v1709_v62 = vmov 0.0  }
  0x5a   :  { %1514 = vmatprep.subr.bf16.mxu0 %v1673_v45  ;;  %v1676_v53 = vld [vmem:[%s2102_s1 + $0x2b0] sm:$0xff]   ;;  %v1679_v55 = vld [vmem:[%s2102_s1 + $0x2f8] sm:$0xff]   ;;  %v1682_v61 = vld [vmem:[%s2102_s1 + $0x300] sm:$0xff]   ;;  %vm1710_vm0 = vmmov 0   ;;  %vm921_vm1 = vcmask 261120   ;;  %v1711_v5 = vmov 0.0|0.0  }
  0x5b   :  { %1535 = vmatpush3.bf16.msra.mxu1 %v1672_v47  ;;  %v318_v54 = vrot.slane %v297_v51, %v1856_v42  ;;  %v1678_v56 = vld [vmem:[%s2102_s1 + $0x238] sm:$0xff]   ;;  %v319_v63 = vcombine.high %v304_v58, %v304_v58  ;;  %v296_v0 = vrot.slane %v282_v60, %v1856_v42  ;;  %v1683_v1 = vld [vmem:[%s2102_s1 + $0x308] sm:$0xff]   ;;  %v1208_v3 = vld [vmem:[%s2104_s3] sm:$0xff]  ;;  %vm1206_vm2 = vcmask 254976  }
  0x5c   :  { %1536 = vmatprep.subr.bf16.mxu1 %v1675_v49  ;;  %v1680_v59 = vld [vmem:[%s2102_s1 + $0x2b8] sm:$0xff]   ;;  %v1209_v4 = vld [vmem:[%s2104_s3 + $0x8] sm:$0xff]  ;;  %v1312_v10 = vld [vmem:[%s2103_s2] ss:$0 sm:$0xff]  ;;  %s1712_s2 = smov [#allocation3]  }
  0x5d   :  { %1515 = vmatpush3.bf16.msra.mxu0 %v1674_v50  ;;  %1117 = vmatprep.mubr.bf16.mxu0 %v318_v54  ;;  %v320_v57 = vcombine.high %v318_v54, %v318_v54  ;;  %v311_v2 = vrot.slane %v296_v0, %v1856_v42  ;;  %v1574_v6 = vpack.c.bf16 %v1209_v4, %v1208_v3  ;;  %v1210_v42 = vld [vmem:[%s2104_s3 + $0x10] sm:$0xff]  ;;  %v1211_v7 = vld [vmem:[%s2104_s3 + $0x18] sm:$0xff]  ;;  %s1300_s3 = sshll.u32 %s1712_s2, 4  ;;  %s1301_s3 = int_to_ptr.vmem [resolvable:$true] %s1300_s3 }
  0x5e   :  { %1516 = vmatprep.subr.bf16.mxu0 %v1677_v52  ;;  %v1577_v8 = vpack.c.bf16 %v1211_v7, %v1210_v42  ;;  %s1684_s4 = scalar_lea.vmem %s1301_s3, 32  ;;  %p1689_p1 = scmp.lt.s32.totalorder %s1301_s3, %s1301_s3 }
  0x5f   :  { %1537 = vmatpush3.bf16.msra.mxu1 %v1676_v53  ;;  %1157 = vmatprep.mubr.bf16.mxu1 %v320_v57  ;;  %p1685_p0 = scmp.ne.s32.totalorder %s1301_s3, %s1684_s4  ;;  %p1690_p2 = scmp.lt.s32.totalorder %s1684_s4, %s1684_s4 }
  0x60   :  { %1538 = vmatprep.subr.bf16.mxu1 %v1679_v55 }
  0x61   :  { %1517 = vmatpush3.bf16.msra.mxu0 %v1678_v56  ;;  %p1691_p3 = por %p1690_p2, %p1689_p1 }
  0x62   :  { %1554 = vmatprep.subr.bf16.mxu0 %v1709_v62 }
  0x63   :  { %1539 = vmatpush3.bf16.msra.mxu1 %v1680_v59  ;;  %p1692_p4 = pnand %p1691_p3, %p1685_p0 }
  0x64   :  { %1118 = vmatmul.mubr.bf16.vlgmr.msra.gmra.mrb[8].mxu0 %v304_v58  ;;  %1573 = vmatprep.subr.bf16.mxu1 %v1711_v5 }
  0x65   :  { %1555 = vmatpush3.bf16.msra.mxu0 %v1682_v61  ;;  %1558 = vmatprep.mubr.msk.bf16.mxu0 %vm1710_vm0, %v1709_v62 }
  0x66   :  { %1158 = vmatmul.mubr.bf16.vlgmr.msra.gmra.mrb[8].mxu1 %v319_v63  ;;  %1556 = vmatprep.subr.bf16.mxu0 %v1709_v62 }
  0x67   :  { %1570 = vmatprep.mubr.msk.f32.mxu1 %vm1710_vm0, %v1709_v62  ;;  %1575 = vmatpush3.bf16.msra.mxu1 %v1574_v6 }
  0x68   :  { %1576 = vmatprep.subr.bf16.mxu1 %v1711_v5 }
  0x69   :  { %1557 = vmatpush3.bf16.msra.mxu0 %v1683_v1 }
  0x6b   :  { %1578 = vmatpush3.bf16.msra.mxu1 %v1577_v8 }
  0x6c   :  { %1559 = vmatmul.mubr.msk.bf16.vlgmr.msra.gmra.mrb[12].mxu0 %vm921_vm1, %v311_v2 }
  0xf7   :  { %v1430_v9 = vpop.f32.mrb[0].mxu0 }
  0xf8   :  { %v1431_v11 = vpop.f32.mrb[1].mxu0 }
  0xf9   :  { %v1432_v12 = vadd.f32 %v1431_v11, %v1430_v9  ;;  %v1433_v13 = vpop.f32.mrb[2].mxu0  ;;  %v1452_v14 = vpop.f32.mrb[0].mxu1 }
  0xfa   :  { %v1434_v15 = vpop.f32.mrb[3].mxu0  ;;  %v1453_v16 = vpop.f32.mrb[1].mxu1 }
  0xfb   :  { %v960_v17 = vadd.f32 %v1432_v12, %v1312_v10  ;;  %v1454_v18 = vadd.f32 %v1453_v16, %v1452_v14  ;;  %v1455_v19 = vpop.f32.mrb[2].mxu1 }
  0xfc   :  { %v1456_v20 = vpop.f32.mrb[3].mxu1 }
  0xfd   :  { %v1000_v21 = vadd.f32 %v1454_v18, %v960_v17 }
 0x117   :  { %v1474_v22 = vpop.f32.mrb[4].mxu0 }
 0x118   :  { %v1475_v23 = vpop.f32.mrb[5].mxu0 }
 0x119   :  { %v1476_v24 = vadd.f32 %v1475_v23, %v1474_v22  ;;  %v1477_v25 = vpop.f32.mrb[6].mxu0  ;;  %v1496_v26 = vpop.f32.mrb[4].mxu1 }
 0x11a   :  { %v1478_v27 = vpop.f32.mrb[7].mxu0  ;;  %v1497_v28 = vpop.f32.mrb[5].mxu1 }
 0x11b   :  { %v1040_v29 = vadd.f32 %v1476_v24, %v1000_v21  ;;  %v1498_v30 = vadd.f32 %v1497_v28, %v1496_v26  ;;  %v1499_v31 = vpop.f32.mrb[6].mxu1 }
 0x11c   :  { %v1500_v32 = vpop.f32.mrb[7].mxu1 }
 0x11d   :  { %v1080_v33 = vadd.f32 %v1498_v30, %v1040_v29 }
 0x137   :  { %v1518_v34 = vpop.f32.mrb[8].mxu0 }
 0x138   :  { %v1519_v35 = vpop.f32.mrb[9].mxu0 }
 0x139   :  { %v1520_v36 = vadd.f32 %v1519_v35, %v1518_v34  ;;  %v1540_v37 = vpop.f32.mrb[8].mxu1  ;;  %v1521_v38 = vpop.f32.mrb[10].mxu0 }
 0x13a   :  { %v1541_v39 = vpop.f32.mrb[9].mxu1  ;;  %v1522_v40 = vpop.f32.mrb[11].mxu0 }
 0x13b   :  { %v1120_v41 = vadd.f32 %v1520_v36, %v1080_v33  ;;  %v1542_v43 = vadd.f32 %v1541_v39, %v1540_v37  ;;  %v1543_v44 = vpop.f32.mrb[10].mxu1 }
 0x13c   :  { %v1544_v45 = vpop.f32.mrb[11].mxu1 }
 0x13d   :  { %v1160_v46 = vadd.f32 %v1542_v43, %v1120_v41 }
 0x13f   :  { %v1199_v47 = vpop.f32.mrb[12].mxu0 }
 0x140   :  { %v1200_v48 = vadd.f32 %v1199_v47, %v1160_v46  ;;  %v1560_v49 = vpop.f32.mrb[13].mxu0 }
 0x141   :  { %v1202_v50 = vpop.f32.mrb[14].mxu0 }
 0x142   :  { %v1205_v51 = vmax.f32 %v1200_v48, 0.0  ;;  %v1561_v52 = vpop.f32.mrb[15].mxu0 }
 0x144   :  { %1571 = vmatmul.mubr.msk.f32.vlgmr.msra.gmra.mrb[12].mxu1 %vm921_vm1, %v1205_v51  ;;  %1207 = vst.msk [vmem:[#allocation3] sm:$0x3] %vm1206_vm2, %v1205_v51 }
 0x145   :  { %1695 = shalt.err (!%p1692_p4)
}
 0x146   :  { %s1696_s0 = scalar_lea.hbm %s2106_s5, 32 }
 0x147   :  { %p1697_p5 = scmp.ne.s32.totalorder %s2106_s5, %s1696_s0  ;;  %p1700_p6 = scmp.lt.u32.totalorder %s1696_s0, %s2106_s5 }
 0x149   :  { %p1702_p7 = pnand %p1700_p6, %p1697_p5 }
 0x14b   :  { %1705 = shalt.err (!%p1702_p7)
}
 0x14c   :  { %1303 = dma.vmem_to_hbm [thread:$0]  %s1301_s3, 32, %s2106_s5, [#allocation4]   ;;  %v1412_v53 = vld [vmem:[#allocation2] ss:$0 sm:$0xff]  ;;  %vm1292_vm3 = vcmask 1024  }
 0x217   :  { %v1288_v54 = vpop.f32.mrb[12].mxu1 }
 0x218   :  { %v1289_v55 = vadd.f32 %v1412_v53, %v1288_v54  ;;  %v1572_v56 = vpop.f32.mrb[13].mxu1 }
 0x21a   :  { %1293 = vst.msk [vmem:[%s2107_s6] sm:$0x3] %vm1292_vm3, %v1289_v55 }
 0x21b   :  { %1706 = dma.done.wait [#allocation4], 32  }
 0x21c   :  { %1707 = vsyncadd [#allocation4], 4294967264 }
 0x21d   :  { %1311 = vsyncpa [#allocation4], 1 }

</bundles_post_ra>
